<compile_context>
chip_gen: v6e
topology: v6e:2x2x1
jax: 0.10.0
libtpu: 0.0.40
codegen_flags: <defaults>
</compile_context>

<pallas_src>
import numpy as np
from functools import partial

import jax
import jax.numpy as jnp
from jax import lax
from jax.experimental import pallas as pl
from jax.experimental.pallas import tpu as pltpu


def _gates_to_hc(gates, c_prev, H):
    """PyTorch LSTM gate order (i, f, g, o); all gate math in f32 on the VPU/EUP."""
    i_g = jax.nn.sigmoid(gates[:, 0 * H:1 * H])
    f_g = jax.nn.sigmoid(gates[:, 1 * H:2 * H])
    g_g = jnp.tanh(gates[:, 2 * H:3 * H])
    o_g = jax.nn.sigmoid(gates[:, 3 * H:4 * H])
    c_new = f_g * c_prev + i_g * g_g
    h_new = o_g * jnp.tanh(c_new)
    return h_new, c_new


def _generative_model_kernel(ids_ref,              # (1, 1, TC*Bg, 1) int32 VMEM
                             emb_ref,              # (V, E)  bf16 VMEM (resident)
                             h0_ref, c0_ref,       # (L, Bg, H) f32
                             wih0_ref,             # (E, 4H) bf16  layer-0 input proj
                             whh0_ref,             # (H, 4H) bf16  layer-0 recurrent
                             wr_ref,               # (L-1, 2H, 4H) bf16 fused [W_ih; W_hh]
                             b0_ref,               # (1, 4H) f32   (b_ih + b_hh) layer 0
                             br_ref,               # (L-1, 1, 4H) f32
                             wlin_ref,             # (H, O) bf16
                             blin_ref,             # (1, O) f32
                             logits_ref,           # (TC, Bg, O) f32 out block
                             hout_ref, cout_ref,   # (L, Bg, H) f32 out
                             h_state, c_state,     # (L, Bg, H) f32 scratch (carried)
                             xproj_buf):           # (TC*Bg, 4H) f32 scratch
    c = pl.program_id(1)
    last_c = pl.num_programs(1) - 1
    L, Bg, H = h_state.shape
    V, _ = emb_ref.shape
    TCB = ids_ref.shape[2]
    TC = TCB // Bg

    # Load the initial hidden state once per batch group; it then stays
    # resident in VMEM scratch across all time chunks of this group.
    @pl.when(c == 0)
    def _():
        h_state[...] = h0_ref[...]
        c_state[...] = c0_ref[...]

    # --- nn.Embedding: one-hot(ids) @ emb on the MXU against the resident
    #     bf16 table, batched over the whole chunk (no HBM gather DMAs) ------
    ids_col = ids_ref[0, 0]                                          # (TC*Bg, 1) int32
    onehot = jnp.where(
        ids_col == lax.broadcasted_iota(jnp.int32, (TCB, V), 1),
        1.0, 0.0).astype(jnp.bfloat16)                               # (TC*Bg, V)
    x = jnp.dot(onehot, emb_ref[...],
                preferred_element_type=jnp.float32)                  # exact bf16 rows, f32

    # --- layer-0 input projection for ALL chunk steps in one matmul (M=TC*Bg)
    xproj_buf[...] = (jnp.dot(x.astype(jnp.bfloat16), wih0_ref[...],
                              preferred_element_type=jnp.float32)
                      + b0_ref[...])                                 # (TC*Bg, 4H) f32

    # --- recurrent path: only h_prev @ W_hh (K = H) per layer is sequential --
    hs = [h_state[l] for l in range(L)]
    cs = [c_state[l] for l in range(L)]
    for s in range(TC):                       # static unroll, TC is small
        gates0 = (xproj_buf[s * Bg:(s + 1) * Bg, :]
                  + jnp.dot(hs[0].astype(jnp.bfloat16), whh0_ref[...],
                            preferred_element_type=jnp.float32))
        hs[0], cs[0] = _gates_to_hc(gates0, cs[0], H)
        # TODO(synk): nn.LSTM inter-layer dropout (p=0.2) is training-mode only;
        # eval-mode semantics (no dropout) are implemented here.
        for l in range(1, L):
            xh = jnp.concatenate([hs[l - 1].astype(jnp.bfloat16),
                                  hs[l].astype(jnp.bfloat16)], axis=-1)   # (Bg, 2H)
            gates = (jnp.dot(xh, wr_ref[l - 1],
                             preferred_element_type=jnp.float32)
                     + br_ref[l - 1])
            hs[l], cs[l] = _gates_to_hc(gates, cs[l], H)

        # --- nn.Linear head on the last layer's hidden state -----------------
        logits_ref[s] = (jnp.dot(hs[L - 1].astype(jnp.bfloat16), wlin_ref[...],
                                 preferred_element_type=jnp.float32)
                         + blin_ref[...])

    for l in range(L):
        h_state[l] = hs[l]
        c_state[l] = cs[l]

    # Export carried state only once, on the final chunk of this batch group.
    @pl.when(c == last_c)
    def _():
        hout_ref[...] = h_state[...]
        cout_ref[...] = c_state[...]


@partial(jax.jit, static_argnames=("tc", "groups", "single_buffer"))
def _sequence_impl(ids4, h0, c0, emb, wih0, whh0, wr, b0, br, w_lin, b_lin,
                   *, tc, groups, single_buffer):
    C, G, TCB, _ = ids4.shape
    L, B, H = h0.shape
    V, E = emb.shape
    O = w_lin.shape[1]
    T = C * tc
    Bg = B // groups
    assert G == groups and TCB == tc * Bg

    def const_spec(shape):
        ndim = len(shape)
        idx = lambda g, c: (0,) * ndim
        if single_buffer:
            # constant index_map => double buffering is pure VMEM waste
            return pl.BlockSpec(shape, idx, pipeline_mode=pl.Buffered(1))
        return pl.BlockSpec(shape, idx)

    grid_spec = pltpu.PrefetchScalarGridSpec(
        num_scalar_prefetch=0,
        grid=(groups, C),        # (batch group ["parallel"], time chunk ["arbitrary"])
        in_specs=[
            pl.BlockSpec((1, 1, TCB, 1), lambda g, c: (c, g, 0, 0)),   # token ids chunk
            const_spec((V, E)),                                        # embedding (resident)
            pl.BlockSpec((L, Bg, H), lambda g, c: (0, g, 0)),          # h0
            pl.BlockSpec((L, Bg, H), lambda g, c: (0, g, 0)),          # c0
            const_spec((E, 4 * H)),                                    # W_ih layer 0
            const_spec((H, 4 * H)),                                    # W_hh layer 0
            const_spec((L - 1, 2 * H, 4 * H)),                         # fused W layers 1..
            const_spec((1, 4 * H)),                                    # bias layer 0
            const_spec((L - 1, 1, 4 * H)),                             # bias layers 1..
            const_spec((H, O)),                                        # W linear
            const_spec((1, O)),                                        # b linear
        ],
        out_specs=(
            pl.BlockSpec((tc, Bg, O), lambda g, c: (c, g, 0)),         # logits per chunk
            pl.BlockSpec((L, Bg, H), lambda g, c: (0, g, 0)),          # h_out
            pl.BlockSpec((L, Bg, H), lambda g, c: (0, g, 0)),          # c_out
        ),
        scratch_shapes=[
            pltpu.VMEM((L, Bg, H), jnp.float32),        # carried h state
            pltpu.VMEM((L, Bg, H), jnp.float32),        # carried c state
            pltpu.VMEM((tc * Bg, 4 * H), jnp.float32),  # chunk input projection
        ],
    )

    flops = int(T * B * (2 * V * E + 2 * E * 4 * H + 2 * H * 4 * H
                         + 2 * (L - 1) * 2 * H * 4 * H + 2 * H * O))
    transcendentals = int(T * B * L * 5 * H)
    bytes_accessed = int(
        2 * (V * E + (E + H) * 4 * H + (L - 1) * 2 * H * 4 * H + H * O)   # bf16 weights+emb
        + 4 * (L * 4 * H + O)                                             # f32 biases
        + 4 * T * B                                                       # ids
        + 4 * T * B * O                                                   # logits
        + 4 * 4 * L * B * H)                                              # state in + out

    logits, h_out, c_out = pl.pallas_call(
        _generative_model_kernel,
        out_shape=(
            jax.ShapeDtypeStruct((T, B, O), jnp.float32),
            jax.ShapeDtypeStruct((L, B, H), jnp.float32),
            jax.ShapeDtypeStruct((L, B, H), jnp.float32),
        ),
        grid_spec=grid_spec,
        compiler_params=pltpu.CompilerParams(
            dimension_semantics=("parallel", "arbitrary"),
            vmem_limit_bytes=32 * 1024 * 1024),
        cost_estimate=pl.CostEstimate(flops=flops,
                                      transcendentals=transcendentals,
                                      bytes_accessed=bytes_accessed),
    )(ids4, emb, h0, c0, wih0, whh0, wr, b0, br, w_lin, b_lin)
    return logits, h_out, c_out


_TC_MAX = 4                    # timesteps per grid step (amortizes grid overhead)
_single_buffer_ok = [True]     # flipped off if pl.Buffered(1) is rejected


def _num_tensorcores():
    """TensorCores addressable by one kernel launch (megacore / dual-TC chips)."""
    try:
        kind = jax.devices()[0].device_kind.lower()
    except Exception:
        return 1
    return 2 if ("v4" in kind or "v5p" in kind or "v7" in kind) else 1


def _pick_chunk(T):
    for d in range(min(T, _TC_MAX), 0, -1):
        if T % d == 0:
            return d
    return 1


def generative_model_sequence(ids_tb, hidden, params):
    """Run T LSTM steps in one kernel launch. ids_tb: (T, B) int32."""
    h0, c0 = hidden
    L, B, H = h0.shape
    T = ids_tb.shape[0]
    assert L >= 2, "kernel is specialised for n_layers >= 2 (the module uses 3)"

    tc = _pick_chunk(T)
    C = T // tc
    groups = _num_tensorcores()
    if groups < 1 or B % (8 * groups) != 0:
        groups = 1
    Bg = B // groups
    # (T, B) -> (C, groups, tc*Bg, 1): contiguous per-(chunk, group) id column.
    ids4 = (ids_tb.astype(jnp.int32)
            .reshape(C, tc, groups, Bg)
            .transpose(0, 2, 1, 3)
            .reshape(C, groups, tc * Bg, 1))

    args = (ids4, h0, c0, params["emb"], params["wih0"], params["whh0"],
            params["wr"], params["b0"], params["br"],
            params["w_lin"], params["b_lin"])

    if _single_buffer_ok[0]:
        try:
            logits, hT, cT = _sequence_impl(*args, tc=tc, groups=groups,
                                            single_buffer=True)
            return logits, (hT, cT)
        except Exception:
            _single_buffer_ok[0] = False   # pl.Buffered(1) unsupported here
    logits, hT, cT = _sequence_impl(*args, tc=tc, groups=groups,
                                    single_buffer=False)
    return logits, (hT, cT)


def generative_model_forward(ids, hidden, params):
    """Matches the PyTorch module forward: ids (B,) int32, one timestep."""
    logits, hidden_out = generative_model_sequence(
        ids.reshape(1, -1).astype(jnp.int32), hidden, params)
    return logits[0], hidden_out


def init_params(key, V, E, H, L, O):
    """Deterministic init. Matmul weights pre-transposed to (in, out) and stored
    bf16 (f32 accumulation in the kernel); layer-0 kept split (W_ih / W_hh),
    layers 1..L-1 pre-concatenated along K; biases pre-summed (b_ih + b_hh)."""
    ks = jax.random.split(key, 11)
    s = 1.0 / float(np.sqrt(H))

    emb = jax.random.normal(ks[0], (V, E), jnp.float32).astype(jnp.bfloat16)

    wih0 = jax.random.uniform(ks[1], (E, 4 * H), jnp.float32, -s, s).astype(jnp.bfloat16)
    whh0 = jax.random.uniform(ks[2], (H, 4 * H), jnp.float32, -s, s).astype(jnp.bfloat16)
    b0 = (jax.random.uniform(ks[3], (1, 4 * H), jnp.float32, -s, s)
          + jax.random.uniform(ks[4], (1, 4 * H), jnp.float32, -s, s))

    wih_r = jax.random.uniform(ks[5], (L - 1, H, 4 * H), jnp.float32, -s, s)
    whh_r = jax.random.uniform(ks[6], (L - 1, H, 4 * H), jnp.float32, -s, s)
    wr = jnp.concatenate([wih_r, whh_r], axis=1).astype(jnp.bfloat16)
    br = (jax.random.uniform(ks[7], (L - 1, 1, 4 * H), jnp.float32, -s, s)
          + jax.random.uniform(ks[8], (L - 1, 1, 4 * H), jnp.float32, -s, s))

    w_lin = jax.random.uniform(ks[9], (H, O), jnp.float32, -s, s).astype(jnp.bfloat16)
    b_lin = jax.random.uniform(ks[10], (1, O), jnp.float32, -s, s)

    return dict(emb=emb, wih0=wih0, whh0=whh0, b0=b0, wr=wr, br=br,
                w_lin=w_lin, b_lin=b_lin)


def reference_step(ids, hidden, params):
    """Pure-JAX single-step reference with the same bf16-weight numerics."""
    h0, c0 = hidden
    L, _, H = h0.shape

    def gate(gates, c_prev):
        i_g = jax.nn.sigmoid(gates[:, 0 * H:1 * H])
        f_g = jax.nn.sigmoid(gates[:, 1 * H:2 * H])
        g_g = jnp.tanh(gates[:, 2 * H:3 * H])
        o_g = jax.nn.sigmoid(gates[:, 3 * H:4 * H])
        c_new = f_g * c_prev + i_g * g_g
        return o_g * jnp.tanh(c_new), c_new

    x = jnp.take(params["emb"], ids, axis=0)                        # (B, E) bf16
    gates0 = (jnp.dot(x, params["wih0"], preferred_element_type=jnp.float32)
              + jnp.dot(h0[0].astype(jnp.bfloat16), params["whh0"],
                        preferred_element_type=jnp.float32)
              + params["b0"])
    h, c = gate(gates0, c0[0])
    hs, cs = [h], [c]
    for l in range(1, L):
        xh = jnp.concatenate([h.astype(jnp.bfloat16),
                              h0[l].astype(jnp.bfloat16)], axis=-1)
        g = (jnp.dot(xh, params["wr"][l - 1],
                     preferred_element_type=jnp.float32) + params["br"][l - 1])
        h, c = gate(g, c0[l])
        hs.append(h); cs.append(c)
    logits = (jnp.dot(h.astype(jnp.bfloat16), params["w_lin"],
                      preferred_element_type=jnp.float32) + params["b_lin"])
    return logits, (jnp.stack(hs), jnp.stack(cs))


if __name__ == "__main__":
    # Small, lane-dense shapes consistent with the module:
    # batch=16, vocab=256, embedding=128, hidden=128, 3 LSTM layers, output=vocab.
    B, V, E, H, L = 16, 256, 128, 128, 3
    O = V

    key = jax.random.PRNGKey(0)
    k_ids, k_par, k_seq = jax.random.split(key, 3)

    params = init_params(k_par, V, E, H, L, O)
    ids = jax.random.randint(k_ids, (B,), 0, V, dtype=jnp.int32)

    # init_hidden(batch_size): zeros
    h0 = jnp.zeros((L, B, H), jnp.float32)
    c0 = jnp.zeros((L, B, H), jnp.float32)

    # --- single-step forward (exact module semantics) ---
    logits, (h1, c1) = generative_model_forward(ids, (h0, c0), params)
    jax.block_until_ready((logits, h1, c1))
    assert logits.shape == (B, O)
    assert h1.shape == (L, B, H) and c1.shape == (L, B, H)

    ref_logits, (ref_h, ref_c) = reference_step(ids, (h0, c0), params)
    np.testing.assert_allclose(np.asarray(logits), np.asarray(ref_logits),
                               rtol=1e-2, atol=1e-2)
    np.testing.assert_allclose(np.asarray(h1), np.asarray(ref_h), rtol=1e-2, atol=1e-2)
    np.testing.assert_allclose(np.asarray(c1), np.asarray(ref_c), rtol=1e-2, atol=1e-2)

    # --- multi-step: the in-kernel time loop keeps weights resident in VMEM ---
    T = 8
    ids_seq = jax.random.randint(k_seq, (T, B), 0, V, dtype=jnp.int32)
    seq_logits, (hT, cT) = generative_model_sequence(ids_seq, (h0, c0), params)
    jax.block_until_ready((seq_logits, hT, cT))

    rh, rc = h0, c0
    ref_seq = []
    for t in range(T):
        lg, (rh, rc) = reference_step(ids_seq[t], (rh, rc), params)
        ref_seq.append(lg)
    np.testing.assert_allclose(np.asarray(seq_logits), np.asarray(jnp.stack(ref_seq)),
                               rtol=1e-2, atol=1e-2)
    np.testing.assert_allclose(np.asarray(hT), np.asarray(rh), rtol=1e-2, atol=1e-2)
    np.testing.assert_allclose(np.asarray(cT), np.asarray(rc), rtol=1e-2, atol=1e-2)

    print("KERNEL_OK")
</pallas_src>

<mosaic_0001>
module attributes {stable_mosaic.version = 11 : i64} {
  func.func @_generative_model_kernel(%arg0: i32, %arg1: i32, %arg2: memref<1x1x16x1xi32, #tpu.memory_space<vmem>>, %arg3: memref<256x128xbf16, #tpu.memory_space<vmem>>, %arg4: memref<3x16x128xf32, #tpu.memory_space<vmem>>, %arg5: memref<3x16x128xf32, #tpu.memory_space<vmem>>, %arg6: memref<128x512xbf16, #tpu.memory_space<vmem>>, %arg7: memref<128x512xbf16, #tpu.memory_space<vmem>>, %arg8: memref<2x256x512xbf16, #tpu.memory_space<vmem>>, %arg9: memref<1x512xf32, #tpu.memory_space<vmem>>, %arg10: memref<2x1x512xf32, #tpu.memory_space<vmem>>, %arg11: memref<128x256xbf16, #tpu.memory_space<vmem>>, %arg12: memref<1x256xf32, #tpu.memory_space<vmem>>, %arg13: memref<1x16x256xf32, #tpu.memory_space<vmem>>, %arg14: memref<3x16x128xf32, #tpu.memory_space<vmem>>, %arg15: memref<3x16x128xf32, #tpu.memory_space<vmem>>, %arg16: memref<3x16x128xf32, #tpu.memory_space<vmem>>, %arg17: memref<3x16x128xf32, #tpu.memory_space<vmem>>, %arg18: memref<16x512xf32, #tpu.memory_space<vmem>>) attributes {dimension_semantics = [#tpu.dimension_semantics<parallel>, #tpu.dimension_semantics<arbitrary>], iteration_bounds = array<i64: 1, 1>, scalar_prefetch = 0 : i64, scratch_operands = 3 : i64, tpu.core_type = #tpu.core_type<tc>, window_params = [{transform_indices = @transform_0, window_bounds = array<i64: 1, 1, 16, 1>}, {pipeline_mode = #tpu.pipeline_mode<synchronous>, transform_indices = @transform_1, window_bounds = array<i64: 256, 128>}, {transform_indices = @transform_2, window_bounds = array<i64: 3, 16, 128>}, {transform_indices = @transform_3, window_bounds = array<i64: 3, 16, 128>}, {pipeline_mode = #tpu.pipeline_mode<synchronous>, transform_indices = @transform_4, window_bounds = array<i64: 128, 512>}, {pipeline_mode = #tpu.pipeline_mode<synchronous>, transform_indices = @transform_5, window_bounds = array<i64: 128, 512>}, {pipeline_mode = #tpu.pipeline_mode<synchronous>, transform_indices = @transform_6, window_bounds = array<i64: 2, 256, 512>}, {pipeline_mode = #tpu.pipeline_mode<synchronous>, transform_indices = @transform_7, window_bounds = array<i64: 1, 512>}, {pipeline_mode = #tpu.pipeline_mode<synchronous>, transform_indices = @transform_8, window_bounds = array<i64: 2, 1, 512>}, {pipeline_mode = #tpu.pipeline_mode<synchronous>, transform_indices = @transform_9, window_bounds = array<i64: 128, 256>}, {pipeline_mode = #tpu.pipeline_mode<synchronous>, transform_indices = @transform_10, window_bounds = array<i64: 1, 256>}, {transform_indices = @transform_11, window_bounds = array<i64: 1, 16, 256>}, {transform_indices = @transform_12, window_bounds = array<i64: 3, 16, 128>}, {transform_indices = @transform_13, window_bounds = array<i64: 3, 16, 128>}]} {
    %c0_i32 = arith.constant 0 : i32
    %0 = arith.cmpi eq, %arg1, %c0_i32 : i32
    %1 = arith.extui %0 : i1 to i32
    %c0_i32_0 = arith.constant 0 : i32
    %2 = arith.cmpi ne, %1, %c0_i32_0 : i32
    scf.if %2 {
      %c0_87 = arith.constant 0 : index
      %c0_88 = arith.constant 0 : index
      %c0_89 = arith.constant 0 : index
      %163 = vector.load %arg4[%c0_87, %c0_88, %c0_89] : memref<3x16x128xf32, #tpu.memory_space<vmem>>, vector<3x16x128xf32>
      %c0_90 = arith.constant 0 : index
      %c0_91 = arith.constant 0 : index
      %c0_92 = arith.constant 0 : index
      %164 = vector.load %arg16[%c0_90, %c0_91, %c0_92] : memref<3x16x128xf32, #tpu.memory_space<vmem>>, vector<3x16x128xf32>
      tpu.vector_store %arg16[%c0_90, %c0_91, %c0_92], %163 {strides = array<i32>} : memref<3x16x128xf32, #tpu.memory_space<vmem>>, vector<3x16x128xf32>,
      %c0_93 = arith.constant 0 : index
      %c0_94 = arith.constant 0 : index
      %c0_95 = arith.constant 0 : index
      %165 = vector.load %arg5[%c0_93, %c0_94, %c0_95] : memref<3x16x128xf32, #tpu.memory_space<vmem>>, vector<3x16x128xf32>
      %c0_96 = arith.constant 0 : index
      %c0_97 = arith.constant 0 : index
      %c0_98 = arith.constant 0 : index
      %166 = vector.load %arg17[%c0_96, %c0_97, %c0_98] : memref<3x16x128xf32, #tpu.memory_space<vmem>>, vector<3x16x128xf32>
      tpu.vector_store %arg17[%c0_96, %c0_97, %c0_98], %165 {strides = array<i32>} : memref<3x16x128xf32, #tpu.memory_space<vmem>>, vector<3x16x128xf32>,
    } else {
    }
    %c0 = arith.constant 0 : index
    %c0_1 = arith.constant 0 : index
    %c0_2 = arith.constant 0 : index
    %c0_3 = arith.constant 0 : index
    %3 = vector.load %arg2[%c0, %c0_1, %c0_2, %c0_3] : memref<1x1x16x1xi32, #tpu.memory_space<vmem>>, vector<1x1x16x1xi32>
    %4 = vector.shape_cast %3 : vector<1x1x16x1xi32> to vector<16x1xi32>
    %5 = tpu.iota {dimensions = array<i32: 1>} : vector<16x256xi32>
    %6 = vector.broadcast %4 : vector<16x1xi32> to vector<16x256xi32>
    %7 = arith.cmpi eq, %6, %5 : vector<16x256xi32>
    %cst = arith.constant 1.000000e+00 : f32
    %cst_4 = arith.constant 0.000000e+00 : f32
    %8 = vector.broadcast %cst : f32 to vector<16x256xf32>
    %9 = vector.broadcast %cst_4 : f32 to vector<16x256xf32>
    %10 = arith.select %7, %8, %9 : vector<16x256xi1>, vector<16x256xf32>
    %11 = arith.truncf %10 : vector<16x256xf32> to vector<16x256xbf16>
    %c0_5 = arith.constant 0 : index
    %c0_6 = arith.constant 0 : index
    %12 = vector.load %arg3[%c0_5, %c0_6] : memref<256x128xbf16, #tpu.memory_space<vmem>>, vector<256x128xbf16>
    %cst_7 = arith.constant dense<0.000000e+00> : vector<16x128xf32>
    %13 = tpu.matmul %11, %12, %cst_7 {dimension_numbers = #tpu.dot_dimension_numbers<[1], [0], [0], [1], [0, 0, 1, 1], [], []>} : vector<16x256xbf16>, vector<256x128xbf16>, vector<16x128xf32> -> vector<16x128xf32>
    %14 = arith.truncf %13 : vector<16x128xf32> to vector<16x128xbf16>
    %c0_8 = arith.constant 0 : index
    %c0_9 = arith.constant 0 : index
    %15 = vector.load %arg6[%c0_8, %c0_9] : memref<128x512xbf16, #tpu.memory_space<vmem>>, vector<128x512xbf16>
    %cst_10 = arith.constant dense<0.000000e+00> : vector<16x512xf32>
    %16 = tpu.matmul %14, %15, %cst_10 {dimension_numbers = #tpu.dot_dimension_numbers<[1], [0], [0], [1], [0, 0, 1, 1], [], []>} : vector<16x128xbf16>, vector<128x512xbf16>, vector<16x512xf32> -> vector<16x512xf32>
    %c0_11 = arith.constant 0 : index
    %c0_12 = arith.constant 0 : index
    %17 = vector.load %arg9[%c0_11, %c0_12] : memref<1x512xf32, #tpu.memory_space<vmem>>, vector<1x512xf32>
    %18 = vector.broadcast %17 : vector<1x512xf32> to vector<16x512xf32>
    %19 = arith.addf %16, %18 : vector<16x512xf32>
    %c0_13 = arith.constant 0 : index
    %c0_14 = arith.constant 0 : index
    %20 = vector.load %arg18[%c0_13, %c0_14] : memref<16x512xf32, #tpu.memory_space<vmem>>, vector<16x512xf32>
    tpu.vector_store %arg18[%c0_13, %c0_14], %19 {strides = array<i32>} : memref<16x512xf32, #tpu.memory_space<vmem>>, vector<16x512xf32>,
    %c0_15 = arith.constant 0 : index
    %c0_16 = arith.constant 0 : index
    %c0_17 = arith.constant 0 : index
    %21 = vector.load %arg16[%c0_15, %c0_16, %c0_17] : memref<3x16x128xf32, #tpu.memory_space<vmem>>, vector<1x16x128xf32>
    %22 = vector.shape_cast %21 : vector<1x16x128xf32> to vector<16x128xf32>
    %c1 = arith.constant 1 : index
    %c0_18 = arith.constant 0 : index
    %c0_19 = arith.constant 0 : index
    %23 = vector.load %arg16[%c1, %c0_18, %c0_19] : memref<3x16x128xf32, #tpu.memory_space<vmem>>, vector<1x16x128xf32>
    %24 = vector.shape_cast %23 : vector<1x16x128xf32> to vector<16x128xf32>
    %c2 = arith.constant 2 : index
    %c0_20 = arith.constant 0 : index
    %c0_21 = arith.constant 0 : index
    %25 = vector.load %arg16[%c2, %c0_20, %c0_21] : memref<3x16x128xf32, #tpu.memory_space<vmem>>, vector<1x16x128xf32>
    %26 = vector.shape_cast %25 : vector<1x16x128xf32> to vector<16x128xf32>
    %c0_22 = arith.constant 0 : index
    %c0_23 = arith.constant 0 : index
    %c0_24 = arith.constant 0 : index
    %27 = vector.load %arg17[%c0_22, %c0_23, %c0_24] : memref<3x16x128xf32, #tpu.memory_space<vmem>>, vector<1x16x128xf32>
    %28 = vector.shape_cast %27 : vector<1x16x128xf32> to vector<16x128xf32>
    %c1_25 = arith.constant 1 : index
    %c0_26 = arith.constant 0 : index
    %c0_27 = arith.constant 0 : index
    %29 = vector.load %arg17[%c1_25, %c0_26, %c0_27] : memref<3x16x128xf32, #tpu.memory_space<vmem>>, vector<1x16x128xf32>
    %30 = vector.shape_cast %29 : vector<1x16x128xf32> to vector<16x128xf32>
    %c2_28 = arith.constant 2 : index
    %c0_29 = arith.constant 0 : index
    %c0_30 = arith.constant 0 : index
    %31 = vector.load %arg17[%c2_28, %c0_29, %c0_30] : memref<3x16x128xf32, #tpu.memory_space<vmem>>, vector<1x16x128xf32>
    %32 = vector.shape_cast %31 : vector<1x16x128xf32> to vector<16x128xf32>
    %c0_31 = arith.constant 0 : index
    %c0_32 = arith.constant 0 : index
    %33 = vector.load %arg18[%c0_31, %c0_32] : memref<16x512xf32, #tpu.memory_space<vmem>>, vector<16x512xf32>
    %34 = arith.truncf %22 : vector<16x128xf32> to vector<16x128xbf16>
    %c0_33 = arith.constant 0 : index
    %c0_34 = arith.constant 0 : index
    %35 = vector.load %arg7[%c0_33, %c0_34] : memref<128x512xbf16, #tpu.memory_space<vmem>>, vector<128x512xbf16>
    %cst_35 = arith.constant dense<0.000000e+00> : vector<16x512xf32>
    %36 = tpu.matmul %34, %35, %cst_35 {dimension_numbers = #tpu.dot_dimension_numbers<[1], [0], [0], [1], [0, 0, 1, 1], [], []>} : vector<16x128xbf16>, vector<128x512xbf16>, vector<16x512xf32> -> vector<16x512xf32>
    %37 = arith.addf %33, %36 : vector<16x512xf32>
    %38 = vector.extract_strided_slice %37 {offsets = [0, 0], sizes = [16, 128], strides = [1, 1]} : vector<16x512xf32> to vector<16x128xf32>
    %39 = arith.negf %38 : vector<16x128xf32>
    %40 = math.exp %39 : vector<16x128xf32>
    %cst_36 = arith.constant 1.000000e+00 : f32
    %41 = vector.broadcast %cst_36 : f32 to vector<16x128xf32>
    %42 = arith.addf %41, %40 : vector<16x128xf32>
    %43 = arith.divf %41, %42 : vector<16x128xf32>
    %44 = vector.extract_strided_slice %37 {offsets = [0, 128], sizes = [16, 128], strides = [1, 1]} : vector<16x512xf32> to vector<16x128xf32>
    %45 = arith.negf %44 : vector<16x128xf32>
    %46 = math.exp %45 : vector<16x128xf32>
    %cst_37 = arith.constant 1.000000e+00 : f32
    %47 = vector.broadcast %cst_37 : f32 to vector<16x128xf32>
    %48 = arith.addf %47, %46 : vector<16x128xf32>
    %49 = arith.divf %47, %48 : vector<16x128xf32>
    %50 = vector.extract_strided_slice %37 {offsets = [0, 256], sizes = [16, 128], strides = [1, 1]} : vector<16x512xf32> to vector<16x128xf32>
    %51 = math.tanh %50 : vector<16x128xf32>
    %52 = vector.extract_strided_slice %37 {offsets = [0, 384], sizes = [16, 128], strides = [1, 1]} : vector<16x512xf32> to vector<16x128xf32>
    %53 = arith.negf %52 : vector<16x128xf32>
    %54 = math.exp %53 : vector<16x128xf32>
    %cst_38 = arith.constant 1.000000e+00 : f32
    %55 = vector.broadcast %cst_38 : f32 to vector<16x128xf32>
    %56 = arith.addf %55, %54 : vector<16x128xf32>
    %57 = arith.divf %55, %56 : vector<16x128xf32>
    %58 = arith.mulf %49, %28 : vector<16x128xf32>
    %59 = arith.mulf %43, %51 : vector<16x128xf32>
    %60 = arith.addf %58, %59 : vector<16x128xf32>
    %61 = math.tanh %60 : vector<16x128xf32>
    %62 = arith.mulf %57, %61 : vector<16x128xf32>
    %63 = arith.truncf %62 : vector<16x128xf32> to vector<16x128xbf16>
    %64 = arith.truncf %24 : vector<16x128xf32> to vector<16x128xbf16>
    %65 = tpu.concatenate %63, %64 in 1 : vector<16x128xbf16>, vector<16x128xbf16> -> vector<16x256xbf16>
    %c0_39 = arith.constant 0 : index
    %c0_40 = arith.constant 0 : index
    %c0_41 = arith.constant 0 : index
    %66 = vector.load %arg8[%c0_39, %c0_40, %c0_41] : memref<2x256x512xbf16, #tpu.memory_space<vmem>>, vector<1x256x512xbf16>
    %67 = vector.shape_cast %66 : vector<1x256x512xbf16> to vector<256x512xbf16>
    %cst_42 = arith.constant dense<0.000000e+00> : vector<16x512xf32>
    %68 = tpu.matmul %65, %67, %cst_42 {dimension_numbers = #tpu.dot_dimension_numbers<[1], [0], [0], [1], [0, 0, 1, 1], [], []>} : vector<16x256xbf16>, vector<256x512xbf16>, vector<16x512xf32> -> vector<16x512xf32>
    %c0_43 = arith.constant 0 : index
    %c0_44 = arith.constant 0 : index
    %c0_45 = arith.constant 0 : index
    %69 = vector.load %arg10[%c0_43, %c0_44, %c0_45] : memref<2x1x512xf32, #tpu.memory_space<vmem>>, vector<1x1x512xf32>
    %70 = vector.shape_cast %69 : vector<1x1x512xf32> to vector<1x512xf32>
    %71 = vector.broadcast %70 : vector<1x512xf32> to vector<16x512xf32>
    %72 = arith.addf %68, %71 : vector<16x512xf32>
    %73 = vector.extract_strided_slice %72 {offsets = [0, 0], sizes = [16, 128], strides = [1, 1]} : vector<16x512xf32> to vector<16x128xf32>
    %74 = arith.negf %73 : vector<16x128xf32>
    %75 = math.exp %74 : vector<16x128xf32>
    %cst_46 = arith.constant 1.000000e+00 : f32
    %76 = vector.broadcast %cst_46 : f32 to vector<16x128xf32>
    %77 = arith.addf %76, %75 : vector<16x128xf32>
    %78 = arith.divf %76, %77 : vector<16x128xf32>
    %79 = vector.extract_strided_slice %72 {offsets = [0, 128], sizes = [16, 128], strides = [1, 1]} : vector<16x512xf32> to vector<16x128xf32>
    %80 = arith.negf %79 : vector<16x128xf32>
    %81 = math.exp %80 : vector<16x128xf32>
    %cst_47 = arith.constant 1.000000e+00 : f32
    %82 = vector.broadcast %cst_47 : f32 to vector<16x128xf32>
    %83 = arith.addf %82, %81 : vector<16x128xf32>
    %84 = arith.divf %82, %83 : vector<16x128xf32>
    %85 = vector.extract_strided_slice %72 {offsets = [0, 256], sizes = [16, 128], strides = [1, 1]} : vector<16x512xf32> to vector<16x128xf32>
    %86 = math.tanh %85 : vector<16x128xf32>
    %87 = vector.extract_strided_slice %72 {offsets = [0, 384], sizes = [16, 128], strides = [1, 1]} : vector<16x512xf32> to vector<16x128xf32>
    %88 = arith.negf %87 : vector<16x128xf32>
    %89 = math.exp %88 : vector<16x128xf32>
    %cst_48 = arith.constant 1.000000e+00 : f32
    %90 = vector.broadcast %cst_48 : f32 to vector<16x128xf32>
    %91 = arith.addf %90, %89 : vector<16x128xf32>
    %92 = arith.divf %90, %91 : vector<16x128xf32>
    %93 = arith.mulf %84, %30 : vector<16x128xf32>
    %94 = arith.mulf %78, %86 : vector<16x128xf32>
    %95 = arith.addf %93, %94 : vector<16x128xf32>
    %96 = math.tanh %95 : vector<16x128xf32>
    %97 = arith.mulf %92, %96 : vector<16x128xf32>
    %98 = arith.truncf %97 : vector<16x128xf32> to vector<16x128xbf16>
    %99 = arith.truncf %26 : vector<16x128xf32> to vector<16x128xbf16>
    %100 = tpu.concatenate %98, %99 in 1 : vector<16x128xbf16>, vector<16x128xbf16> -> vector<16x256xbf16>
    %c1_49 = arith.constant 1 : index
    %c0_50 = arith.constant 0 : index
    %c0_51 = arith.constant 0 : index
    %101 = vector.load %arg8[%c1_49, %c0_50, %c0_51] : memref<2x256x512xbf16, #tpu.memory_space<vmem>>, vector<1x256x512xbf16>
    %102 = vector.shape_cast %101 : vector<1x256x512xbf16> to vector<256x512xbf16>
    %cst_52 = arith.constant dense<0.000000e+00> : vector<16x512xf32>
    %103 = tpu.matmul %100, %102, %cst_52 {dimension_numbers = #tpu.dot_dimension_numbers<[1], [0], [0], [1], [0, 0, 1, 1], [], []>} : vector<16x256xbf16>, vector<256x512xbf16>, vector<16x512xf32> -> vector<16x512xf32>
    %c1_53 = arith.constant 1 : index
    %c0_54 = arith.constant 0 : index
    %c0_55 = arith.constant 0 : index
    %104 = vector.load %arg10[%c1_53, %c0_54, %c0_55] : memref<2x1x512xf32, #tpu.memory_space<vmem>>, vector<1x1x512xf32>
    %105 = vector.shape_cast %104 : vector<1x1x512xf32> to vector<1x512xf32>
    %106 = vector.broadcast %105 : vector<1x512xf32> to vector<16x512xf32>
    %107 = arith.addf %103, %106 : vector<16x512xf32>
    %108 = vector.extract_strided_slice %107 {offsets = [0, 0], sizes = [16, 128], strides = [1, 1]} : vector<16x512xf32> to vector<16x128xf32>
    %109 = arith.negf %108 : vector<16x128xf32>
    %110 = math.exp %109 : vector<16x128xf32>
    %cst_56 = arith.constant 1.000000e+00 : f32
    %111 = vector.broadcast %cst_56 : f32 to vector<16x128xf32>
    %112 = arith.addf %111, %110 : vector<16x128xf32>
    %113 = arith.divf %111, %112 : vector<16x128xf32>
    %114 = vector.extract_strided_slice %107 {offsets = [0, 128], sizes = [16, 128], strides = [1, 1]} : vector<16x512xf32> to vector<16x128xf32>
    %115 = arith.negf %114 : vector<16x128xf32>
    %116 = math.exp %115 : vector<16x128xf32>
    %cst_57 = arith.constant 1.000000e+00 : f32
    %117 = vector.broadcast %cst_57 : f32 to vector<16x128xf32>
    %118 = arith.addf %117, %116 : vector<16x128xf32>
    %119 = arith.divf %117, %118 : vector<16x128xf32>
    %120 = vector.extract_strided_slice %107 {offsets = [0, 256], sizes = [16, 128], strides = [1, 1]} : vector<16x512xf32> to vector<16x128xf32>
    %121 = math.tanh %120 : vector<16x128xf32>
    %122 = vector.extract_strided_slice %107 {offsets = [0, 384], sizes = [16, 128], strides = [1, 1]} : vector<16x512xf32> to vector<16x128xf32>
    %123 = arith.negf %122 : vector<16x128xf32>
    %124 = math.exp %123 : vector<16x128xf32>
    %cst_58 = arith.constant 1.000000e+00 : f32
    %125 = vector.broadcast %cst_58 : f32 to vector<16x128xf32>
    %126 = arith.addf %125, %124 : vector<16x128xf32>
    %127 = arith.divf %125, %126 : vector<16x128xf32>
    %128 = arith.mulf %119, %32 : vector<16x128xf32>
    %129 = arith.mulf %113, %121 : vector<16x128xf32>
    %130 = arith.addf %128, %129 : vector<16x128xf32>
    %131 = math.tanh %130 : vector<16x128xf32>
    %132 = arith.mulf %127, %131 : vector<16x128xf32>
    %133 = arith.truncf %132 : vector<16x128xf32> to vector<16x128xbf16>
    %c0_59 = arith.constant 0 : index
    %c0_60 = arith.constant 0 : index
    %134 = vector.load %arg11[%c0_59, %c0_60] : memref<128x256xbf16, #tpu.memory_space<vmem>>, vector<128x256xbf16>
    %cst_61 = arith.constant dense<0.000000e+00> : vector<16x256xf32>
    %135 = tpu.matmul %133, %134, %cst_61 {dimension_numbers = #tpu.dot_dimension_numbers<[1], [0], [0], [1], [0, 0, 1, 1], [], []>} : vector<16x128xbf16>, vector<128x256xbf16>, vector<16x256xf32> -> vector<16x256xf32>
    %c0_62 = arith.constant 0 : index
    %c0_63 = arith.constant 0 : index
    %136 = vector.load %arg12[%c0_62, %c0_63] : memref<1x256xf32, #tpu.memory_space<vmem>>, vector<1x256xf32>
    %137 = vector.broadcast %136 : vector<1x256xf32> to vector<16x256xf32>
    %138 = arith.addf %135, %137 : vector<16x256xf32>
    %c0_64 = arith.constant 0 : index
    %c0_65 = arith.constant 0 : index
    %c0_66 = arith.constant 0 : index
    %139 = vector.load %arg13[%c0_64, %c0_65, %c0_66] : memref<1x16x256xf32, #tpu.memory_space<vmem>>, vector<1x16x256xf32>
    %140 = vector.shape_cast %139 : vector<1x16x256xf32> to vector<16x256xf32>
    %141 = vector.shape_cast %138 : vector<16x256xf32> to vector<1x16x256xf32>
    tpu.vector_store %arg13[%c0_64, %c0_65, %c0_66], %141 {strides = array<i32>} : memref<1x16x256xf32, #tpu.memory_space<vmem>>, vector<1x16x256xf32>,
    %c0_67 = arith.constant 0 : index
    %c0_68 = arith.constant 0 : index
    %c0_69 = arith.constant 0 : index
    %142 = vector.load %arg16[%c0_67, %c0_68, %c0_69] : memref<3x16x128xf32, #tpu.memory_space<vmem>>, vector<1x16x128xf32>
    %143 = vector.shape_cast %142 : vector<1x16x128xf32> to vector<16x128xf32>
    %144 = vector.shape_cast %62 : vector<16x128xf32> to vector<1x16x128xf32>
    tpu.vector_store %arg16[%c0_67, %c0_68, %c0_69], %144 {strides = array<i32>} : memref<3x16x128xf32, #tpu.memory_space<vmem>>, vector<1x16x128xf32>,
    %c0_70 = arith.constant 0 : index
    %c0_71 = arith.constant 0 : index
    %c0_72 = arith.constant 0 : index
    %145 = vector.load %arg17[%c0_70, %c0_71, %c0_72] : memref<3x16x128xf32, #tpu.memory_space<vmem>>, vector<1x16x128xf32>
    %146 = vector.shape_cast %145 : vector<1x16x128xf32> to vector<16x128xf32>
    %147 = vector.shape_cast %60 : vector<16x128xf32> to vector<1x16x128xf32>
    tpu.vector_store %arg17[%c0_70, %c0_71, %c0_72], %147 {strides = array<i32>} : memref<3x16x128xf32, #tpu.memory_space<vmem>>, vector<1x16x128xf32>,
    %c1_73 = arith.constant 1 : index
    %c0_74 = arith.constant 0 : index
    %c0_75 = arith.constant 0 : index
    %148 = vector.load %arg16[%c1_73, %c0_74, %c0_75] : memref<3x16x128xf32, #tpu.memory_space<vmem>>, vector<1x16x128xf32>
    %149 = vector.shape_cast %148 : vector<1x16x128xf32> to vector<16x128xf32>
    %150 = vector.shape_cast %97 : vector<16x128xf32> to vector<1x16x128xf32>
    tpu.vector_store %arg16[%c1_73, %c0_74, %c0_75], %150 {strides = array<i32>} : memref<3x16x128xf32, #tpu.memory_space<vmem>>, vector<1x16x128xf32>,
    %c1_76 = arith.constant 1 : index
    %c0_77 = arith.constant 0 : index
    %c0_78 = arith.constant 0 : index
    %151 = vector.load %arg17[%c1_76, %c0_77, %c0_78] : memref<3x16x128xf32, #tpu.memory_space<vmem>>, vector<1x16x128xf32>
    %152 = vector.shape_cast %151 : vector<1x16x128xf32> to vector<16x128xf32>
    %153 = vector.shape_cast %95 : vector<16x128xf32> to vector<1x16x128xf32>
    tpu.vector_store %arg17[%c1_76, %c0_77, %c0_78], %153 {strides = array<i32>} : memref<3x16x128xf32, #tpu.memory_space<vmem>>, vector<1x16x128xf32>,
    %c2_79 = arith.constant 2 : index
    %c0_80 = arith.constant 0 : index
    %c0_81 = arith.constant 0 : index
    %154 = vector.load %arg16[%c2_79, %c0_80, %c0_81] : memref<3x16x128xf32, #tpu.memory_space<vmem>>, vector<1x16x128xf32>
    %155 = vector.shape_cast %154 : vector<1x16x128xf32> to vector<16x128xf32>
    %156 = vector.shape_cast %132 : vector<16x128xf32> to vector<1x16x128xf32>
    tpu.vector_store %arg16[%c2_79, %c0_80, %c0_81], %156 {strides = array<i32>} : memref<3x16x128xf32, #tpu.memory_space<vmem>>, vector<1x16x128xf32>,
    %c2_82 = arith.constant 2 : index
    %c0_83 = arith.constant 0 : index
    %c0_84 = arith.constant 0 : index
    %157 = vector.load %arg17[%c2_82, %c0_83, %c0_84] : memref<3x16x128xf32, #tpu.memory_space<vmem>>, vector<1x16x128xf32>
    %158 = vector.shape_cast %157 : vector<1x16x128xf32> to vector<16x128xf32>
    %159 = vector.shape_cast %130 : vector<16x128xf32> to vector<1x16x128xf32>
    tpu.vector_store %arg17[%c2_82, %c0_83, %c0_84], %159 {strides = array<i32>} : memref<3x16x128xf32, #tpu.memory_space<vmem>>, vector<1x16x128xf32>,
    %c0_i32_85 = arith.constant 0 : i32
    %160 = arith.cmpi eq, %arg1, %c0_i32_85 : i32
    %161 = arith.extui %160 : i1 to i32
    %c0_i32_86 = arith.constant 0 : i32
    %162 = arith.cmpi ne, %161, %c0_i32_86 : i32
    scf.if %162 {
      %c0_87 = arith.constant 0 : index
      %c0_88 = arith.constant 0 : index
      %c0_89 = arith.constant 0 : index
      %163 = vector.load %arg16[%c0_87, %c0_88, %c0_89] : memref<3x16x128xf32, #tpu.memory_space<vmem>>, vector<3x16x128xf32>
      %c0_90 = arith.constant 0 : index
      %c0_91 = arith.constant 0 : index
      %c0_92 = arith.constant 0 : index
      %164 = vector.load %arg14[%c0_90, %c0_91, %c0_92] : memref<3x16x128xf32, #tpu.memory_space<vmem>>, vector<3x16x128xf32>
      tpu.vector_store %arg14[%c0_90, %c0_91, %c0_92], %163 {strides = array<i32>} : memref<3x16x128xf32, #tpu.memory_space<vmem>>, vector<3x16x128xf32>,
      %c0_93 = arith.constant 0 : index
      %c0_94 = arith.constant 0 : index
      %c0_95 = arith.constant 0 : index
      %165 = vector.load %arg17[%c0_93, %c0_94, %c0_95] : memref<3x16x128xf32, #tpu.memory_space<vmem>>, vector<3x16x128xf32>
      %c0_96 = arith.constant 0 : index
      %c0_97 = arith.constant 0 : index
      %c0_98 = arith.constant 0 : index
      %166 = vector.load %arg15[%c0_96, %c0_97, %c0_98] : memref<3x16x128xf32, #tpu.memory_space<vmem>>, vector<3x16x128xf32>
      tpu.vector_store %arg15[%c0_96, %c0_97, %c0_98], %165 {strides = array<i32>} : memref<3x16x128xf32, #tpu.memory_space<vmem>>, vector<3x16x128xf32>,
    } else {
    }
    return
  }
  func.func @transform_0(%arg0: i32, %arg1: i32) -> (i32, i32, i32, i32) {
    %c0_i32 = arith.constant 0 : i32
    %c0_i32_0 = arith.constant 0 : i32
    %c0_i32_1 = arith.constant 0 : i32
    return %arg1, %arg0, %c0_i32, %c0_i32_0 : i32, i32, i32, i32
  }
  func.func @transform_1(%arg0: i32, %arg1: i32) -> (i32, i32) {
    %c0_i32 = arith.constant 0 : i32
    %c0_i32_0 = arith.constant 0 : i32
    %c0_i32_1 = arith.constant 0 : i32
    return %c0_i32, %c0_i32_0 : i32, i32
  }
  func.func @transform_2(%arg0: i32, %arg1: i32) -> (i32, i32, i32) {
    %c0_i32 = arith.constant 0 : i32
    %c0_i32_0 = arith.constant 0 : i32
    %c0_i32_1 = arith.constant 0 : i32
    return %c0_i32, %arg0, %c0_i32_0 : i32, i32, i32
  }
  func.func @transform_3(%arg0: i32, %arg1: i32) -> (i32, i32, i32) {
    %c0_i32 = arith.constant 0 : i32
    %c0_i32_0 = arith.constant 0 : i32
    %c0_i32_1 = arith.constant 0 : i32
    return %c0_i32, %arg0, %c0_i32_0 : i32, i32, i32
  }
  func.func @transform_4(%arg0: i32, %arg1: i32) -> (i32, i32) {
    %c0_i32 = arith.constant 0 : i32
    %c0_i32_0 = arith.constant 0 : i32
    %c0_i32_1 = arith.constant 0 : i32
    return %c0_i32, %c0_i32_0 : i32, i32
  }
  func.func @transform_5(%arg0: i32, %arg1: i32) -> (i32, i32) {
    %c0_i32 = arith.constant 0 : i32
    %c0_i32_0 = arith.constant 0 : i32
    %c0_i32_1 = arith.constant 0 : i32
    return %c0_i32, %c0_i32_0 : i32, i32
  }
  func.func @transform_6(%arg0: i32, %arg1: i32) -> (i32, i32, i32) {
    %c0_i32 = arith.constant 0 : i32
    %c0_i32_0 = arith.constant 0 : i32
    %c0_i32_1 = arith.constant 0 : i32
    %c0_i32_2 = arith.constant 0 : i32
    return %c0_i32, %c0_i32_0, %c0_i32_1 : i32, i32, i32
  }
  func.func @transform_7(%arg0: i32, %arg1: i32) -> (i32, i32) {
    %c0_i32 = arith.constant 0 : i32
    %c0_i32_0 = arith.constant 0 : i32
    %c0_i32_1 = arith.constant 0 : i32
    return %c0_i32, %c0_i32_0 : i32, i32
  }
  func.func @transform_8(%arg0: i32, %arg1: i32) -> (i32, i32, i32) {
    %c0_i32 = arith.constant 0 : i32
    %c0_i32_0 = arith.constant 0 : i32
    %c0_i32_1 = arith.constant 0 : i32
    %c0_i32_2 = arith.constant 0 : i32
    return %c0_i32, %c0_i32_0, %c0_i32_1 : i32, i32, i32
  }
  func.func @transform_9(%arg0: i32, %arg1: i32) -> (i32, i32) {
    %c0_i32 = arith.constant 0 : i32
    %c0_i32_0 = arith.constant 0 : i32
    %c0_i32_1 = arith.constant 0 : i32
    return %c0_i32, %c0_i32_0 : i32, i32
  }
  func.func @transform_10(%arg0: i32, %arg1: i32) -> (i32, i32) {
    %c0_i32 = arith.constant 0 : i32
    %c0_i32_0 = arith.constant 0 : i32
    %c0_i32_1 = arith.constant 0 : i32
    return %c0_i32, %c0_i32_0 : i32, i32
  }
  func.func @transform_11(%arg0: i32, %arg1: i32) -> (i32, i32, i32) {
    %c0_i32 = arith.constant 0 : i32
    %c0_i32_0 = arith.constant 0 : i32
    return %arg1, %arg0, %c0_i32 : i32, i32, i32
  }
  func.func @transform_12(%arg0: i32, %arg1: i32) -> (i32, i32, i32) {
    %c0_i32 = arith.constant 0 : i32
    %c0_i32_0 = arith.constant 0 : i32
    %c0_i32_1 = arith.constant 0 : i32
    return %c0_i32, %arg0, %c0_i32_0 : i32, i32, i32
  }
  func.func @transform_13(%arg0: i32, %arg1: i32) -> (i32, i32, i32) {
    %c0_i32 = arith.constant 0 : i32
    %c0_i32_0 = arith.constant 0 : i32
    %c0_i32_1 = arith.constant 0 : i32
    return %c0_i32, %arg0, %c0_i32_0 : i32, i32, i32
  }
}

module attributes {stable_mosaic.version = 11 : i64} {
  func.func @_generative_model_kernel(%arg0: i32, %arg1: i32, %arg2: memref<1x1x16x1xi32, #tpu.memory_space<vmem>>, %arg3: memref<256x128xbf16, #tpu.memory_space<vmem>>, %arg4: memref<3x16x128xf32, #tpu.memory_space<vmem>>, %arg5: memref<3x16x128xf32, #tpu.memory_space<vmem>>, %arg6: memref<128x512xbf16, #tpu.memory_space<vmem>>, %arg7: memref<128x512xbf16, #tpu.memory_space<vmem>>, %arg8: memref<2x256x512xbf16, #tpu.memory_space<vmem>>, %arg9: memref<1x512xf32, #tpu.memory_space<vmem>>, %arg10: memref<2x1x512xf32, #tpu.memory_space<vmem>>, %arg11: memref<128x256xbf16, #tpu.memory_space<vmem>>, %arg12: memref<1x256xf32, #tpu.memory_space<vmem>>, %arg13: memref<1x16x256xf32, #tpu.memory_space<vmem>>, %arg14: memref<3x16x128xf32, #tpu.memory_space<vmem>>, %arg15: memref<3x16x128xf32, #tpu.memory_space<vmem>>, %arg16: memref<3x16x128xf32, #tpu.memory_space<vmem>>, %arg17: memref<3x16x128xf32, #tpu.memory_space<vmem>>, %arg18: memref<16x512xf32, #tpu.memory_space<vmem>>) attributes {dimension_semantics = [#tpu.dimension_semantics<parallel>, #tpu.dimension_semantics<arbitrary>], iteration_bounds = array<i64: 1, 1>, scalar_prefetch = 0 : i64, scratch_operands = 3 : i64, tpu.core_type = #tpu.core_type<tc>, window_params = [{transform_indices = @transform_0, window_bounds = array<i64: 1, 1, 16, 1>}, {pipeline_mode = #tpu.pipeline_mode<synchronous>, transform_indices = @transform_1, window_bounds = array<i64: 256, 128>}, {transform_indices = @transform_2, window_bounds = array<i64: 3, 16, 128>}, {transform_indices = @transform_3, window_bounds = array<i64: 3, 16, 128>}, {pipeline_mode = #tpu.pipeline_mode<synchronous>, transform_indices = @transform_4, window_bounds = array<i64: 128, 512>}, {pipeline_mode = #tpu.pipeline_mode<synchronous>, transform_indices = @transform_5, window_bounds = array<i64: 128, 512>}, {pipeline_mode = #tpu.pipeline_mode<synchronous>, transform_indices = @transform_6, window_bounds = array<i64: 2, 256, 512>}, {pipeline_mode = #tpu.pipeline_mode<synchronous>, transform_indices = @transform_7, window_bounds = array<i64: 1, 512>}, {pipeline_mode = #tpu.pipeline_mode<synchronous>, transform_indices = @transform_8, window_bounds = array<i64: 2, 1, 512>}, {pipeline_mode = #tpu.pipeline_mode<synchronous>, transform_indices = @transform_9, window_bounds = array<i64: 128, 256>}, {pipeline_mode = #tpu.pipeline_mode<synchronous>, transform_indices = @transform_10, window_bounds = array<i64: 1, 256>}, {transform_indices = @transform_11, window_bounds = array<i64: 1, 16, 256>}, {transform_indices = @transform_12, window_bounds = array<i64: 3, 16, 128>}, {transform_indices = @transform_13, window_bounds = array<i64: 3, 16, 128>}]} {
    %c0_i32 = arith.constant 0 : i32
    %0 = arith.cmpi eq, %arg1, %c0_i32 : i32
    %1 = arith.extui %0 : i1 to i32
    %c0_i32_0 = arith.constant 0 : i32
    %2 = arith.cmpi ne, %1, %c0_i32_0 : i32
    scf.if %2 {
      %c0_87 = arith.constant 0 : index
      %c0_88 = arith.constant 0 : index
      %c0_89 = arith.constant 0 : index
      %163 = vector.load %arg4[%c0_87, %c0_88, %c0_89] : memref<3x16x128xf32, #tpu.memory_space<vmem>>, vector<3x16x128xf32>
      %c0_90 = arith.constant 0 : index
      %c0_91 = arith.constant 0 : index
      %c0_92 = arith.constant 0 : index
      %164 = vector.load %arg16[%c0_90, %c0_91, %c0_92] : memref<3x16x128xf32, #tpu.memory_space<vmem>>, vector<3x16x128xf32>
      tpu.vector_store %arg16[%c0_90, %c0_91, %c0_92], %163 {strides = array<i32>} : memref<3x16x128xf32, #tpu.memory_space<vmem>>, vector<3x16x128xf32>,
      %c0_93 = arith.constant 0 : index
      %c0_94 = arith.constant 0 : index
      %c0_95 = arith.constant 0 : index
      %165 = vector.load %arg5[%c0_93, %c0_94, %c0_95] : memref<3x16x128xf32, #tpu.memory_space<vmem>>, vector<3x16x128xf32>
      %c0_96 = arith.constant 0 : index
      %c0_97 = arith.constant 0 : index
      %c0_98 = arith.constant 0 : index
      %166 = vector.load %arg17[%c0_96, %c0_97, %c0_98] : memref<3x16x128xf32, #tpu.memory_space<vmem>>, vector<3x16x128xf32>
      tpu.vector_store %arg17[%c0_96, %c0_97, %c0_98], %165 {strides = array<i32>} : memref<3x16x128xf32, #tpu.memory_space<vmem>>, vector<3x16x128xf32>,
    } else {
    }
    %c0 = arith.constant 0 : index
    %c0_1 = arith.constant 0 : index
    %c0_2 = arith.constant 0 : index
    %c0_3 = arith.constant 0 : index
    %3 = vector.load %arg2[%c0, %c0_1, %c0_2, %c0_3] : memref<1x1x16x1xi32, #tpu.memory_space<vmem>>, vector<1x1x16x1xi32>
    %4 = vector.shape_cast %3 : vector<1x1x16x1xi32> to vector<16x1xi32>
    %5 = tpu.iota {dimensions = array<i32: 1>} : vector<16x256xi32>
    %6 = vector.broadcast %4 : vector<16x1xi32> to vector<16x256xi32>
    %7 = arith.cmpi eq, %6, %5 : vector<16x256xi32>
    %cst = arith.constant 1.000000e+00 : f32
    %cst_4 = arith.constant 0.000000e+00 : f32
    %8 = vector.broadcast %cst : f32 to vector<16x256xf32>
    %9 = vector.broadcast %cst_4 : f32 to vector<16x256xf32>
    %10 = arith.select %7, %8, %9 : vector<16x256xi1>, vector<16x256xf32>
    %11 = arith.truncf %10 : vector<16x256xf32> to vector<16x256xbf16>
    %c0_5 = arith.constant 0 : index
    %c0_6 = arith.constant 0 : index
    %12 = vector.load %arg3[%c0_5, %c0_6] : memref<256x128xbf16, #tpu.memory_space<vmem>>, vector<256x128xbf16>
    %cst_7 = arith.constant dense<0.000000e+00> : vector<16x128xf32>
    %13 = tpu.matmul %11, %12, %cst_7 {dimension_numbers = #tpu.dot_dimension_numbers<[1], [0], [0], [1], [0, 0, 1, 1], [], []>} : vector<16x256xbf16>, vector<256x128xbf16>, vector<16x128xf32> -> vector<16x128xf32>
    %14 = arith.truncf %13 : vector<16x128xf32> to vector<16x128xbf16>
    %c0_8 = arith.constant 0 : index
    %c0_9 = arith.constant 0 : index
    %15 = vector.load %arg6[%c0_8, %c0_9] : memref<128x512xbf16, #tpu.memory_space<vmem>>, vector<128x512xbf16>
    %cst_10 = arith.constant dense<0.000000e+00> : vector<16x512xf32>
    %16 = tpu.matmul %14, %15, %cst_10 {dimension_numbers = #tpu.dot_dimension_numbers<[1], [0], [0], [1], [0, 0, 1, 1], [], []>} : vector<16x128xbf16>, vector<128x512xbf16>, vector<16x512xf32> -> vector<16x512xf32>
    %c0_11 = arith.constant 0 : index
    %c0_12 = arith.constant 0 : index
    %17 = vector.load %arg9[%c0_11, %c0_12] : memref<1x512xf32, #tpu.memory_space<vmem>>, vector<1x512xf32>
    %18 = vector.broadcast %17 : vector<1x512xf32> to vector<16x512xf32>
    %19 = arith.addf %16, %18 : vector<16x512xf32>
    %c0_13 = arith.constant 0 : index
    %c0_14 = arith.constant 0 : index
    %20 = vector.load %arg18[%c0_13, %c0_14] : memref<16x512xf32, #tpu.memory_space<vmem>>, vector<16x512xf32>
    tpu.vector_store %arg18[%c0_13, %c0_14], %19 {strides = array<i32>} : memref<16x512xf32, #tpu.memory_space<vmem>>, vector<16x512xf32>,
    %c0_15 = arith.constant 0 : index
    %c0_16 = arith.constant 0 : index
    %c0_17 = arith.constant 0 : index
    %21 = vector.load %arg16[%c0_15, %c0_16, %c0_17] : memref<3x16x128xf32, #tpu.memory_space<vmem>>, vector<1x16x128xf32>
    %22 = vector.shape_cast %21 : vector<1x16x128xf32> to vector<16x128xf32>
    %c1 = arith.constant 1 : index
    %c0_18 = arith.constant 0 : index
    %c0_19 = arith.constant 0 : index
    %23 = vector.load %arg16[%c1, %c0_18, %c0_19] : memref<3x16x128xf32, #tpu.memory_space<vmem>>, vector<1x16x128xf32>
    %24 = vector.shape_cast %23 : vector<1x16x128xf32> to vector<16x128xf32>
    %c2 = arith.constant 2 : index
    %c0_20 = arith.constant 0 : index
    %c0_21 = arith.constant 0 : index
    %25 = vector.load %arg16[%c2, %c0_20, %c0_21] : memref<3x16x128xf32, #tpu.memory_space<vmem>>, vector<1x16x128xf32>
    %26 = vector.shape_cast %25 : vector<1x16x128xf32> to vector<16x128xf32>
    %c0_22 = arith.constant 0 : index
    %c0_23 = arith.constant 0 : index
    %c0_24 = arith.constant 0 : index
    %27 = vector.load %arg17[%c0_22, %c0_23, %c0_24] : memref<3x16x128xf32, #tpu.memory_space<vmem>>, vector<1x16x128xf32>
    %28 = vector.shape_cast %27 : vector<1x16x128xf32> to vector<16x128xf32>
    %c1_25 = arith.constant 1 : index
    %c0_26 = arith.constant 0 : index
    %c0_27 = arith.constant 0 : index
    %29 = vector.load %arg17[%c1_25, %c0_26, %c0_27] : memref<3x16x128xf32, #tpu.memory_space<vmem>>, vector<1x16x128xf32>
    %30 = vector.shape_cast %29 : vector<1x16x128xf32> to vector<16x128xf32>
    %c2_28 = arith.constant 2 : index
    %c0_29 = arith.constant 0 : index
    %c0_30 = arith.constant 0 : index
    %31 = vector.load %arg17[%c2_28, %c0_29, %c0_30] : memref<3x16x128xf32, #tpu.memory_space<vmem>>, vector<1x16x128xf32>
    %32 = vector.shape_cast %31 : vector<1x16x128xf32> to vector<16x128xf32>
    %c0_31 = arith.constant 0 : index
    %c0_32 = arith.constant 0 : index
    %33 = vector.load %arg18[%c0_31, %c0_32] : memref<16x512xf32, #tpu.memory_space<vmem>>, vector<16x512xf32>
    %34 = arith.truncf %22 : vector<16x128xf32> to vector<16x128xbf16>
    %c0_33 = arith.constant 0 : index
    %c0_34 = arith.constant 0 : index
    %35 = vector.load %arg7[%c0_33, %c0_34] : memref<128x512xbf16, #tpu.memory_space<vmem>>, vector<128x512xbf16>
    %cst_35 = arith.constant dense<0.000000e+00> : vector<16x512xf32>
    %36 = tpu.matmul %34, %35, %cst_35 {dimension_numbers = #tpu.dot_dimension_numbers<[1], [0], [0], [1], [0, 0, 1, 1], [], []>} : vector<16x128xbf16>, vector<128x512xbf16>, vector<16x512xf32> -> vector<16x512xf32>
    %37 = arith.addf %33, %36 : vector<16x512xf32>
    %38 = vector.extract_strided_slice %37 {offsets = [0, 0], sizes = [16, 128], strides = [1, 1]} : vector<16x512xf32> to vector<16x128xf32>
    %39 = arith.negf %38 : vector<16x128xf32>
    %40 = math.exp %39 : vector<16x128xf32>
    %cst_36 = arith.constant 1.000000e+00 : f32
    %41 = vector.broadcast %cst_36 : f32 to vector<16x128xf32>
    %42 = arith.addf %41, %40 : vector<16x128xf32>
    %43 = arith.divf %41, %42 : vector<16x128xf32>
    %44 = vector.extract_strided_slice %37 {offsets = [0, 128], sizes = [16, 128], strides = [1, 1]} : vector<16x512xf32> to vector<16x128xf32>
    %45 = arith.negf %44 : vector<16x128xf32>
    %46 = math.exp %45 : vector<16x128xf32>
    %cst_37 = arith.constant 1.000000e+00 : f32
    %47 = vector.broadcast %cst_37 : f32 to vector<16x128xf32>
    %48 = arith.addf %47, %46 : vector<16x128xf32>
    %49 = arith.divf %47, %48 : vector<16x128xf32>
    %50 = vector.extract_strided_slice %37 {offsets = [0, 256], sizes = [16, 128], strides = [1, 1]} : vector<16x512xf32> to vector<16x128xf32>
    %51 = math.tanh %50 : vector<16x128xf32>
    %52 = vector.extract_strided_slice %37 {offsets = [0, 384], sizes = [16, 128], strides = [1, 1]} : vector<16x512xf32> to vector<16x128xf32>
    %53 = arith.negf %52 : vector<16x128xf32>
    %54 = math.exp %53 : vector<16x128xf32>
    %cst_38 = arith.constant 1.000000e+00 : f32
    %55 = vector.broadcast %cst_38 : f32 to vector<16x128xf32>
    %56 = arith.addf %55, %54 : vector<16x128xf32>
    %57 = arith.divf %55, %56 : vector<16x128xf32>
    %58 = arith.mulf %49, %28 : vector<16x128xf32>
    %59 = arith.mulf %43, %51 : vector<16x128xf32>
    %60 = arith.addf %58, %59 : vector<16x128xf32>
    %61 = math.tanh %60 : vector<16x128xf32>
    %62 = arith.mulf %57, %61 : vector<16x128xf32>
    %63 = arith.truncf %62 : vector<16x128xf32> to vector<16x128xbf16>
    %64 = arith.truncf %24 : vector<16x128xf32> to vector<16x128xbf16>
    %65 = tpu.concatenate %63, %64 in 1 : vector<16x128xbf16>, vector<16x128xbf16> -> vector<16x256xbf16>
    %c0_39 = arith.constant 0 : index
    %c0_40 = arith.constant 0 : index
    %c0_41 = arith.constant 0 : index
    %66 = vector.load %arg8[%c0_39, %c0_40, %c0_41] : memref<2x256x512xbf16, #tpu.memory_space<vmem>>, vector<1x256x512xbf16>
    %67 = vector.shape_cast %66 : vector<1x256x512xbf16> to vector<256x512xbf16>
    %cst_42 = arith.constant dense<0.000000e+00> : vector<16x512xf32>
    %68 = tpu.matmul %65, %67, %cst_42 {dimension_numbers = #tpu.dot_dimension_numbers<[1], [0], [0], [1], [0, 0, 1, 1], [], []>} : vector<16x256xbf16>, vector<256x512xbf16>, vector<16x512xf32> -> vector<16x512xf32>
    %c0_43 = arith.constant 0 : index
    %c0_44 = arith.constant 0 : index
    %c0_45 = arith.constant 0 : index
    %69 = vector.load %arg10[%c0_43, %c0_44, %c0_45] : memref<2x1x512xf32, #tpu.memory_space<vmem>>, vector<1x1x512xf32>
    %70 = vector.shape_cast %69 : vector<1x1x512xf32> to vector<1x512xf32>
    %71 = vector.broadcast %70 : vector<1x512xf32> to vector<16x512xf32>
    %72 = arith.addf %68, %71 : vector<16x512xf32>
    %73 = vector.extract_strided_slice %72 {offsets = [0, 0], sizes = [16, 128], strides = [1, 1]} : vector<16x512xf32> to vector<16x128xf32>
    %74 = arith.negf %73 : vector<16x128xf32>
    %75 = math.exp %74 : vector<16x128xf32>
    %cst_46 = arith.constant 1.000000e+00 : f32
    %76 = vector.broadcast %cst_46 : f32 to vector<16x128xf32>
    %77 = arith.addf %76, %75 : vector<16x128xf32>
    %78 = arith.divf %76, %77 : vector<16x128xf32>
    %79 = vector.extract_strided_slice %72 {offsets = [0, 128], sizes = [16, 128], strides = [1, 1]} : vector<16x512xf32> to vector<16x128xf32>
    %80 = arith.negf %79 : vector<16x128xf32>
    %81 = math.exp %80 : vector<16x128xf32>
    %cst_47 = arith.constant 1.000000e+00 : f32
    %82 = vector.broadcast %cst_47 : f32 to vector<16x128xf32>
    %83 = arith.addf %82, %81 : vector<16x128xf32>
    %84 = arith.divf %82, %83 : vector<16x128xf32>
    %85 = vector.extract_strided_slice %72 {offsets = [0, 256], sizes = [16, 128], strides = [1, 1]} : vector<16x512xf32> to vector<16x128xf32>
    %86 = math.tanh %85 : vector<16x128xf32>
    %87 = vector.extract_strided_slice %72 {offsets = [0, 384], sizes = [16, 128], strides = [1, 1]} : vector<16x512xf32> to vector<16x128xf32>
    %88 = arith.negf %87 : vector<16x128xf32>
    %89 = math.exp %88 : vector<16x128xf32>
    %cst_48 = arith.constant 1.000000e+00 : f32
    %90 = vector.broadcast %cst_48 : f32 to vector<16x128xf32>
    %91 = arith.addf %90, %89 : vector<16x128xf32>
    %92 = arith.divf %90, %91 : vector<16x128xf32>
    %93 = arith.mulf %84, %30 : vector<16x128xf32>
    %94 = arith.mulf %78, %86 : vector<16x128xf32>
    %95 = arith.addf %93, %94 : vector<16x128xf32>
    %96 = math.tanh %95 : vector<16x128xf32>
    %97 = arith.mulf %92, %96 : vector<16x128xf32>
    %98 = arith.truncf %97 : vector<16x128xf32> to vector<16x128xbf16>
    %99 = arith.truncf %26 : vector<16x128xf32> to vector<16x128xbf16>
    %100 = tpu.concatenate %98, %99 in 1 : vector<16x128xbf16>, vector<16x128xbf16> -> vector<16x256xbf16>
    %c1_49 = arith.constant 1 : index
    %c0_50 = arith.constant 0 : index
    %c0_51 = arith.constant 0 : index
    %101 = vector.load %arg8[%c1_49, %c0_50, %c0_51] : memref<2x256x512xbf16, #tpu.memory_space<vmem>>, vector<1x256x512xbf16>
    %102 = vector.shape_cast %101 : vector<1x256x512xbf16> to vector<256x512xbf16>
    %cst_52 = arith.constant dense<0.000000e+00> : vector<16x512xf32>
    %103 = tpu.matmul %100, %102, %cst_52 {dimension_numbers = #tpu.dot_dimension_numbers<[1], [0], [0], [1], [0, 0, 1, 1], [], []>} : vector<16x256xbf16>, vector<256x512xbf16>, vector<16x512xf32> -> vector<16x512xf32>
    %c1_53 = arith.constant 1 : index
    %c0_54 = arith.constant 0 : index
    %c0_55 = arith.constant 0 : index
    %104 = vector.load %arg10[%c1_53, %c0_54, %c0_55] : memref<2x1x512xf32, #tpu.memory_space<vmem>>, vector<1x1x512xf32>
    %105 = vector.shape_cast %104 : vector<1x1x512xf32> to vector<1x512xf32>
    %106 = vector.broadcast %105 : vector<1x512xf32> to vector<16x512xf32>
    %107 = arith.addf %103, %106 : vector<16x512xf32>
    %108 = vector.extract_strided_slice %107 {offsets = [0, 0], sizes = [16, 128], strides = [1, 1]} : vector<16x512xf32> to vector<16x128xf32>
    %109 = arith.negf %108 : vector<16x128xf32>
    %110 = math.exp %109 : vector<16x128xf32>
    %cst_56 = arith.constant 1.000000e+00 : f32
    %111 = vector.broadcast %cst_56 : f32 to vector<16x128xf32>
    %112 = arith.addf %111, %110 : vector<16x128xf32>
    %113 = arith.divf %111, %112 : vector<16x128xf32>
    %114 = vector.extract_strided_slice %107 {offsets = [0, 128], sizes = [16, 128], strides = [1, 1]} : vector<16x512xf32> to vector<16x128xf32>
    %115 = arith.negf %114 : vector<16x128xf32>
    %116 = math.exp %115 : vector<16x128xf32>
    %cst_57 = arith.constant 1.000000e+00 : f32
    %117 = vector.broadcast %cst_57 : f32 to vector<16x128xf32>
    %118 = arith.addf %117, %116 : vector<16x128xf32>
    %119 = arith.divf %117, %118 : vector<16x128xf32>
    %120 = vector.extract_strided_slice %107 {offsets = [0, 256], sizes = [16, 128], strides = [1, 1]} : vector<16x512xf32> to vector<16x128xf32>
    %121 = math.tanh %120 : vector<16x128xf32>
    %122 = vector.extract_strided_slice %107 {offsets = [0, 384], sizes = [16, 128], strides = [1, 1]} : vector<16x512xf32> to vector<16x128xf32>
    %123 = arith.negf %122 : vector<16x128xf32>
    %124 = math.exp %123 : vector<16x128xf32>
    %cst_58 = arith.constant 1.000000e+00 : f32
    %125 = vector.broadcast %cst_58 : f32 to vector<16x128xf32>
    %126 = arith.addf %125, %124 : vector<16x128xf32>
    %127 = arith.divf %125, %126 : vector<16x128xf32>
    %128 = arith.mulf %119, %32 : vector<16x128xf32>
    %129 = arith.mulf %113, %121 : vector<16x128xf32>
    %130 = arith.addf %128, %129 : vector<16x128xf32>
    %131 = math.tanh %130 : vector<16x128xf32>
    %132 = arith.mulf %127, %131 : vector<16x128xf32>
    %133 = arith.truncf %132 : vector<16x128xf32> to vector<16x128xbf16>
    %c0_59 = arith.constant 0 : index
    %c0_60 = arith.constant 0 : index
    %134 = vector.load %arg11[%c0_59, %c0_60] : memref<128x256xbf16, #tpu.memory_space<vmem>>, vector<128x256xbf16>
    %cst_61 = arith.constant dense<0.000000e+00> : vector<16x256xf32>
    %135 = tpu.matmul %133, %134, %cst_61 {dimension_numbers = #tpu.dot_dimension_numbers<[1], [0], [0], [1], [0, 0, 1, 1], [], []>} : vector<16x128xbf16>, vector<128x256xbf16>, vector<16x256xf32> -> vector<16x256xf32>
    %c0_62 = arith.constant 0 : index
    %c0_63 = arith.constant 0 : index
    %136 = vector.load %arg12[%c0_62, %c0_63] : memref<1x256xf32, #tpu.memory_space<vmem>>, vector<1x256xf32>
    %137 = vector.broadcast %136 : vector<1x256xf32> to vector<16x256xf32>
    %138 = arith.addf %135, %137 : vector<16x256xf32>
    %c0_64 = arith.constant 0 : index
    %c0_65 = arith.constant 0 : index
    %c0_66 = arith.constant 0 : index
    %139 = vector.load %arg13[%c0_64, %c0_65, %c0_66] : memref<1x16x256xf32, #tpu.memory_space<vmem>>, vector<1x16x256xf32>
    %140 = vector.shape_cast %139 : vector<1x16x256xf32> to vector<16x256xf32>
    %141 = vector.shape_cast %138 : vector<16x256xf32> to vector<1x16x256xf32>
    tpu.vector_store %arg13[%c0_64, %c0_65, %c0_66], %141 {strides = array<i32>} : memref<1x16x256xf32, #tpu.memory_space<vmem>>, vector<1x16x256xf32>,
    %c0_67 = arith.constant 0 : index
    %c0_68 = arith.constant 0 : index
    %c0_69 = arith.constant 0 : index
    %142 = vector.load %arg16[%c0_67, %c0_68, %c0_69] : memref<3x16x128xf32, #tpu.memory_space<vmem>>, vector<1x16x128xf32>
    %143 = vector.shape_cast %142 : vector<1x16x128xf32> to vector<16x128xf32>
    %144 = vector.shape_cast %62 : vector<16x128xf32> to vector<1x16x128xf32>
    tpu.vector_store %arg16[%c0_67, %c0_68, %c0_69], %144 {strides = array<i32>} : memref<3x16x128xf32, #tpu.memory_space<vmem>>, vector<1x16x128xf32>,
    %c0_70 = arith.constant 0 : index
    %c0_71 = arith.constant 0 : index
    %c0_72 = arith.constant 0 : index
    %145 = vector.load %arg17[%c0_70, %c0_71, %c0_72] : memref<3x16x128xf32, #tpu.memory_space<vmem>>, vector<1x16x128xf32>
    %146 = vector.shape_cast %145 : vector<1x16x128xf32> to vector<16x128xf32>
    %147 = vector.shape_cast %60 : vector<16x128xf32> to vector<1x16x128xf32>
    tpu.vector_store %arg17[%c0_70, %c0_71, %c0_72], %147 {strides = array<i32>} : memref<3x16x128xf32, #tpu.memory_space<vmem>>, vector<1x16x128xf32>,
    %c1_73 = arith.constant 1 : index
    %c0_74 = arith.constant 0 : index
    %c0_75 = arith.constant 0 : index
    %148 = vector.load %arg16[%c1_73, %c0_74, %c0_75] : memref<3x16x128xf32, #tpu.memory_space<vmem>>, vector<1x16x128xf32>
    %149 = vector.shape_cast %148 : vector<1x16x128xf32> to vector<16x128xf32>
    %150 = vector.shape_cast %97 : vector<16x128xf32> to vector<1x16x128xf32>
    tpu.vector_store %arg16[%c1_73, %c0_74, %c0_75], %150 {strides = array<i32>} : memref<3x16x128xf32, #tpu.memory_space<vmem>>, vector<1x16x128xf32>,
    %c1_76 = arith.constant 1 : index
    %c0_77 = arith.constant 0 : index
    %c0_78 = arith.constant 0 : index
    %151 = vector.load %arg17[%c1_76, %c0_77, %c0_78] : memref<3x16x128xf32, #tpu.memory_space<vmem>>, vector<1x16x128xf32>
    %152 = vector.shape_cast %151 : vector<1x16x128xf32> to vector<16x128xf32>
    %153 = vector.shape_cast %95 : vector<16x128xf32> to vector<1x16x128xf32>
    tpu.vector_store %arg17[%c1_76, %c0_77, %c0_78], %153 {strides = array<i32>} : memref<3x16x128xf32, #tpu.memory_space<vmem>>, vector<1x16x128xf32>,
    %c2_79 = arith.constant 2 : index
    %c0_80 = arith.constant 0 : index
    %c0_81 = arith.constant 0 : index
    %154 = vector.load %arg16[%c2_79, %c0_80, %c0_81] : memref<3x16x128xf32, #tpu.memory_space<vmem>>, vector<1x16x128xf32>
    %155 = vector.shape_cast %154 : vector<1x16x128xf32> to vector<16x128xf32>
    %156 = vector.shape_cast %132 : vector<16x128xf32> to vector<1x16x128xf32>
    tpu.vector_store %arg16[%c2_79, %c0_80, %c0_81], %156 {strides = array<i32>} : memref<3x16x128xf32, #tpu.memory_space<vmem>>, vector<1x16x128xf32>,
    %c2_82 = arith.constant 2 : index
    %c0_83 = arith.constant 0 : index
    %c0_84 = arith.constant 0 : index
    %157 = vector.load %arg17[%c2_82, %c0_83, %c0_84] : memref<3x16x128xf32, #tpu.memory_space<vmem>>, vector<1x16x128xf32>
    %158 = vector.shape_cast %157 : vector<1x16x128xf32> to vector<16x128xf32>
    %159 = vector.shape_cast %130 : vector<16x128xf32> to vector<1x16x128xf32>
    tpu.vector_store %arg17[%c2_82, %c0_83, %c0_84], %159 {strides = array<i32>} : memref<3x16x128xf32, #tpu.memory_space<vmem>>, vector<1x16x128xf32>,
    %c0_i32_85 = arith.constant 0 : i32
    %160 = arith.cmpi eq, %arg1, %c0_i32_85 : i32
    %161 = arith.extui %160 : i1 to i32
    %c0_i32_86 = arith.constant 0 : i32
    %162 = arith.cmpi ne, %161, %c0_i32_86 : i32
    scf.if %162 {
      %c0_87 = arith.constant 0 : index
      %c0_88 = arith.constant 0 : index
      %c0_89 = arith.constant 0 : index
      %163 = vector.load %arg16[%c0_87, %c0_88, %c0_89] : memref<3x16x128xf32, #tpu.memory_space<vmem>>, vector<3x16x128xf32>
      %c0_90 = arith.constant 0 : index
      %c0_91 = arith.constant 0 : index
      %c0_92 = arith.constant 0 : index
      %164 = vector.load %arg14[%c0_90, %c0_91, %c0_92] : memref<3x16x128xf32, #tpu.memory_space<vmem>>, vector<3x16x128xf32>
      tpu.vector_store %arg14[%c0_90, %c0_91, %c0_92], %163 {strides = array<i32>} : memref<3x16x128xf32, #tpu.memory_space<vmem>>, vector<3x16x128xf32>,
      %c0_93 = arith.constant 0 : index
      %c0_94 = arith.constant 0 : index
      %c0_95 = arith.constant 0 : index
      %165 = vector.load %arg17[%c0_93, %c0_94, %c0_95] : memref<3x16x128xf32, #tpu.memory_space<vmem>>, vector<3x16x128xf32>
      %c0_96 = arith.constant 0 : index
      %c0_97 = arith.constant 0 : index
      %c0_98 = arith.constant 0 : index
      %166 = vector.load %arg15[%c0_96, %c0_97, %c0_98] : memref<3x16x128xf32, #tpu.memory_space<vmem>>, vector<3x16x128xf32>
      tpu.vector_store %arg15[%c0_96, %c0_97, %c0_98], %165 {strides = array<i32>} : memref<3x16x128xf32, #tpu.memory_space<vmem>>, vector<3x16x128xf32>,
    } else {
    }
    return
  }
  func.func @transform_0(%arg0: i32, %arg1: i32) -> (i32, i32, i32, i32) {
    %c0_i32 = arith.constant 0 : i32
    %c0_i32_0 = arith.constant 0 : i32
    %c0_i32_1 = arith.constant 0 : i32
    return %arg1, %arg0, %c0_i32, %c0_i32_0 : i32, i32, i32, i32
  }
  func.func @transform_1(%arg0: i32, %arg1: i32) -> (i32, i32) {
    %c0_i32 = arith.constant 0 : i32
    %c0_i32_0 = arith.constant 0 : i32
    %c0_i32_1 = arith.constant 0 : i32
    return %c0_i32, %c0_i32_0 : i32, i32
  }
  func.func @transform_2(%arg0: i32, %arg1: i32) -> (i32, i32, i32) {
    %c0_i32 = arith.constant 0 : i32
    %c0_i32_0 = arith.constant 0 : i32
    %c0_i32_1 = arith.constant 0 : i32
    return %c0_i32, %arg0, %c0_i32_0 : i32, i32, i32
  }
  func.func @transform_3(%arg0: i32, %arg1: i32) -> (i32, i32, i32) {
    %c0_i32 = arith.constant 0 : i32
    %c0_i32_0 = arith.constant 0 : i32
    %c0_i32_1 = arith.constant 0 : i32
    return %c0_i32, %arg0, %c0_i32_0 : i32, i32, i32
  }
  func.func @transform_4(%arg0: i32, %arg1: i32) -> (i32, i32) {
    %c0_i32 = arith.constant 0 : i32
    %c0_i32_0 = arith.constant 0 : i32
    %c0_i32_1 = arith.constant 0 : i32
    return %c0_i32, %c0_i32_0 : i32, i32
  }
  func.func @transform_5(%arg0: i32, %arg1: i32) -> (i32, i32) {
    %c0_i32 = arith.constant 0 : i32
    %c0_i32_0 = arith.constant 0 : i32
    %c0_i32_1 = arith.constant 0 : i32
    return %c0_i32, %c0_i32_0 : i32, i32
  }
  func.func @transform_6(%arg0: i32, %arg1: i32) -> (i32, i32, i32) {
    %c0_i32 = arith.constant 0 : i32
    %c0_i32_0 = arith.constant 0 : i32
    %c0_i32_1 = arith.constant 0 : i32
    %c0_i32_2 = arith.constant 0 : i32
    return %c0_i32, %c0_i32_0, %c0_i32_1 : i32, i32, i32
  }
  func.func @transform_7(%arg0: i32, %arg1: i32) -> (i32, i32) {
    %c0_i32 = arith.constant 0 : i32
    %c0_i32_0 = arith.constant 0 : i32
    %c0_i32_1 = arith.constant 0 : i32
    return %c0_i32, %c0_i32_0 : i32, i32
  }
  func.func @transform_8(%arg0: i32, %arg1: i32) -> (i32, i32, i32) {
    %c0_i32 = arith.constant 0 : i32
    %c0_i32_0 = arith.constant 0 : i32
    %c0_i32_1 = arith.constant 0 : i32
    %c0_i32_2 = arith.constant 0 : i32
    return %c0_i32, %c0_i32_0, %c0_i32_1 : i32, i32, i32
  }
  func.func @transform_9(%arg0: i32, %arg1: i32) -> (i32, i32) {
    %c0_i32 = arith.constant 0 : i32
    %c0_i32_0 = arith.constant 0 : i32
    %c0_i32_1 = arith.constant 0 : i32
    return %c0_i32, %c0_i32_0 : i32, i32
  }
  func.func @transform_10(%arg0: i32, %arg1: i32) -> (i32, i32) {
    %c0_i32 = arith.constant 0 : i32
    %c0_i32_0 = arith.constant 0 : i32
    %c0_i32_1 = arith.constant 0 : i32
    return %c0_i32, %c0_i32_0 : i32, i32
  }
  func.func @transform_11(%arg0: i32, %arg1: i32) -> (i32, i32, i32) {
    %c0_i32 = arith.constant 0 : i32
    %c0_i32_0 = arith.constant 0 : i32
    return %arg1, %arg0, %c0_i32 : i32, i32, i32
  }
  func.func @transform_12(%arg0: i32, %arg1: i32) -> (i32, i32, i32) {
    %c0_i32 = arith.constant 0 : i32
    %c0_i32_0 = arith.constant 0 : i32
    %c0_i32_1 = arith.constant 0 : i32
    return %c0_i32, %arg0, %c0_i32_0 : i32, i32, i32
  }
  func.func @transform_13(%arg0: i32, %arg1: i32) -> (i32, i32, i32) {
    %c0_i32 = arith.constant 0 : i32
    %c0_i32_0 = arith.constant 0 : i32
    %c0_i32_1 = arith.constant 0 : i32
    return %c0_i32, %arg0, %c0_i32_0 : i32, i32, i32
  }
}

</mosaic_0001>

<bundles_post_ra>
// kernel: _sequence_impl.1
= control target key start
LH: loop header
LB: loop body
LE: loop exit
PB: predicated region body
PF: predicated region fallthrough
CT: control target
= control target key end

     0   :  { %19 = vsyncpa [#allocation6], 0  ;;  %s3474_s0 = inlined_call_operand.vmem [shape: s32[1,1,16,1], index: 0, kind: input, shape index: {}]   ;;  %s3475_s1 = inlined_call_operand.hbm [shape: bf16[256,128], index: 1, kind: input, shape index: {}]   ;;  %s3476_s2 = inlined_call_operand.hbm [shape: f32[3,16,128], index: 2, kind: input, shape index: {}]   ;;  %s3477_s3 = inlined_call_operand.hbm [shape: f32[3,16,128], index: 3, kind: input, shape index: {}]   ;;  %s3478_s4 = inlined_call_operand.hbm [shape: bf16[128,512], index: 4, kind: input, shape index: {}]   ;;  %s3479_s5 = inlined_call_operand.hbm [shape: bf16[128,512], index: 5, kind: input, shape index: {}]   ;;  %s3480_s6 = inlined_call_operand.hbm [shape: bf16[2,256,512], index: 6, kind: input, shape index: {}]   ;;  %s3481_s7 = inlined_call_operand.vmem [shape: f32[1,512], index: 7, kind: input, shape index: {}]   ;;  %s3482_s8 = inlined_call_operand.vmem [shape: f32[2,1,512], index: 8, kind: input, shape index: {}]   ;;  %s3483_s9 = inlined_call_operand.hbm [shape: bf16[128,256], index: 9, kind: input, shape index: {}]   ;;  %s3484_s10 = inlined_call_operand.vmem [shape: f32[1,256], index: 10, kind: input, shape index: {}]   ;;  %s3485_s11 = inlined_call_operand.hbm [shape: f32[1,16,256], index: 11, kind: output, shape index: {0}]   ;;  %s3486_s12 = inlined_call_operand.hbm [shape: f32[3,16,128], index: 12, kind: output, shape index: {1}]   ;;  %s3487_s13 = inlined_call_operand.hbm [shape: f32[3,16,128], index: 13, kind: output, shape index: {2}]  }
   0x1   :  { %20 = vsyncpa [#allocation9], 0 }
   0x2   :  { %21 = vsyncpa [#allocation12], 0 }
   0x3   :  { %22 = vsyncpa [#allocation15], 0 }
   0x4   :  { %23 = vsyncpa [#allocation7], 0 }
   0x5   :  { %24 = vsyncpa [#allocation19], 0  ;;  %s3281_s25 = smov [#allocation8]  }
   0x6   :  { %s44_s26 = sshll.u32 %s3281_s25, 4  ;;  %s45_s26 = int_to_ptr.vmem [resolvable:$true] %s44_s26 }
   0x7   :  { %s3077_s27 = scalar_lea.vmem %s45_s26, 768  ;;  %p3082_p1 = scmp.lt.s32.totalorder %s45_s26, %s45_s26 }
   0x8   :  { %p3078_p0 = scmp.ne.s32.totalorder %s45_s26, %s3077_s27  ;;  %p3083_p2 = scmp.lt.s32.totalorder %s3077_s27, %s3077_s27 }
   0xa   :  { %p3084_p3 = por %p3083_p2, %p3082_p1 }
   0xc   :  { %p3085_p4 = pnand %p3084_p3, %p3078_p0 }
   0xe   :  { %3088 = shalt.err (!%p3085_p4)
}
   0xf   :  { %s3282_s28 = smov 128   ;;  %s3283_s29 = smov 8  }
  0x10   :  { %50 = dma.hbm_to_vmem [thread:$0]  %s3476_s2, 768, %s45_s26, [#allocation9], %s3282_s28, %s3282_s28, %s3283_s29  }
  0x11   :  { %s3284_s15 = smov [#allocation11]  }
  0x12   :  { %s68_s16 = sshll.u32 %s3284_s15, 4  ;;  %s69_s16 = int_to_ptr.vmem [resolvable:$true] %s68_s16 }
  0x13   :  { %s3097_s17 = scalar_lea.vmem %s69_s16, 4096  ;;  %p3102_p6 = scmp.lt.s32.totalorder %s69_s16, %s69_s16 }
  0x14   :  { %p3098_p5 = scmp.ne.s32.totalorder %s69_s16, %s3097_s17  ;;  %p3103_p7 = scmp.lt.s32.totalorder %s3097_s17, %s3097_s17 }
  0x16   :  { %p3104_p8 = por %p3103_p7, %p3102_p6 }
  0x18   :  { %p3105_p9 = pnand %p3104_p8, %p3098_p5 }
  0x1a   :  { %3108 = shalt.err (!%p3105_p9)
}
  0x1b   :  { %s3285_s18 = smov 256   ;;  %s3286_s19 = smov 16  }
  0x1c   :  { %74 = dma.hbm_to_vmem [thread:$0]  %s3478_s4, 4096, %s69_s16, [#allocation12], %s3285_s18, %s3285_s18, %s3286_s19  }
  0x1d   :  { %s3287_s2 = smov [#allocation14]   ;;  %s3288_s23 = smov [#allocation5]  }
  0x1e   :  { %s92_s22 = sshll.u32 %s3287_s2, 4  ;;  %s32_s24 = sshll.u32 %s3288_s23, 4  ;;  %s93_s22 = int_to_ptr.vmem [resolvable:$true] %s92_s22  ;;  %s33_s24 = int_to_ptr.vmem [resolvable:$true] %s32_s24 }
  0x1f   :  { %s3117_s25 = scalar_lea.vmem %s93_s22, 16384  ;;  %p3122_p11 = scmp.lt.s32.totalorder %s93_s22, %s93_s22 }
  0x20   :  { %p3118_p10 = scmp.ne.s32.totalorder %s93_s22, %s3117_s25  ;;  %p3123_p12 = scmp.lt.s32.totalorder %s3117_s25, %s3117_s25 }
  0x22   :  { %p3124_p13 = por %p3123_p12, %p3122_p11 }
  0x24   :  { %p3125_p0 = pnand %p3124_p13, %p3118_p10 }
  0x26   :  { %3128 = shalt.err (!%p3125_p0)
}
  0x27   :  { %98 = dma.hbm_to_vmem [thread:$0]  %s3480_s6, 16384, %s93_s22, [#allocation15], %s3285_s18, %s3285_s18, %s3286_s19  }
  0x28   :  { %s3137_s4 = scalar_lea.vmem %s33_s24, 2048  ;;  %p3142_p2 = scmp.lt.s32.totalorder %s33_s24, %s33_s24 }
  0x29   :  { %p3138_p1 = scmp.ne.s32.totalorder %s33_s24, %s3137_s4  ;;  %p3143_p3 = scmp.lt.s32.totalorder %s3137_s4, %s3137_s4 }
  0x2b   :  { %p3144_p4 = por %p3143_p3, %p3142_p2 }
  0x2d   :  { %p3145_p5 = pnand %p3144_p4, %p3138_p1 }
  0x2f   :  { %3148 = shalt.err (!%p3145_p5)
}
  0x30   :  { %s3289_s30 = smov 64   ;;  %s3290_s14 = smov 4  }
  0x31   :  { %38 = dma.hbm_to_vmem [thread:$0]  %s3475_s1, 2048, %s33_s24, [#allocation6], %s3289_s30, %s3289_s30, %s3290_s14  }
  0x32   :  { %s3291_s17 = smov [#allocation10]   ;;  %s3292_s21 = smov [#allocation13]  }
  0x33   :  { %s56_s20 = sshll.u32 %s3291_s17, 4  ;;  %s80_s2 = sshll.u32 %s3292_s21, 4  ;;  %s57_s20 = int_to_ptr.vmem [resolvable:$true] %s56_s20  ;;  %s81_s2 = int_to_ptr.vmem [resolvable:$true] %s80_s2 }
  0x34   :  { %s3157_s6 = scalar_lea.vmem %s57_s20, 768  ;;  %p3162_p7 = scmp.lt.s32.totalorder %s57_s20, %s57_s20 }
  0x35   :  { %p3158_p6 = scmp.ne.s32.totalorder %s57_s20, %s3157_s6  ;;  %p3163_p8 = scmp.lt.s32.totalorder %s3157_s6, %s3157_s6 }
  0x37   :  { %p3164_p9 = por %p3163_p8, %p3162_p7 }
  0x39   :  { %p3165_p10 = pnand %p3164_p9, %p3158_p6 }
  0x3b   :  { %3168 = shalt.err (!%p3165_p10)
}
  0x3c   :  { %62 = dma.hbm_to_vmem [thread:$0]  %s3477_s3, 768, %s57_s20, [#allocation9], %s3282_s28, %s3282_s28, %s3283_s29  }
  0x3d   :  { %s3177_s1 = scalar_lea.vmem %s81_s2, 4096  ;;  %p3182_p12 = scmp.lt.s32.totalorder %s81_s2, %s81_s2 }
  0x3e   :  { %p3178_p11 = scmp.ne.s32.totalorder %s81_s2, %s3177_s1  ;;  %p3183_p13 = scmp.lt.s32.totalorder %s3177_s1, %s3177_s1 }
  0x40   :  { %p3184_p0 = por %p3183_p13, %p3182_p12 }
  0x42   :  { %p3185_p1 = pnand %p3184_p0, %p3178_p11 }
  0x44   :  { %3188 = shalt.err (!%p3185_p1)
}
  0x45   :  { %86 = dma.hbm_to_vmem [thread:$0]  %s3479_s5, 4096, %s81_s2, [#allocation12], %s3285_s18, %s3285_s18, %s3286_s19  }
  0x46   :  { %s3293_s26 = smov [#allocation16]  }
  0x47   :  { %s108_s27 = sshll.u32 %s3293_s26, 4  ;;  %s109_s27 = int_to_ptr.vmem [resolvable:$true] %s108_s27 }
  0x48   :  { %s3197_s4 = scalar_lea.vmem %s109_s27, 2048  ;;  %p3202_p3 = scmp.lt.s32.totalorder %s109_s27, %s109_s27 }
  0x49   :  { %p3198_p2 = scmp.ne.s32.totalorder %s109_s27, %s3197_s4  ;;  %p3203_p4 = scmp.lt.s32.totalorder %s3197_s4, %s3197_s4 }
  0x4b   :  { %p3204_p5 = por %p3203_p4, %p3202_p3 }
  0x4d   :  { %p3205_p6 = pnand %p3204_p5, %p3198_p2 }
  0x4f   :  { %3208 = shalt.err (!%p3205_p6)
}
  0x50   :  { %114 = dma.hbm_to_vmem [thread:$0]  %s3483_s9, 2048, %s109_s27, [#allocation15], %s3282_s28, %s3282_s28, %s3283_s29  }
  0x51   :  { %3269 = dma.done.wait [#allocation6], 2048  }
  0x52   :  { %3270 = vsyncadd [#allocation6], 4294965248 }
  0x53   :  { %3271 = dma.done.wait [#allocation9], 1536  }
  0x54   :  { %3272 = vsyncadd [#allocation9], 4294965760 }
  0x55   :  { %3273 = dma.done.wait [#allocation12], 8192  }
  0x56   :  { %3274 = vsyncadd [#allocation12], 4294959104 }
  0x57   :  { %3275 = dma.done.wait [#allocation15], 18432  }
  0x58   :  { %3276 = vsyncadd [#allocation15], 4294948864  ;;  %v3294_v0 = vmov 0   ;;  %v167_v1 = vld [vmem:[%s3474_s0] sm:$0xff]  ;;  %v168_v2 = vld [vmem:[%s3474_s0 + $0x8] sm:$0xff]  ;;  %v169_v32 = vlaneseq }
  0x59   :  { %2644 = vset.pattern.permute.xlu0 %v3294_v0  ;;  %604 = vmatprep.mubr.bf16.mxu1 %v3294_v0  ;;  %v2645_v3 = vld [vmem:[#allocation5 + $0x78] sm:$0xff]   ;;  %v2647_v5 = vld [vmem:[#allocation5 + $0x70] sm:$0xff]   ;;  %v2649_v7 = vld [vmem:[#allocation5 + $0x68] sm:$0xff]   ;;  %v3295_v39 = vmov 1.0|1.0  }
  0x5a   :  { %173 = vperm.xlu0 %2644, %v167_v1   ;;  %v2646_v4 = vld [vmem:[#allocation5 + $0x38] sm:$0xff]   ;;  %2604 = vmatprep.subr.bf16.mxu0 %v2645_v3  ;;  %v2648_v6 = vld [vmem:[#allocation5 + $0x30] sm:$0xff]   ;;  %v2650_v8 = vld [vmem:[#allocation5 + $0x28] sm:$0xff]   ;;  %v170_v33 = vand.u32 127, %v169_v32 }
  0x5b   :  { %2605 = vmatpush3.bf16.msra.mxu0 %v2646_v4  ;;  %v2651_v9 = vld [vmem:[#allocation5 + $0x60] sm:$0xff]   ;;  %v2653_v11 = vld [vmem:[#allocation5 + $0x58] sm:$0xff]   ;;  %v2655_v13 = vld [vmem:[#allocation5 + $0x50] sm:$0xff]  }
  0x5c   :  { %2606 = vmatprep.subr.bf16.mxu0 %v2647_v5  ;;  %v2652_v10 = vld [vmem:[#allocation5 + $0x20] sm:$0xff]   ;;  %v2654_v12 = vld [vmem:[#allocation5 + $0x18] sm:$0xff]   ;;  %v2656_v15 = vld [vmem:[#allocation5 + $0x10] sm:$0xff]   ;;  %v171_v35 = vadd.s32 128, %v170_v33 }
  0x5d   :  { %v2661_v14 = vld [vmem:[#allocation11 + $0xe4] ss:$16 sps:$4 sm:$0xff]   ;;  %v2666_v16 = vld [vmem:[#allocation11 + $0xe0] ss:$16 sps:$4 sm:$0xff]   ;;  %v2657_v18 = vld [vmem:[#allocation5 + $0x48] sm:$0xff]  }
  0x5e   :  { %176 = vperm.xlu0 %2644, %v168_v2   ;;  %572 = vmatprep.subr.bf16.mxu1 %v2661_v14  ;;  %v2667_v17 = vld [vmem:[#allocation11 + $0xc4] ss:$16 sps:$4 sm:$0xff]   ;;  %v2672_v19 = vld [vmem:[#allocation11 + $0xc0] ss:$16 sps:$4 sm:$0xff]   ;;  %v2658_v21 = vld [vmem:[#allocation5 + $0x8] sm:$0xff]  }
  0x5f   :  { %2607 = vmatpush3.bf16.msra.mxu0 %v2648_v6  ;;  %573 = vmatpush1.bf16.msra.mxu1 %v2666_v16  ;;  %v2673_v20 = vld [vmem:[#allocation11 + $0xa4] ss:$16 sps:$4 sm:$0xff]   ;;  %v2678_v23 = vld [vmem:[#allocation11 + $0xa0] ss:$16 sps:$4 sm:$0xff]   ;;  %v2665_v26 = vld [vmem:[#allocation11 + $0xec] ss:$16 sps:$4 sm:$0xff]  }
  0x60   :  { %2608 = vmatprep.subr.bf16.mxu0 %v2649_v7  ;;  %574 = vmatprep.subr.bf16.mxu1 %v2667_v17  ;;  %v2659_v22 = vld [vmem:[#allocation5 + $0x40] sm:$0xff]   ;;  %v2663_v37 = vld [vmem:[#allocation11 + $0xe8] ss:$16 sps:$4 sm:$0xff]   ;;  %v2671_v38 = vld [vmem:[#allocation11 + $0xcc] ss:$16 sps:$4 sm:$0xff]  }
  0x61   :  { %v2679_v24 = vld [vmem:[#allocation11 + $0x84] ss:$16 sps:$4 sm:$0xff]   ;;  %v2684_v27 = vld [vmem:[#allocation11 + $0x80] ss:$16 sps:$4 sm:$0xff]   ;;  %v2669_v40 = vld [vmem:[#allocation11 + $0xc8] ss:$16 sps:$4 sm:$0xff]  }
  0x62   :  { %v2660_v25 = vld [vmem:[#allocation5] sm:$0xff]   ;;  %v2677_v41 = vld [vmem:[#allocation11 + $0xac] ss:$16 sps:$4 sm:$0xff]   ;;  %v2675_v42 = vld [vmem:[#allocation11 + $0xa8] ss:$16 sps:$4 sm:$0xff]  }
  0x63   :  { %2609 = vmatpush3.bf16.msra.mxu0 %v2650_v8  ;;  %575 = vmatpush1.bf16.msra.mxu1 %v2672_v19  ;;  %v2685_v28 = vld [vmem:[#allocation11 + $0x64] ss:$16 sps:$4 sm:$0xff]   ;;  %v2690_v29 = vld [vmem:[#allocation11 + $0x60] ss:$16 sps:$4 sm:$0xff]   ;;  %v2683_v43 = vld [vmem:[#allocation11 + $0x8c] ss:$16 sps:$4 sm:$0xff]  }
  0x64   :  { %2610 = vmatprep.subr.bf16.mxu0 %v2651_v9  ;;  %576 = vmatprep.subr.bf16.mxu1 %v2673_v20  ;;  %v2691_v30 = vld [vmem:[#allocation11 + $0x44] ss:$16 sps:$4 sm:$0xff]   ;;  %v2696_v31 = vld [vmem:[#allocation11 + $0x40] ss:$16 sps:$4 sm:$0xff]   ;;  %v2681_v44 = vld [vmem:[#allocation11 + $0x88] ss:$16 sps:$4 sm:$0xff]  }
  0x65   :  { %v2689_v45 = vld [vmem:[#allocation11 + $0x6c] ss:$16 sps:$4 sm:$0xff]   ;;  %v2687_v46 = vld [vmem:[#allocation11 + $0x68] ss:$16 sps:$4 sm:$0xff]   ;;  %v2697_v49 = vld [vmem:[#allocation11 + $0x24] ss:$16 sps:$4 sm:$0xff]  }
  0x66   :  { %v2695_v47 = vld [vmem:[#allocation11 + $0x4c] ss:$16 sps:$4 sm:$0xff]   ;;  %v2693_v48 = vld [vmem:[#allocation11 + $0x48] ss:$16 sps:$4 sm:$0xff]   ;;  %v2702_v52 = vld [vmem:[#allocation11 + $0x20] ss:$16 sps:$4 sm:$0xff]  }
  0x67   :  { %2611 = vmatpush3.bf16.msra.mxu0 %v2652_v10  ;;  %577 = vmatpush1.bf16.msra.mxu1 %v2678_v23  ;;  %v2701_v50 = vld [vmem:[#allocation11 + $0x2c] ss:$16 sps:$4 sm:$0xff]   ;;  %v2699_v51 = vld [vmem:[#allocation11 + $0x28] ss:$16 sps:$4 sm:$0xff]   ;;  %v2703_v53 = vld [vmem:[#allocation11 + $0x4] ss:$16 sps:$4 sm:$0xff]  }
  0x68   :  { %2612 = vmatprep.subr.bf16.mxu0 %v2653_v11  ;;  %578 = vmatprep.subr.bf16.mxu1 %v2679_v24  ;;  %v2707_v54 = vld [vmem:[#allocation11 + $0xc] ss:$16 sps:$4 sm:$0xff]   ;;  %v2705_v55 = vld [vmem:[#allocation11 + $0x8] ss:$16 sps:$4 sm:$0xff]   ;;  %v2708_v56 = vld [vmem:[#allocation11] ss:$16 sps:$4 sm:$0xff]  }
  0x69   :  { %v2711_v57 = vld [vmem:[#allocation13 + $0xe4] ss:$16 sps:$4 sm:$0xff]   ;;  %v2714_v58 = vld [vmem:[#allocation13 + $0xec] ss:$16 sps:$4 sm:$0xff]   ;;  %v2709_v2 = vld [vmem:[#allocation13 + $0xe0] ss:$16 sps:$4 sm:$0xff]  }
  0x6a   :  { %v2712_v3 = vld [vmem:[#allocation13 + $0xe8] ss:$16 sps:$4 sm:$0xff]   ;;  %v2717_v5 = vld [vmem:[#allocation13 + $0xc4] ss:$16 sps:$4 sm:$0xff]   ;;  %v2720_v6 = vld [vmem:[#allocation13 + $0xcc] ss:$16 sps:$4 sm:$0xff]  }
  0x6b   :  { %2613 = vmatpush3.bf16.msra.mxu0 %v2654_v12  ;;  %579 = vmatpush1.bf16.msra.mxu1 %v2684_v27  ;;  %v2715_v7 = vld [vmem:[#allocation13 + $0xc0] ss:$16 sps:$4 sm:$0xff]   ;;  %v2718_v8 = vld [vmem:[#allocation13 + $0xc8] ss:$16 sps:$4 sm:$0xff]   ;;  %v2723_v9 = vld [vmem:[#allocation13 + $0xa4] ss:$16 sps:$4 sm:$0xff]  }
  0x6c   :  { %2614 = vmatprep.subr.bf16.mxu0 %v2655_v13  ;;  %580 = vmatprep.subr.bf16.mxu1 %v2685_v28  ;;  %v2726_v10 = vld [vmem:[#allocation13 + $0xac] ss:$16 sps:$4 sm:$0xff]   ;;  %v2721_v11 = vld [vmem:[#allocation13 + $0xa0] ss:$16 sps:$4 sm:$0xff]   ;;  %v2724_v12 = vld [vmem:[#allocation13 + $0xa8] ss:$16 sps:$4 sm:$0xff]  }
  0x6d   :  { %v2729_v13 = vld [vmem:[#allocation13 + $0x84] ss:$16 sps:$4 sm:$0xff]   ;;  %v2732_v14 = vld [vmem:[#allocation13 + $0x8c] ss:$16 sps:$4 sm:$0xff]   ;;  %v2730_v16 = vld [vmem:[#allocation13 + $0x88] ss:$16 sps:$4 sm:$0xff]  }
  0x6e   :  { %v2735_v17 = vld [vmem:[#allocation13 + $0x64] ss:$16 sps:$4 sm:$0xff]   ;;  %v2733_v19 = vld [vmem:[#allocation13 + $0x60] ss:$16 sps:$4 sm:$0xff]   ;;  %v2736_v20 = vld [vmem:[#allocation13 + $0x68] ss:$16 sps:$4 sm:$0xff]  }
  0x6f   :  { %2615 = vmatpush3.bf16.msra.mxu0 %v2656_v15  ;;  %581 = vmatpush1.bf16.msra.mxu1 %v2690_v29  ;;  %v2727_v15 = vld [vmem:[#allocation13 + $0x80] ss:$16 sps:$4 sm:$0xff]   ;;  %v2742_v24 = vld [vmem:[#allocation13 + $0x48] ss:$16 sps:$4 sm:$0xff]   ;;  %v2753_v29 = vld [vmem:[#allocation13 + $0x4] ss:$16 sps:$4 sm:$0xff]  }
  0x70   :  { %2616 = vmatprep.subr.bf16.mxu0 %v2657_v18  ;;  %582 = vmatprep.subr.bf16.mxu1 %v2691_v30  ;;  %v2738_v18 = vld [vmem:[#allocation13 + $0x6c] ss:$16 sps:$4 sm:$0xff]   ;;  %v2739_v23 = vld [vmem:[#allocation13 + $0x40] ss:$16 sps:$4 sm:$0xff]   ;;  %v2748_v28 = vld [vmem:[#allocation13 + $0x28] ss:$16 sps:$4 sm:$0xff]  }
  0x71   :  { %v2745_v27 = vld [vmem:[#allocation13 + $0x20] ss:$16 sps:$4 sm:$0xff]   ;;  %v2756_v30 = vld [vmem:[#allocation13 + $0xc] ss:$16 sps:$4 sm:$0xff]  }
  0x73   :  { %2617 = vmatpush3.bf16.msra.mxu0 %v2658_v21  ;;  %583 = vmatpush1.bf16.msra.mxu1 %v2696_v31  ;;  %v2741_v21 = vld [vmem:[#allocation13 + $0x44] ss:$16 sps:$4 sm:$0xff]   ;;  %v2751_v31 = vld [vmem:[#allocation13] ss:$16 sps:$4 sm:$0xff]  }
  0x74   :  { %2618 = vmatprep.subr.bf16.mxu0 %v2659_v22  ;;  %584 = vmatprep.subr.bf16.mxu1 %v2697_v49  ;;  %v2744_v22 = vld [vmem:[#allocation13 + $0x4c] ss:$16 sps:$4 sm:$0xff]   ;;  %v2777_v49 = vld [vmem:[#allocation14 + $0x84] ss:$16 sps:$4 sm:$0xff]  }
  0x77   :  { %2619 = vmatpush3.bf16.msra.mxu0 %v2660_v25  ;;  %585 = vmatpush1.bf16.msra.mxu1 %v2702_v52  ;;  %v2747_v25 = vld [vmem:[#allocation13 + $0x24] ss:$16 sps:$4 sm:$0xff]   ;;  %v2778_v52 = vld [vmem:[#allocation14 + $0x88] ss:$16 sps:$4 sm:$0xff]  }
  0x78   :  { %615 = vmatprep.subr.bf16.mxu0 %v2665_v26  ;;  %586 = vmatprep.subr.bf16.mxu1 %v2703_v53  ;;  %v2750_v26 = vld [vmem:[#allocation13 + $0x2c] ss:$16 sps:$4 sm:$0xff]   ;;  %v2783_v53 = vld [vmem:[#allocation14 + $0x64] ss:$16 sps:$4 sm:$0xff]  }
  0x7b   :  { %587 = vmatpush1.bf16.msra.mxu1 %v2708_v56  ;;  %v2784_v56 = vld [vmem:[#allocation14 + $0x68] ss:$16 sps:$4 sm:$0xff]  }
  0x7c   :  { %883 = vmatprep.subr.bf16.mxu1 %v2711_v57  ;;  %v2789_v57 = vld [vmem:[#allocation14 + $0x44] ss:$16 sps:$4 sm:$0xff]  }
  0xd5   :  { %v174_v34 = vpop.permute.xlu0 %173 }
  0xd6   :  { %vm178_vm0 = vcmp.eq.s32.totalorder %v174_v34, %v170_v33  ;;  %vm179_vm4 = vcmp.eq.s32.totalorder %v174_v34, %v171_v35  ;;  %v143_v34 = vld [vmem:[#allocation8] sm:$0xff] }
  0xd9   :  { %v177_v36 = vpop.permute.xlu0 %176 }
  0xda   :  { %vm180_vm1 = vcmp.eq.s32.totalorder %v177_v36, %v170_v33  ;;  %vm181_vm2 = vcmp.eq.s32.totalorder %v177_v36, %v171_v35  ;;  %v2754_v33 = vld [vmem:[#allocation13 + $0x8] ss:$16 sps:$4 sm:$0xff]  }
  0xdb   :  { %vm2375_vm3 = vmpackc.low %vm180_vm1, %vm178_vm0  ;;  %v144_v35 = vld [vmem:[#allocation8 + $0x8] sm:$0xff] }
  0xdc   :  { %vm2373_vm5 = vmpackc.low %vm181_vm2, %vm179_vm4  ;;  %v690_v36 = vpack.c.bf16 %v144_v35, %v143_v34  ;;  %v2846_v34 = vld [vmem:[#allocation14 + $0x12c] ss:$16 sps:$4 sm:$0xff]  }
  0xdd   :  { %2374 = vmatprep.mubr.msk.bf16.mxu0 %vm2373_vm5, %v3295_v39 }
  0xde   :  { %2376 = vmatmul.mubr.msk.bf16.vlgmr.msra.gmra.mxu0 %vm2375_vm3, %v3295_v39  ;;  %v2760_v39 = vld [vmem:[#allocation14 + $0xe8] ss:$16 sps:$4 sm:$0xff]  }
  0xdf   :  { %616 = vmatpush1.bf16.msra.mxu0 %v2663_v37  ;;  %647 = vmatprep.mubr.bf16.mxu0 %v3294_v0  ;;  %v2757_v37 = vld [vmem:[#allocation14 + $0xe0] ss:$16 sps:$4 sm:$0xff]  }
  0xe0   :  { %617 = vmatprep.subr.bf16.mxu0 %v2671_v38  ;;  %v2759_v38 = vld [vmem:[#allocation14 + $0xe4] ss:$16 sps:$4 sm:$0xff]  }
  0xe3   :  { %618 = vmatpush1.bf16.msra.mxu0 %v2669_v40  ;;  %v2762_v40 = vld [vmem:[#allocation14 + $0xec] ss:$16 sps:$4 sm:$0xff]  }
  0xe4   :  { %619 = vmatprep.subr.bf16.mxu0 %v2677_v41  ;;  %v2765_v41 = vld [vmem:[#allocation14 + $0xc4] ss:$16 sps:$4 sm:$0xff]  }
  0xe7   :  { %620 = vmatpush1.bf16.msra.mxu0 %v2675_v42  ;;  %v2768_v42 = vld [vmem:[#allocation14 + $0xcc] ss:$16 sps:$4 sm:$0xff]  }
  0xe8   :  { %621 = vmatprep.subr.bf16.mxu0 %v2683_v43  ;;  %v2763_v43 = vld [vmem:[#allocation14 + $0xc0] ss:$16 sps:$4 sm:$0xff]  }
  0xeb   :  { %622 = vmatpush1.bf16.msra.mxu0 %v2681_v44  ;;  %v2766_v44 = vld [vmem:[#allocation14 + $0xc8] ss:$16 sps:$4 sm:$0xff]  }
  0xec   :  { %623 = vmatprep.subr.bf16.mxu0 %v2689_v45  ;;  %v2771_v45 = vld [vmem:[#allocation14 + $0xa4] ss:$16 sps:$4 sm:$0xff]  }
  0xef   :  { %624 = vmatpush1.bf16.msra.mxu0 %v2687_v46  ;;  %v2774_v46 = vld [vmem:[#allocation14 + $0xac] ss:$16 sps:$4 sm:$0xff]  }
  0xf0   :  { %625 = vmatprep.subr.bf16.mxu0 %v2695_v47  ;;  %v2769_v47 = vld [vmem:[#allocation14 + $0xa0] ss:$16 sps:$4 sm:$0xff]  }
  0xf3   :  { %626 = vmatpush1.bf16.msra.mxu0 %v2693_v48  ;;  %v2772_v48 = vld [vmem:[#allocation14 + $0xa8] ss:$16 sps:$4 sm:$0xff]  }
  0xf4   :  { %627 = vmatprep.subr.bf16.mxu0 %v2701_v50  ;;  %v2780_v50 = vld [vmem:[#allocation14 + $0x8c] ss:$16 sps:$4 sm:$0xff]  }
  0xf7   :  { %628 = vmatpush1.bf16.msra.mxu0 %v2699_v51  ;;  %v2775_v51 = vld [vmem:[#allocation14 + $0x80] ss:$16 sps:$4 sm:$0xff]  }
  0xf8   :  { %629 = vmatprep.subr.bf16.mxu0 %v2707_v54  ;;  %v2786_v54 = vld [vmem:[#allocation14 + $0x6c] ss:$16 sps:$4 sm:$0xff]  }
  0xfb   :  { %630 = vmatpush1.bf16.msra.mxu0 %v2705_v55  ;;  %v2781_v55 = vld [vmem:[#allocation14 + $0x60] ss:$16 sps:$4 sm:$0xff]  }
  0xfc   :  { %926 = vmatprep.subr.bf16.mxu0 %v2714_v58  ;;  %v2792_v58 = vld [vmem:[#allocation14 + $0x4c] ss:$16 sps:$4 sm:$0xff]  }
 0x19e   :  { %v2620_v59 = vpop.f32.mrf.mxu0 }
 0x1a0   :  { %v2621_v60 = vpop.f32.mrf.mxu0 }
 0x1a1   :  { %v2622_v63 = vadd.f32 %v2621_v60, %v2620_v59  ;;  %v2787_v59 = vld [vmem:[#allocation14 + $0x40] ss:$16 sps:$4 sm:$0xff]   ;;  %v2790_v60 = vld [vmem:[#allocation14 + $0x48] ss:$16 sps:$4 sm:$0xff]  }
 0x1a2   :  { %v2623_v61 = vpop.f32.mrf.mxu0 }
 0x1a4   :  { %v2624_v62 = vpop.f32.mrf.mxu0 }
 0x1a5   :  { %v2625_v1 = vadd.f32 %v2624_v62, %v2623_v61  ;;  %v2795_v61 = vld [vmem:[#allocation14 + $0x24] ss:$16 sps:$4 sm:$0xff]   ;;  %v2798_v62 = vld [vmem:[#allocation14 + $0x2c] ss:$16 sps:$4 sm:$0xff]  }
 0x1a7   :  { %v357_v4 = vpack.c.bf16 %v2625_v1, %v2622_v63  ;;  %v2793_v63 = vld [vmem:[#allocation14 + $0x20] ss:$16 sps:$4 sm:$0xff]   ;;  %v2796_v1 = vld [vmem:[#allocation14 + $0x28] ss:$16 sps:$4 sm:$0xff]  }
 0x1a9   :  { %605 = vmatmul.mubr.bf16.vlgmr.msra.gmra.mxu1 %v357_v4  ;;  %648 = vmatmul.mubr.bf16.vlgmr.msra.gmra.mxu0 %v357_v4  ;;  %v2799_v4 = vld [vmem:[#allocation14] ss:$16 sps:$4 sm:$0xff]  }
 0x1aa   :  { %884 = vmatpush1.bf16.msra.mxu1 %v2709_v2  ;;  %927 = vmatpush1.bf16.msra.mxu0 %v2712_v3  ;;  %v2801_v2 = vld [vmem:[#allocation14 + $0x4] ss:$16 sps:$4 sm:$0xff]   ;;  %v2804_v3 = vld [vmem:[#allocation14 + $0xc] ss:$16 sps:$4 sm:$0xff]  }
 0x1ab   :  { %885 = vmatprep.subr.bf16.mxu1 %v2717_v5  ;;  %928 = vmatprep.subr.bf16.mxu0 %v2720_v6  ;;  %v2802_v5 = vld [vmem:[#allocation14 + $0x8] ss:$16 sps:$4 sm:$0xff]   ;;  %v2807_v6 = vld [vmem:[#allocation14 + $0x1e4] ss:$16 sps:$4 sm:$0xff]  }
 0x1ac   :  { %915 = vmatprep.mubr.bf16.mxu1 %v3294_v0  ;;  %958 = vmatprep.mubr.bf16.mxu0 %v3294_v0 }
 0x1ae   :  { %886 = vmatpush1.bf16.msra.mxu1 %v2715_v7  ;;  %929 = vmatpush1.bf16.msra.mxu0 %v2718_v8  ;;  %v2810_v7 = vld [vmem:[#allocation14 + $0x1ec] ss:$16 sps:$4 sm:$0xff]   ;;  %v2805_v8 = vld [vmem:[#allocation14 + $0x1e0] ss:$16 sps:$4 sm:$0xff]  }
 0x1af   :  { %887 = vmatprep.subr.bf16.mxu1 %v2723_v9  ;;  %930 = vmatprep.subr.bf16.mxu0 %v2726_v10  ;;  %v2808_v9 = vld [vmem:[#allocation14 + $0x1e8] ss:$16 sps:$4 sm:$0xff]   ;;  %v2813_v10 = vld [vmem:[#allocation14 + $0x1c4] ss:$16 sps:$4 sm:$0xff]  }
 0x1b2   :  { %888 = vmatpush1.bf16.msra.mxu1 %v2721_v11  ;;  %931 = vmatpush1.bf16.msra.mxu0 %v2724_v12  ;;  %v2816_v11 = vld [vmem:[#allocation14 + $0x1cc] ss:$16 sps:$4 sm:$0xff]   ;;  %v2811_v12 = vld [vmem:[#allocation14 + $0x1c0] ss:$16 sps:$4 sm:$0xff]  }
 0x1b3   :  { %889 = vmatprep.subr.bf16.mxu1 %v2729_v13  ;;  %932 = vmatprep.subr.bf16.mxu0 %v2732_v14  ;;  %v2814_v13 = vld [vmem:[#allocation14 + $0x1c8] ss:$16 sps:$4 sm:$0xff]   ;;  %v2819_v14 = vld [vmem:[#allocation14 + $0x1a4] ss:$16 sps:$4 sm:$0xff]  }
 0x1b6   :  { %890 = vmatpush1.bf16.msra.mxu1 %v2727_v15  ;;  %933 = vmatpush1.bf16.msra.mxu0 %v2730_v16  ;;  %v2822_v15 = vld [vmem:[#allocation14 + $0x1ac] ss:$16 sps:$4 sm:$0xff]   ;;  %v2817_v16 = vld [vmem:[#allocation14 + $0x1a0] ss:$16 sps:$4 sm:$0xff]  }
 0x1b7   :  { %891 = vmatprep.subr.bf16.mxu1 %v2735_v17  ;;  %934 = vmatprep.subr.bf16.mxu0 %v2738_v18  ;;  %v2820_v17 = vld [vmem:[#allocation14 + $0x1a8] ss:$16 sps:$4 sm:$0xff]   ;;  %v2825_v18 = vld [vmem:[#allocation14 + $0x184] ss:$16 sps:$4 sm:$0xff]  }
 0x1ba   :  { %892 = vmatpush1.bf16.msra.mxu1 %v2733_v19  ;;  %935 = vmatpush1.bf16.msra.mxu0 %v2736_v20  ;;  %v2828_v19 = vld [vmem:[#allocation14 + $0x18c] ss:$16 sps:$4 sm:$0xff]   ;;  %v2823_v20 = vld [vmem:[#allocation14 + $0x180] ss:$16 sps:$4 sm:$0xff]  }
 0x1bb   :  { %893 = vmatprep.subr.bf16.mxu1 %v2741_v21  ;;  %936 = vmatprep.subr.bf16.mxu0 %v2744_v22  ;;  %v2826_v21 = vld [vmem:[#allocation14 + $0x188] ss:$16 sps:$4 sm:$0xff]   ;;  %v2831_v22 = vld [vmem:[#allocation14 + $0x164] ss:$16 sps:$4 sm:$0xff]  }
 0x1be   :  { %894 = vmatpush1.bf16.msra.mxu1 %v2739_v23  ;;  %937 = vmatpush1.bf16.msra.mxu0 %v2742_v24  ;;  %v2834_v23 = vld [vmem:[#allocation14 + $0x16c] ss:$16 sps:$4 sm:$0xff]   ;;  %v2829_v24 = vld [vmem:[#allocation14 + $0x160] ss:$16 sps:$4 sm:$0xff]  }
 0x1bf   :  { %895 = vmatprep.subr.bf16.mxu1 %v2747_v25  ;;  %938 = vmatprep.subr.bf16.mxu0 %v2750_v26  ;;  %v2832_v25 = vld [vmem:[#allocation14 + $0x168] ss:$16 sps:$4 sm:$0xff]   ;;  %v2837_v26 = vld [vmem:[#allocation14 + $0x144] ss:$16 sps:$4 sm:$0xff]  }
 0x1c2   :  { %896 = vmatpush1.bf16.msra.mxu1 %v2745_v27  ;;  %939 = vmatpush1.bf16.msra.mxu0 %v2748_v28  ;;  %v2840_v27 = vld [vmem:[#allocation14 + $0x14c] ss:$16 sps:$4 sm:$0xff]   ;;  %v2835_v28 = vld [vmem:[#allocation14 + $0x140] ss:$16 sps:$4 sm:$0xff]  }
 0x1c3   :  { %897 = vmatprep.subr.bf16.mxu1 %v2753_v29  ;;  %940 = vmatprep.subr.bf16.mxu0 %v2756_v30  ;;  %v2838_v29 = vld [vmem:[#allocation14 + $0x148] ss:$16 sps:$4 sm:$0xff]   ;;  %v145_v30 = vld [vmem:[#allocation8 + $0x10] sm:$0xff] }
 0x1c6   :  { %898 = vmatpush1.bf16.msra.mxu1 %v2751_v31  ;;  %941 = vmatpush1.bf16.msra.mxu0 %v2754_v33  ;;  %v146_v31 = vld [vmem:[#allocation8 + $0x18] sm:$0xff]  ;;  %v2843_v33 = vld [vmem:[#allocation14 + $0x124] ss:$16 sps:$4 sm:$0xff]  }
 0x1c7   :  { %1433 = vmatprep.subr.bf16.mxu1 %v2759_v38  ;;  %1476 = vmatprep.subr.bf16.mxu0 %v2762_v40  ;;  %v1026_v35 = vpack.c.bf16 %v146_v31, %v145_v30  ;;  %v2849_v38 = vld [vmem:[#allocation14 + $0x104] ss:$16 sps:$4 sm:$0xff]   ;;  %v2847_v40 = vld [vmem:[#allocation14 + $0x100] ss:$16 sps:$4 sm:$0xff]  }
 0x1c9   :  { %916 = vmatmul.mubr.bf16.vlgmr.msra.gmra.mxu1 %v690_v36  ;;  %959 = vmatmul.mubr.bf16.vlgmr.msra.gmra.mxu0 %v690_v36  ;;  %v2841_v36 = vld [vmem:[#allocation14 + $0x120] ss:$16 sps:$4 sm:$0xff]  }
 0x1ca   :  { %1434 = vmatpush1.bf16.msra.mxu1 %v2757_v37  ;;  %1477 = vmatpush1.bf16.msra.mxu0 %v2760_v39  ;;  %v2844_v37 = vld [vmem:[#allocation14 + $0x128] ss:$16 sps:$4 sm:$0xff]   ;;  %v2852_v39 = vld [vmem:[#allocation14 + $0x10c] ss:$16 sps:$4 sm:$0xff]  }
 0x1cb   :  { %1435 = vmatprep.subr.bf16.mxu1 %v2765_v41  ;;  %1478 = vmatprep.subr.bf16.mxu0 %v2768_v42  ;;  %v2850_v41 = vld [vmem:[#allocation14 + $0x108] ss:$16 sps:$4 sm:$0xff]   ;;  %v2855_v42 = vld [vmem:[#allocation14 + $0x2e4] ss:$16 sps:$4 sm:$0xff]  }
 0x1cc   :  { %1465 = vmatprep.mubr.bf16.mxu1 %v1026_v35  ;;  %1508 = vmatprep.mubr.bf16.mxu0 %v1026_v35 }
 0x1ce   :  { %1436 = vmatpush1.bf16.msra.mxu1 %v2763_v43  ;;  %1479 = vmatpush1.bf16.msra.mxu0 %v2766_v44  ;;  %v2858_v43 = vld [vmem:[#allocation14 + $0x2ec] ss:$16 sps:$4 sm:$0xff]  }
 0x1cf   :  { %1437 = vmatprep.subr.bf16.mxu1 %v2771_v45  ;;  %1480 = vmatprep.subr.bf16.mxu0 %v2774_v46  ;;  %v393_v45 = vshrl.u32 %v169_v32, 7 }
 0x1d2   :  { %1438 = vmatpush1.bf16.msra.mxu1 %v2769_v47  ;;  %1481 = vmatpush1.bf16.msra.mxu0 %v2772_v48  ;;  %v3421_v48 = vsub.s32 0, %v393_v45 }
 0x1d3   :  { %1439 = vmatprep.subr.bf16.mxu1 %v2777_v49  ;;  %1482 = vmatprep.subr.bf16.mxu0 %v2780_v50  ;;  %v390_v50 = vld [vmem:[%s3481_s7] sm:$0xf] }
 0x1d6   :  { %1440 = vmatpush1.bf16.msra.mxu1 %v2775_v51  ;;  %1483 = vmatpush1.bf16.msra.mxu0 %v2778_v52  ;;  %v3426_v51 = vsub.s32 1, %v393_v45 }
 0x1d7   :  { %1441 = vmatprep.subr.bf16.mxu1 %v2783_v53  ;;  %1484 = vmatprep.subr.bf16.mxu0 %v2786_v54  ;;  %v395_v53 = vrot.slane %v390_v50, %v3421_v48 }
 0x1da   :  { %1442 = vmatpush1.bf16.msra.mxu1 %v2781_v55  ;;  %1485 = vmatpush1.bf16.msra.mxu0 %v2784_v56  ;;  %v399_v55 = vrot.slane %v390_v50, %v3426_v51 }
 0x1db   :  { %1443 = vmatprep.subr.bf16.mxu1 %v2789_v57  ;;  %1486 = vmatprep.subr.bf16.mxu0 %v2792_v58 }
 0x1de   :  { %1444 = vmatpush1.bf16.msra.mxu1 %v2787_v59  ;;  %1487 = vmatpush1.bf16.msra.mxu0 %v2790_v60 }
 0x1df   :  { %1445 = vmatprep.subr.bf16.mxu1 %v2795_v61  ;;  %1488 = vmatprep.subr.bf16.mxu0 %v2798_v62  ;;  %v3430_v62 = vsub.s32 3, %v393_v45 }
 0x1e2   :  { %1446 = vmatpush1.bf16.msra.mxu1 %v2793_v63  ;;  %1489 = vmatpush1.bf16.msra.mxu0 %v2796_v1 }
 0x1e3   :  { %1447 = vmatprep.subr.bf16.mxu1 %v2801_v2  ;;  %1490 = vmatprep.subr.bf16.mxu0 %v2804_v3 }
 0x1e6   :  { %1448 = vmatpush1.bf16.msra.mxu1 %v2799_v4  ;;  %1491 = vmatpush1.bf16.msra.mxu0 %v2802_v5 }
 0x1e7   :  { %1449 = vmatprep.subr.bf16.mxu1 %v2807_v6  ;;  %1492 = vmatprep.subr.bf16.mxu0 %v2810_v7 }
 0x1ea   :  { %1450 = vmatpush2.bf16.msra.mxu1 %v2805_v8  ;;  %1493 = vmatpush2.bf16.msra.mxu0 %v2808_v9  ;;  %v407_v9 = vrot.slane %v390_v50, %v3430_v62 }
 0x1eb   :  { %1451 = vmatprep.subr.bf16.mxu1 %v2813_v10  ;;  %1494 = vmatprep.subr.bf16.mxu0 %v2816_v11 }
 0x1ee   :  { %1452 = vmatpush2.bf16.msra.mxu1 %v2811_v12  ;;  %1495 = vmatpush2.bf16.msra.mxu0 %v2814_v13  ;;  %v3433_v13 = vsub.s32 2, %v393_v45 }
 0x1ef   :  { %1453 = vmatprep.subr.bf16.mxu1 %v2819_v14  ;;  %1496 = vmatprep.subr.bf16.mxu0 %v2822_v15 }
 0x1f2   :  { %1454 = vmatpush2.bf16.msra.mxu1 %v2817_v16  ;;  %1497 = vmatpush2.bf16.msra.mxu0 %v2820_v17  ;;  %v403_v17 = vrot.slane %v390_v50, %v3433_v13 }
 0x1f3   :  { %1455 = vmatprep.subr.bf16.mxu1 %v2825_v18  ;;  %1498 = vmatprep.subr.bf16.mxu0 %v2828_v19 }
 0x1f6   :  { %1456 = vmatpush2.bf16.msra.mxu1 %v2823_v20  ;;  %1499 = vmatpush2.bf16.msra.mxu0 %v2826_v21 }
 0x1f7   :  { %1457 = vmatprep.subr.bf16.mxu1 %v2831_v22  ;;  %1500 = vmatprep.subr.bf16.mxu0 %v2834_v23 }
 0x1fa   :  { %1458 = vmatpush2.bf16.msra.mxu1 %v2829_v24  ;;  %1501 = vmatpush2.bf16.msra.mxu0 %v2832_v25 }
 0x1fb   :  { %1459 = vmatprep.subr.bf16.mxu1 %v2837_v26  ;;  %1502 = vmatprep.subr.bf16.mxu0 %v2840_v27 }
 0x1fe   :  { %1460 = vmatpush2.bf16.msra.mxu1 %v2835_v28  ;;  %1503 = vmatpush2.bf16.msra.mxu0 %v2838_v29 }
 0x1ff   :  { %1461 = vmatprep.subr.bf16.mxu1 %v2843_v33  ;;  %1504 = vmatprep.subr.bf16.mxu0 %v2846_v34 }
 0x202   :  { %1462 = vmatpush2.bf16.msra.mxu1 %v2841_v36  ;;  %1505 = vmatpush2.bf16.msra.mxu0 %v2844_v37 }
 0x203   :  { %1463 = vmatprep.subr.bf16.mxu1 %v2849_v38  ;;  %1506 = vmatprep.subr.bf16.mxu0 %v2852_v39  ;;  %v155_v39 = vld [vmem:[#allocation10] sm:$0xff] }
 0x206   :  { %1464 = vmatpush2.bf16.msra.mxu1 %v2847_v40  ;;  %1507 = vmatpush2.bf16.msra.mxu0 %v2850_v41 }
 0x207   :  { %1977 = vmatprep.subr.bf16.mxu1 %v2855_v42  ;;  %2020 = vmatprep.subr.bf16.mxu0 %v2858_v43 }
 0x269   :  { %v606_v44 = vpop.f32.mrf.mxu1  ;;  %v649_v46 = vpop.f32.mrf.mxu0 }
 0x26a   :  { %v607_v57 = vadd.f32 %v606_v44, %v395_v53  ;;  %v650_v21 = vadd.f32 %v649_v46, %v403_v17 }
 0x26b   :  { %v608_v47 = vpop.f32.mrf.mxu1  ;;  %v651_v49 = vpop.f32.mrf.mxu0 }
 0x26c   :  { %v609_v59 = vadd.f32 %v608_v47, %v399_v55  ;;  %v652_v16 = vadd.f32 %v651_v49, %v407_v9  ;;  %v156_v47 = vld [vmem:[#allocation10 + $0x8] sm:$0xff] }
 0x26d   :  { %v610_v52 = vpop.f32.mrf.mxu1  ;;  %v653_v54 = vpop.f32.mrf.mxu0 }
 0x26e   :  { %v611_v1 = vadd.f32 %v610_v52, %v395_v53  ;;  %v654_v28 = vadd.f32 %v653_v54, %v403_v17  ;;  %v2882_v17 = vld [vmem:[#allocation14 + $0x26c] ss:$16 sps:$4 sm:$0xff]  }
 0x26f   :  { %v612_v56 = vpop.f32.mrf.mxu1  ;;  %v655_v32 = vpop.f32.mrf.mxu0 }
 0x270   :  { %v613_v5 = vadd.f32 %v612_v56, %v399_v55  ;;  %v656_v20 = vadd.f32 %v655_v32, %v407_v9  ;;  %v2865_v9 = vld [vmem:[#allocation14 + $0x2a0] ss:$16 sps:$4 sm:$0xff]  }
 0x289   :  { %v917_v58 = vpop.f32.mrf.mxu1  ;;  %v960_v61 = vpop.f32.mrf.mxu0 }
 0x28a   :  { %v969_v60 = vadd.f32 %v917_v58, %v607_v57  ;;  %v971_v25 = vadd.f32 %v960_v61, %v650_v21  ;;  %v2888_v21 = vld [vmem:[#allocation14 + $0x24c] ss:$16 sps:$4 sm:$0xff]  }
 0x28b   :  { %v919_v63 = vpop.f32.mrf.mxu1  ;;  %v962_v7 = vpop.f32.mrf.mxu0 }
 0x28c   :  { %v2441_v2 = vmul.f32 -1.442695, %v969_v60  ;;  %v970_v3 = vadd.f32 %v919_v63, %v609_v59  ;;  %v972_v18 = vadd.f32 %v962_v7, %v652_v16  ;;  %v2853_v63 = vld [vmem:[#allocation14 + $0x2e0] ss:$16 sps:$4 sm:$0xff]   ;;  %v2867_v7 = vld [vmem:[#allocation14 + $0x2a4] ss:$16 sps:$4 sm:$0xff]  }
 0x28d   :  { %v921_v4 = vpop.f32.mrf.mxu1  ;;  %v964_v14 = vpop.f32.mrf.mxu0  ;;  %v2879_v16 = vld [vmem:[#allocation14 + $0x264] ss:$16 sps:$4 sm:$0xff]  }
 0x28e   :  { %2973 = vpow2.f32 %v2441_v2  ;;  %v2443_v6 = vmul.f32 -1.442695, %v970_v3  ;;  %v973_v8 = vadd.f32 %v921_v4, %v611_v1  ;;  %v2445_v22 = vmul.f32 -1.442695, %v972_v18  ;;  %v2856_v1 = vld [vmem:[#allocation14 + $0x2e8] ss:$16 sps:$4 sm:$0xff]  }
 0x28f   :  { %v923_v10 = vpop.f32.mrf.mxu1  ;;  %v966_v19 = vpop.f32.mrf.mxu0  ;;  %v975_v33 = vadd.f32 %v964_v14, %v654_v28  ;;  %v2861_v3 = vld [vmem:[#allocation14 + $0x2c4] ss:$16 sps:$4 sm:$0xff]   ;;  %v2864_v4 = vld [vmem:[#allocation14 + $0x2cc] ss:$16 sps:$4 sm:$0xff]   ;;  %v2871_v14 = vld [vmem:[#allocation14 + $0x280] ss:$16 sps:$4 sm:$0xff]  }
 0x290   :  { %2975 = vpow2.f32 %v2443_v6  ;;  %v2442_v11 = vmul.f32 -1.442695, %v973_v8  ;;  %v974_v12 = vadd.f32 %v923_v10, %v613_v5  ;;  %v976_v23 = vadd.f32 %v966_v19, %v656_v20  ;;  %v2859_v5 = vld [vmem:[#allocation14 + $0x2c0] ss:$16 sps:$4 sm:$0xff]   ;;  %v2862_v6 = vld [vmem:[#allocation14 + $0x2c8] ss:$16 sps:$4 sm:$0xff]  }
 0x291   :  { %v2870_v8 = vld [vmem:[#allocation14 + $0x2ac] ss:$16 sps:$4 sm:$0xff]   ;;  %v2868_v10 = vld [vmem:[#allocation14 + $0x2a8] ss:$16 sps:$4 sm:$0xff]   ;;  %v2877_v18 = vld [vmem:[#allocation14 + $0x260] ss:$16 sps:$4 sm:$0xff]  }
 0x292   :  { %2977 = vpow2.f32 %v2442_v11  ;;  %v2444_v15 = vmul.f32 -1.442695, %v974_v12  ;;  %v2446_v29 = vmul.f32 -1.442695, %v976_v23  ;;  %v2873_v11 = vld [vmem:[#allocation14 + $0x284] ss:$16 sps:$4 sm:$0xff]  }
 0x293   :  { %v2876_v12 = vld [vmem:[#allocation14 + $0x28c] ss:$16 sps:$4 sm:$0xff]   ;;  %v2880_v19 = vld [vmem:[#allocation14 + $0x268] ss:$16 sps:$4 sm:$0xff]   ;;  %v2885_v20 = vld [vmem:[#allocation14 + $0x244] ss:$16 sps:$4 sm:$0xff]  }
 0x294   :  { %2979 = vpow2.f32 %v2444_v15  ;;  %v2874_v15 = vld [vmem:[#allocation14 + $0x288] ss:$16 sps:$4 sm:$0xff]   ;;  %v2897_v28 = vld [vmem:[#allocation14 + $0x204] ss:$16 sps:$4 sm:$0xff]  }
 0x295   :  { %2981 = vpow2.f32 %v2445_v22  ;;  %v2883_v22 = vld [vmem:[#allocation14 + $0x240] ss:$16 sps:$4 sm:$0xff]   ;;  %v2886_v23 = vld [vmem:[#allocation14 + $0x248] ss:$16 sps:$4 sm:$0xff]  }
 0x29b   :  { %v2974_v24 = vpop.eup %2973 }
 0x29c   :  { %v983_v26 = vadd.f32 1.0, %v2974_v24  ;;  %v2891_v24 = vld [vmem:[#allocation14 + $0x224] ss:$16 sps:$4 sm:$0xff]  }
 0x29d   :  { %v2976_v27 = vpop.eup %2975 }
 0x29e   :  { %2983 = vrcp.f32 %v983_v26  ;;  %v995_v30 = vadd.f32 1.0, %v2976_v27  ;;  %v2889_v26 = vld [vmem:[#allocation14 + $0x220] ss:$16 sps:$4 sm:$0xff]   ;;  %v2892_v27 = vld [vmem:[#allocation14 + $0x228] ss:$16 sps:$4 sm:$0xff]  }
 0x29f   :  { %v2978_v31 = vpop.eup %2977  ;;  %2985 = vtanh.f32 %v971_v25  ;;  %v2894_v25 = vld [vmem:[#allocation14 + $0x22c] ss:$16 sps:$4 sm:$0xff]  }
 0x2a0   :  { %2987 = vrcp.f32 %v995_v30  ;;  %v984_v34 = vadd.f32 1.0, %v2978_v31  ;;  %v2895_v30 = vld [vmem:[#allocation14 + $0x200] ss:$16 sps:$4 sm:$0xff]   ;;  %v2898_v31 = vld [vmem:[#allocation14 + $0x208] ss:$16 sps:$4 sm:$0xff]  }
 0x2a1   :  { %v2980_v35 = vpop.eup %2979  ;;  %2989 = vpow2.f32 %v2446_v29  ;;  %v2900_v29 = vld [vmem:[#allocation14 + $0x20c] ss:$16 sps:$4 sm:$0xff]  }
 0x2a2   :  { %2991 = vrcp.f32 %v984_v34  ;;  %v996_v36 = vadd.f32 1.0, %v2980_v35  ;;  %v2982_v37 = vpop.eup %2981  ;;  %v2906_v34 = vld [vmem:[#allocation14 + $0x3ec] ss:$16 sps:$4 sm:$0xff]   ;;  %v2901_v35 = vld [vmem:[#allocation14 + $0x3e0] ss:$16 sps:$4 sm:$0xff]  }
 0x2a3   :  { %2993 = vtanh.f32 %v975_v33  ;;  %v1009_v42 = vadd.f32 1.0, %v2982_v37  ;;  %v2903_v33 = vld [vmem:[#allocation14 + $0x3e4] ss:$16 sps:$4 sm:$0xff]  }
 0x2a4   :  { %2995 = vrcp.f32 %v996_v36  ;;  %v2904_v36 = vld [vmem:[#allocation14 + $0x3e8] ss:$16 sps:$4 sm:$0xff]   ;;  %v2909_v37 = vld [vmem:[#allocation14 + $0x3c4] ss:$16 sps:$4 sm:$0xff]  }
 0x2a5   :  { %2997 = vrcp.f32 %v1009_v42  ;;  %v2918_v42 = vld [vmem:[#allocation14 + $0x3ac] ss:$16 sps:$4 sm:$0xff]  }
 0x2ab   :  { %v2984_v38 = vpop.eup %2983 }
 0x2ac   :  { %v2986_v40 = vpop.eup %2985 }
 0x2ad   :  { %v2988_v41 = vpop.eup %2987  ;;  %v1017_v44 = vmul.f32 %v2986_v40, %v2984_v38  ;;  %v2912_v38 = vld [vmem:[#allocation14 + $0x3cc] ss:$16 sps:$4 sm:$0xff]   ;;  %v2910_v40 = vld [vmem:[#allocation14 + $0x3c8] ss:$16 sps:$4 sm:$0xff]  }
 0x2ae   :  { %v2990_v43 = vpop.eup %2989  ;;  %v1015_v45 = vmul.f32 %v2988_v41, %v155_v39  ;;  %v2907_v39 = vld [vmem:[#allocation14 + $0x3c0] ss:$16 sps:$4 sm:$0xff]   ;;  %v2915_v41 = vld [vmem:[#allocation14 + $0x3a4] ss:$16 sps:$4 sm:$0xff]  }
 0x2af   :  { %v2992_v46 = vpop.eup %2991  ;;  %v1010_v53 = vadd.f32 1.0, %v2990_v43  ;;  %v2913_v43 = vld [vmem:[#allocation14 + $0x3a0] ss:$16 sps:$4 sm:$0xff]  }
 0x2b0   :  { %v2994_v49 = vpop.eup %2993  ;;  %v1019_v50 = vadd.f32 %v1017_v44, %v1015_v45  ;;  %v2916_v44 = vld [vmem:[#allocation14 + $0x3a8] ss:$16 sps:$4 sm:$0xff]   ;;  %v2921_v45 = vld [vmem:[#allocation14 + $0x384] ss:$16 sps:$4 sm:$0xff]  }
 0x2b1   :  { %v2996_v52 = vpop.eup %2995  ;;  %v1018_v54 = vmul.f32 %v2994_v49, %v2992_v46  ;;  %v2924_v46 = vld [vmem:[#allocation14 + $0x38c] ss:$16 sps:$4 sm:$0xff]   ;;  %v2922_v49 = vld [vmem:[#allocation14 + $0x388] ss:$16 sps:$4 sm:$0xff]  }
 0x2b2   :  { %2300 = vst [vmem:[#allocation20] sm:$0xff] %v1019_v50  ;;  %v1016_v55 = vmul.f32 %v2996_v52, %v156_v47  ;;  %2999 = vtanh.f32 %v1019_v50  ;;  %v2998_v57 = vpop.eup %2997  ;;  %v2919_v47 = vld [vmem:[#allocation14 + $0x380] ss:$16 sps:$4 sm:$0xff]   ;;  %v2927_v50 = vld [vmem:[#allocation14 + $0x364] ss:$16 sps:$4 sm:$0xff]  }
 0x2b3   :  { %3001 = vrcp.f32 %v1010_v53  ;;  %v2930_v52 = vld [vmem:[#allocation14 + $0x36c] ss:$16 sps:$4 sm:$0xff]   ;;  %v2925_v53 = vld [vmem:[#allocation14 + $0x360] ss:$16 sps:$4 sm:$0xff]  }
 0x2b4   :  { %v1020_v56 = vadd.f32 %v1018_v54, %v1016_v55  ;;  %v2928_v54 = vld [vmem:[#allocation14 + $0x368] ss:$16 sps:$4 sm:$0xff]   ;;  %v2933_v55 = vld [vmem:[#allocation14 + $0x344] ss:$16 sps:$4 sm:$0xff]  }
 0x2b6   :  { %2301 = vst [vmem:[#allocation20 + $0x8] sm:$0xff] %v1020_v56  ;;  %3003 = vtanh.f32 %v1020_v56  ;;  %v2936_v56 = vld [vmem:[#allocation14 + $0x34c] ss:$16 sps:$4 sm:$0xff]  }
 0x2bf   :  { %v3000_v32 = vpop.eup %2999 }
 0x2c0   :  { %v1023_v58 = vmul.f32 %v3000_v32, %v2998_v57  ;;  %v3002_v59 = vpop.eup %3001  ;;  %v2931_v57 = vld [vmem:[#allocation14 + $0x340] ss:$16 sps:$4 sm:$0xff]   ;;  %v2934_v32 = vld [vmem:[#allocation14 + $0x348] ss:$16 sps:$4 sm:$0xff]  }
 0x2c2   :  { %2288 = vst [vmem:[#allocation18] sm:$0xff] %v1023_v58 }
 0x2c3   :  { %v3004_v60 = vpop.eup %3003 }
 0x2c4   :  { %v1024_v61 = vmul.f32 %v3004_v60, %v3002_v59  ;;  %v148_v59 = vld [vmem:[#allocation8 + $0x28] sm:$0xff]  ;;  %v2939_v60 = vld [vmem:[#allocation14 + $0x324] ss:$16 sps:$4 sm:$0xff]  }
 0x2c6   :  { %v1025_v2 = vpack.c.bf16 %v1024_v61, %v1023_v58  ;;  %2289 = vst [vmem:[#allocation18 + $0x8] sm:$0xff] %v1024_v61  ;;  %v147_v58 = vld [vmem:[#allocation8 + $0x20] sm:$0xff]  ;;  %v2942_v61 = vld [vmem:[#allocation14 + $0x32c] ss:$16 sps:$4 sm:$0xff]  }
 0x2c8   :  { %1466 = vmatmul.mubr.bf16.vlgmr.msra.gmra.mxu1 %v1025_v2  ;;  %1509 = vmatmul.mubr.bf16.vlgmr.msra.gmra.mxu0 %v1025_v2  ;;  %v2940_v2 = vld [vmem:[#allocation14 + $0x328] ss:$16 sps:$4 sm:$0xff]  }
 0x2c9   :  { %1978 = vmatpush1.bf16.msra.mxu1 %v2853_v63  ;;  %2021 = vmatpush1.bf16.msra.mxu0 %v2856_v1  ;;  %v1568_v63 = vpack.c.bf16 %v148_v59, %v147_v58  ;;  %v2937_v1 = vld [vmem:[#allocation14 + $0x320] ss:$16 sps:$4 sm:$0xff]  }
 0x2ca   :  { %1979 = vmatprep.subr.bf16.mxu1 %v2861_v3  ;;  %2022 = vmatprep.subr.bf16.mxu0 %v2864_v4  ;;  %v2945_v3 = vld [vmem:[#allocation14 + $0x304] ss:$16 sps:$4 sm:$0xff]   ;;  %v2948_v4 = vld [vmem:[#allocation14 + $0x30c] ss:$16 sps:$4 sm:$0xff]  }
 0x2cb   :  { %2009 = vmatprep.mubr.bf16.mxu1 %v1568_v63  ;;  %2052 = vmatprep.mubr.bf16.mxu0 %v1568_v63 }
 0x2cd   :  { %1980 = vmatpush1.bf16.msra.mxu1 %v2859_v5  ;;  %2023 = vmatpush1.bf16.msra.mxu0 %v2862_v6  ;;  %v2943_v5 = vld [vmem:[#allocation14 + $0x300] ss:$16 sps:$4 sm:$0xff]   ;;  %v2946_v6 = vld [vmem:[#allocation14 + $0x308] ss:$16 sps:$4 sm:$0xff]  }
 0x2ce   :  { %1981 = vmatprep.subr.bf16.mxu1 %v2867_v7  ;;  %2024 = vmatprep.subr.bf16.mxu0 %v2870_v8  ;;  %v1091_v7 = vld [vmem:[%s3482_s8] sm:$0xf] }
 0x2cf   :  { %v1096_v8 = vrot.slane %v1091_v7, %v3421_v48 }
 0x2d1   :  { %1982 = vmatpush1.bf16.msra.mxu1 %v2865_v9  ;;  %2025 = vmatpush1.bf16.msra.mxu0 %v2868_v10  ;;  %v1100_v9 = vrot.slane %v1091_v7, %v3426_v51 }
 0x2d2   :  { %1983 = vmatprep.subr.bf16.mxu1 %v2873_v11  ;;  %2026 = vmatprep.subr.bf16.mxu0 %v2876_v12 }
 0x2d5   :  { %1984 = vmatpush1.bf16.msra.mxu1 %v2871_v14  ;;  %2027 = vmatpush1.bf16.msra.mxu0 %v2874_v15 }
 0x2d6   :  { %1985 = vmatprep.subr.bf16.mxu1 %v2879_v16  ;;  %2028 = vmatprep.subr.bf16.mxu0 %v2882_v17 }
 0x2d9   :  { %1986 = vmatpush1.bf16.msra.mxu1 %v2877_v18  ;;  %2029 = vmatpush1.bf16.msra.mxu0 %v2880_v19 }
 0x2da   :  { %1987 = vmatprep.subr.bf16.mxu1 %v2885_v20  ;;  %2030 = vmatprep.subr.bf16.mxu0 %v2888_v21 }
 0x2dd   :  { %1988 = vmatpush1.bf16.msra.mxu1 %v2883_v22  ;;  %2031 = vmatpush1.bf16.msra.mxu0 %v2886_v23 }
 0x2de   :  { %1989 = vmatprep.subr.bf16.mxu1 %v2891_v24  ;;  %2032 = vmatprep.subr.bf16.mxu0 %v2894_v25  ;;  %v1108_v24 = vrot.slane %v1091_v7, %v3430_v62 }
 0x2e1   :  { %1990 = vmatpush1.bf16.msra.mxu1 %v2889_v26  ;;  %2033 = vmatpush1.bf16.msra.mxu0 %v2892_v27 }
 0x2e2   :  { %1991 = vmatprep.subr.bf16.mxu1 %v2897_v28  ;;  %2034 = vmatprep.subr.bf16.mxu0 %v2900_v29  ;;  %v1104_v29 = vrot.slane %v1091_v7, %v3433_v13 }
 0x2e5   :  { %1992 = vmatpush1.bf16.msra.mxu1 %v2895_v30  ;;  %2035 = vmatpush1.bf16.msra.mxu0 %v2898_v31 }
 0x2e6   :  { %1993 = vmatprep.subr.bf16.mxu1 %v2903_v33  ;;  %2036 = vmatprep.subr.bf16.mxu0 %v2906_v34 }
 0x2e9   :  { %1994 = vmatpush2.bf16.msra.mxu1 %v2901_v35  ;;  %2037 = vmatpush2.bf16.msra.mxu0 %v2904_v36 }
 0x2ea   :  { %1995 = vmatprep.subr.bf16.mxu1 %v2909_v37  ;;  %2038 = vmatprep.subr.bf16.mxu0 %v2912_v38 }
 0x2ed   :  { %1996 = vmatpush2.bf16.msra.mxu1 %v2907_v39  ;;  %2039 = vmatpush2.bf16.msra.mxu0 %v2910_v40 }
 0x2ee   :  { %1997 = vmatprep.subr.bf16.mxu1 %v2915_v41  ;;  %2040 = vmatprep.subr.bf16.mxu0 %v2918_v42 }
 0x2f1   :  { %1998 = vmatpush2.bf16.msra.mxu1 %v2913_v43  ;;  %2041 = vmatpush2.bf16.msra.mxu0 %v2916_v44 }
 0x2f2   :  { %1999 = vmatprep.subr.bf16.mxu1 %v2921_v45  ;;  %2042 = vmatprep.subr.bf16.mxu0 %v2924_v46  ;;  %v157_v46 = vld [vmem:[#allocation10 + $0x10] sm:$0xff] }
 0x2f5   :  { %2000 = vmatpush2.bf16.msra.mxu1 %v2919_v47  ;;  %2043 = vmatpush2.bf16.msra.mxu0 %v2922_v49 }
 0x2f6   :  { %2001 = vmatprep.subr.bf16.mxu1 %v2927_v50  ;;  %2044 = vmatprep.subr.bf16.mxu0 %v2930_v52 }
 0x2f9   :  { %2002 = vmatpush2.bf16.msra.mxu1 %v2925_v53  ;;  %2045 = vmatpush2.bf16.msra.mxu0 %v2928_v54 }
 0x2fa   :  { %2003 = vmatprep.subr.bf16.mxu1 %v2933_v55  ;;  %2046 = vmatprep.subr.bf16.mxu0 %v2936_v56  ;;  %v158_v56 = vld [vmem:[#allocation10 + $0x18] sm:$0xff] }
 0x2fd   :  { %2004 = vmatpush2.bf16.msra.mxu1 %v2931_v57  ;;  %2047 = vmatpush2.bf16.msra.mxu0 %v2934_v32 }
 0x2fe   :  { %2005 = vmatprep.subr.bf16.mxu1 %v2939_v60  ;;  %2048 = vmatprep.subr.bf16.mxu0 %v2942_v61 }
 0x301   :  { %2006 = vmatpush2.bf16.msra.mxu1 %v2937_v1  ;;  %2049 = vmatpush2.bf16.msra.mxu0 %v2940_v2 }
 0x302   :  { %2007 = vmatprep.subr.bf16.mxu1 %v2945_v3  ;;  %2050 = vmatprep.subr.bf16.mxu0 %v2948_v4 }
 0x305   :  { %2008 = vmatpush2.bf16.msra.mxu1 %v2943_v5  ;;  %2051 = vmatpush2.bf16.msra.mxu0 %v2946_v6 }
 0x388   :  { %v1467_v10 = vpop.f32.mrf.mxu1  ;;  %v1510_v12 = vpop.f32.mrf.mxu0 }
 0x389   :  { %v1468_v11 = vadd.f32 %v1467_v10, %v1096_v8  ;;  %v1511_v34 = vadd.f32 %v1510_v12, %v1104_v29  ;;  %v2954_v10 = vld [vmem:[#allocation16 + $0x64] ss:$8 sps:$4 sm:$0xff]   ;;  %v2957_v12 = vld [vmem:[#allocation16 + $0x54] ss:$8 sps:$4 sm:$0xff]  }
 0x38a   :  { %v1469_v14 = vpop.f32.mrf.mxu1  ;;  %v1512_v19 = vpop.f32.mrf.mxu0 }
 0x38b   :  { %v2511_v15 = vmul.f32 -1.442695, %v1468_v11  ;;  %v1470_v16 = vadd.f32 %v1469_v14, %v1100_v9  ;;  %v1513_v27 = vadd.f32 %v1512_v19, %v1108_v24  ;;  %v2952_v11 = vld [vmem:[#allocation16 + $0x60] ss:$8 sps:$4 sm:$0xff]   ;;  %v2955_v14 = vld [vmem:[#allocation16 + $0x50] ss:$8 sps:$4 sm:$0xff]  }
 0x38c   :  { %v1471_v17 = vpop.f32.mrf.mxu1  ;;  %v1514_v25 = vpop.f32.mrf.mxu0  ;;  %v2964_v19 = vld [vmem:[#allocation16 + $0x20] ss:$8 sps:$4 sm:$0xff]  }
 0x38d   :  { %3005 = vpow2.f32 %v2511_v15  ;;  %v2513_v18 = vmul.f32 -1.442695, %v1470_v16  ;;  %v1472_v20 = vadd.f32 %v1471_v17, %v1096_v8  ;;  %v2515_v30 = vmul.f32 -1.442695, %v1513_v27  ;;  %v2951_v8 = vld [vmem:[#allocation16 + $0x74] ss:$8 sps:$4 sm:$0xff]  }
 0x38e   :  { %v1473_v21 = vpop.f32.mrf.mxu1  ;;  %v1516_v28 = vpop.f32.mrf.mxu0  ;;  %v1515_v40 = vadd.f32 %v1514_v25, %v1104_v29  ;;  %2220 = vmatprep.subr.bf16.mxu1 %v2951_v8  ;;  %v2960_v15 = vld [vmem:[#allocation16 + $0x44] ss:$8 sps:$4 sm:$0xff]   ;;  %v2958_v16 = vld [vmem:[#allocation16 + $0x40] ss:$8 sps:$4 sm:$0xff]   ;;  %v2963_v17 = vld [vmem:[#allocation16 + $0x34] ss:$8 sps:$4 sm:$0xff]  }
 0x38f   :  { %3007 = vpow2.f32 %v2513_v18  ;;  %v2512_v22 = vmul.f32 -1.442695, %v1472_v20  ;;  %v1474_v23 = vadd.f32 %v1473_v21, %v1100_v9  ;;  %v1517_v31 = vadd.f32 %v1516_v28, %v1108_v24  ;;  %v2949_v9 = vld [vmem:[#allocation16 + $0x70] ss:$8 sps:$4 sm:$0xff]   ;;  %v2969_v20 = vld [vmem:[#allocation16 + $0x14] ss:$8 sps:$4 sm:$0xff]  }
 0x390   :  { %v2961_v18 = vld [vmem:[#allocation16 + $0x30] ss:$8 sps:$4 sm:$0xff]   ;;  %v2517_v24 = vld [vmem:[%s3482_s8 + $0x4] sm:$0xf]  ;;  %s3296_s8 = smov [#allocation18]  }
 0x391   :  { %3009 = vpow2.f32 %v2512_v22  ;;  %v2514_v26 = vmul.f32 -1.442695, %v1474_v23  ;;  %v2516_v37 = vmul.f32 -1.442695, %v1517_v31  ;;  %v2967_v21 = vld [vmem:[#allocation16 + $0x10] ss:$8 sps:$4 sm:$0xff]   ;;  %v1640_v25 = vrot.slane %v2517_v24, %v3421_v48 }
 0x392   :  { %v2972_v22 = vld [vmem:[#allocation16 + $0x4] ss:$8 sps:$4 sm:$0xff]   ;;  %v2970_v23 = vld [vmem:[#allocation16] ss:$8 sps:$4 sm:$0xff]   ;;  %s2323_s2 = sshll.u32 %s3296_s8, 4  ;;  %s2324_s2 = int_to_ptr.vmem [resolvable:$true] %s2323_s2 }
 0x393   :  { %3011 = vpow2.f32 %v2514_v26  ;;  %v1644_v26 = vrot.slane %v2517_v24, %v3426_v51  ;;  %s3209_s6 = scalar_lea.vmem %s2324_s2, 768  ;;  %p3214_p8 = scmp.lt.s32.totalorder %s2324_s2, %s2324_s2 }
 0x394   :  { %3013 = vpow2.f32 %v2515_v30  ;;  %p3210_p7 = scmp.ne.s32.totalorder %s2324_s2, %s3209_s6  ;;  %p3215_p9 = scmp.lt.s32.totalorder %s3209_s6, %s3209_s6 }
 0x396   :  { %p3216_p10 = por %p3215_p9, %p3214_p8 }
 0x398   :  { %p3217_p11 = pnand %p3216_p10, %p3210_p7 }
 0x39a   :  { %v3006_v33 = vpop.eup %3005 }
 0x39b   :  { %v1525_v35 = vadd.f32 1.0, %v3006_v33 }
 0x39c   :  { %v3008_v36 = vpop.eup %3007 }
 0x39d   :  { %3015 = vrcp.f32 %v1525_v35  ;;  %v1537_v38 = vadd.f32 1.0, %v3008_v36 }
 0x39e   :  { %v3010_v39 = vpop.eup %3009  ;;  %3017 = vtanh.f32 %v1511_v34 }
 0x39f   :  { %3019 = vrcp.f32 %v1537_v38  ;;  %v1526_v41 = vadd.f32 1.0, %v3010_v39 }
 0x3a0   :  { %v3012_v42 = vpop.eup %3011  ;;  %3021 = vpow2.f32 %v2516_v37 }
 0x3a1   :  { %3023 = vrcp.f32 %v1526_v41  ;;  %v1538_v43 = vadd.f32 1.0, %v3012_v42  ;;  %v3014_v44 = vpop.eup %3013  ;;  %v1652_v41 = vrot.slane %v2517_v24, %v3430_v62 }
 0x3a2   :  { %3025 = vtanh.f32 %v1515_v40  ;;  %v1551_v50 = vadd.f32 1.0, %v3014_v44 }
 0x3a3   :  { %3027 = vrcp.f32 %v1538_v43 }
 0x3a4   :  { %3029 = vrcp.f32 %v1551_v50 }
 0x3aa   :  { %v3016_v45 = vpop.eup %3015 }
 0x3ab   :  { %v3018_v47 = vpop.eup %3017 }
 0x3ac   :  { %v3020_v49 = vpop.eup %3019  ;;  %v1559_v53 = vmul.f32 %v3018_v47, %v3016_v45 }
 0x3ad   :  { %v3022_v52 = vpop.eup %3021  ;;  %v1557_v54 = vmul.f32 %v3020_v49, %v157_v46  ;;  %v1648_v46 = vrot.slane %v2517_v24, %v3433_v13 }
 0x3ae   :  { %v3024_v55 = vpop.eup %3023  ;;  %v1552_v59 = vadd.f32 1.0, %v3022_v52 }
 0x3af   :  { %v3026_v57 = vpop.eup %3025  ;;  %v1561_v32 = vadd.f32 %v1559_v53, %v1557_v54 }
 0x3b0   :  { %v3028_v58 = vpop.eup %3027  ;;  %v1560_v60 = vmul.f32 %v3026_v57, %v3024_v55 }
 0x3b1   :  { %2302 = vst [vmem:[#allocation20 + $0x10] sm:$0xff] %v1561_v32  ;;  %v1558_v61 = vmul.f32 %v3028_v58, %v158_v56  ;;  %3031 = vtanh.f32 %v1561_v32  ;;  %v3030_v1 = vpop.eup %3029 }
 0x3b2   :  { %3033 = vrcp.f32 %v1552_v59 }
 0x3b3   :  { %v1562_v63 = vadd.f32 %v1560_v60, %v1558_v61  ;;  %v159_v61 = vld [vmem:[#allocation10 + $0x20] sm:$0xff] }
 0x3b5   :  { %2303 = vst [vmem:[#allocation20 + $0x18] sm:$0xff] %v1562_v63  ;;  %3035 = vtanh.f32 %v1562_v63 }
 0x3be   :  { %v3032_v2 = vpop.eup %3031 }
 0x3bf   :  { %v1565_v3 = vmul.f32 %v3032_v2, %v3030_v1  ;;  %v3034_v4 = vpop.eup %3033 }
 0x3c1   :  { %2290 = vst [vmem:[#allocation18 + $0x10] sm:$0xff] %v1565_v3 }
 0x3c2   :  { %v3036_v5 = vpop.eup %3035 }
 0x3c3   :  { %v1566_v6 = vmul.f32 %v3036_v5, %v3034_v4 }
 0x3c5   :  { %v1567_v7 = vpack.c.bf16 %v1566_v6, %v1565_v3  ;;  %2291 = vst [vmem:[#allocation18 + $0x18] sm:$0xff] %v1566_v6 }
 0x3c7   :  { %2010 = vmatmul.mubr.bf16.vlgmr.msra.gmra.mxu1 %v1567_v7  ;;  %2053 = vmatmul.mubr.bf16.vlgmr.msra.gmra.mxu0 %v1567_v7  ;;  %v160_v7 = vld [vmem:[#allocation10 + $0x28] sm:$0xff] }
 0x3c8   :  { %2252 = vmatprep.mubr.bf16.mxu1 %v3294_v0  ;;  %2221 = vmatpush1.bf16.msra.mxu1 %v2949_v9  ;;  %v2966_v0 = vld [vmem:[#allocation16 + $0x24] ss:$8 sps:$4 sm:$0xff]  }
 0x3c9   :  { %2222 = vmatprep.subr.bf16.mxu1 %v2954_v10 }
 0x3cc   :  { %2223 = vmatpush1.bf16.msra.mxu1 %v2952_v11 }
 0x3cd   :  { %2224 = vmatprep.subr.bf16.mxu1 %v2957_v12 }
 0x3d0   :  { %2225 = vmatpush1.bf16.msra.mxu1 %v2955_v14 }
 0x3d1   :  { %2226 = vmatprep.subr.bf16.mxu1 %v2960_v15 }
 0x3d4   :  { %2227 = vmatpush1.bf16.msra.mxu1 %v2958_v16 }
 0x3d5   :  { %2228 = vmatprep.subr.bf16.mxu1 %v2963_v17 }
 0x3d8   :  { %2229 = vmatpush1.bf16.msra.mxu1 %v2961_v18 }
 0x3d9   :  { %2230 = vmatprep.subr.bf16.mxu1 %v2966_v0 }
 0x3dc   :  { %2231 = vmatpush1.bf16.msra.mxu1 %v2964_v19 }
 0x3dd   :  { %2232 = vmatprep.subr.bf16.mxu1 %v2969_v20 }
 0x3e0   :  { %2233 = vmatpush1.bf16.msra.mxu1 %v2967_v21 }
 0x3e1   :  { %2234 = vmatprep.subr.bf16.mxu1 %v2972_v22 }
 0x3e4   :  { %2235 = vmatpush1.bf16.msra.mxu1 %v2970_v23 }
 0x487   :  { %v2011_v27 = vpop.f32.mrf.mxu1  ;;  %v2054_v29 = vpop.f32.mrf.mxu0 }
 0x488   :  { %v2012_v28 = vadd.f32 %v2011_v27, %v1640_v25  ;;  %v2055_v52 = vadd.f32 %v2054_v29, %v1648_v46 }
 0x489   :  { %v2013_v30 = vpop.f32.mrf.mxu1  ;;  %v2056_v36 = vpop.f32.mrf.mxu0 }
 0x48a   :  { %v2582_v31 = vmul.f32 -1.442695, %v2012_v28  ;;  %v2014_v33 = vadd.f32 %v2013_v30, %v1644_v26  ;;  %v2057_v44 = vadd.f32 %v2056_v36, %v1652_v41 }
 0x48b   :  { %v2015_v34 = vpop.f32.mrf.mxu1  ;;  %v2058_v42 = vpop.f32.mrf.mxu0 }
 0x48c   :  { %3037 = vpow2.f32 %v2582_v31  ;;  %v2584_v35 = vmul.f32 -1.442695, %v2014_v33  ;;  %v2016_v37 = vadd.f32 %v2015_v34, %v1640_v25  ;;  %v2586_v47 = vmul.f32 -1.442695, %v2057_v44 }
 0x48d   :  { %v2017_v38 = vpop.f32.mrf.mxu1  ;;  %v2060_v45 = vpop.f32.mrf.mxu0  ;;  %v2059_v62 = vadd.f32 %v2058_v42, %v1648_v46 }
 0x48e   :  { %3039 = vpow2.f32 %v2584_v35  ;;  %v2583_v39 = vmul.f32 -1.442695, %v2016_v37  ;;  %v2018_v40 = vadd.f32 %v2017_v38, %v1644_v26  ;;  %v2061_v49 = vadd.f32 %v2060_v45, %v1652_v41 }
 0x490   :  { %3041 = vpow2.f32 %v2583_v39  ;;  %v2585_v43 = vmul.f32 -1.442695, %v2018_v40  ;;  %v2587_v55 = vmul.f32 -1.442695, %v2061_v49 }
 0x492   :  { %3043 = vpow2.f32 %v2585_v43 }
 0x493   :  { %3045 = vpow2.f32 %v2586_v47 }
 0x499   :  { %v3038_v50 = vpop.eup %3037 }
 0x49a   :  { %v2069_v53 = vadd.f32 1.0, %v3038_v50 }
 0x49b   :  { %v3040_v54 = vpop.eup %3039 }
 0x49c   :  { %3047 = vrcp.f32 %v2069_v53  ;;  %v2081_v56 = vadd.f32 1.0, %v3040_v54 }
 0x49d   :  { %v3042_v57 = vpop.eup %3041  ;;  %3049 = vtanh.f32 %v2055_v52 }
 0x49e   :  { %3051 = vrcp.f32 %v2081_v56  ;;  %v2070_v32 = vadd.f32 1.0, %v3042_v57 }
 0x49f   :  { %v3044_v58 = vpop.eup %3043  ;;  %3053 = vpow2.f32 %v2587_v55 }
 0x4a0   :  { %3055 = vrcp.f32 %v2070_v32  ;;  %v2082_v59 = vadd.f32 1.0, %v3044_v58  ;;  %v3046_v13 = vpop.eup %3045 }
 0x4a1   :  { %3057 = vtanh.f32 %v2059_v62  ;;  %v2095_v2 = vadd.f32 1.0, %v3046_v13 }
 0x4a2   :  { %3059 = vrcp.f32 %v2082_v59 }
 0x4a3   :  { %3061 = vrcp.f32 %v2095_v2 }
 0x4a9   :  { %v3048_v60 = vpop.eup %3047 }
 0x4aa   :  { %v3050_v63 = vpop.eup %3049 }
 0x4ab   :  { %v3052_v1 = vpop.eup %3051  ;;  %v2103_v4 = vmul.f32 %v3050_v63, %v3048_v60 }
 0x4ac   :  { %v3054_v3 = vpop.eup %3053  ;;  %v2101_v5 = vmul.f32 %v3052_v1, %v159_v61 }
 0x4ad   :  { %v3056_v6 = vpop.eup %3055  ;;  %v2096_v11 = vadd.f32 1.0, %v3054_v3 }
 0x4ae   :  { %v3058_v8 = vpop.eup %3057  ;;  %v2105_v9 = vadd.f32 %v2103_v4, %v2101_v5 }
 0x4af   :  { %v3060_v10 = vpop.eup %3059  ;;  %v2104_v12 = vmul.f32 %v3058_v8, %v3056_v6 }
 0x4b0   :  { %2304 = vst [vmem:[#allocation20 + $0x20] sm:$0xff] %v2105_v9  ;;  %v2102_v14 = vmul.f32 %v3060_v10, %v160_v7  ;;  %3063 = vtanh.f32 %v2105_v9  ;;  %v3062_v16 = vpop.eup %3061 }
 0x4b1   :  { %3065 = vrcp.f32 %v2096_v11 }
 0x4b2   :  { %v2106_v15 = vadd.f32 %v2104_v12, %v2102_v14 }
 0x4b4   :  { %2305 = vst [vmem:[#allocation20 + $0x28] sm:$0xff] %v2106_v15  ;;  %3067 = vtanh.f32 %v2106_v15 }
 0x4bd   :  { %v3064_v17 = vpop.eup %3063 }
 0x4be   :  { %v2109_v18 = vmul.f32 %v3064_v17, %v3062_v16  ;;  %v3066_v0 = vpop.eup %3065 }
 0x4c0   :  { %2292 = vst [vmem:[#allocation18 + $0x20] sm:$0xff] %v2109_v18 }
 0x4c1   :  { %v3068_v19 = vpop.eup %3067 }
 0x4c2   :  { %v2110_v20 = vmul.f32 %v3068_v19, %v3066_v0 }
 0x4c4   :  { %v2111_v21 = vpack.c.bf16 %v2110_v20, %v2109_v18  ;;  %2293 = vst [vmem:[#allocation18 + $0x28] sm:$0xff] %v2110_v20 }
 0x4c6   :  { %2253 = vmatmul.mubr.bf16.vlgmr.msra.gmra.mxu1 %v2111_v21 }
 0x4c7   :  { %3220 = shalt.err (!%p3217_p11)
}
 0x4c8   :  { %2329 = dma.vmem_to_hbm [thread:$0]  %s2324_s2, 768, %s3486_s12, [#allocation19], %s3282_s28, %s3282_s28, %s3283_s29  }
 0x4c9   :  { %s3297_s1 = smov [#allocation20]  }
 0x4ca   :  { %s2335_s24 = sshll.u32 %s3297_s1, 4  ;;  %s2336_s24 = int_to_ptr.vmem [resolvable:$true] %s2335_s24 }
 0x4cb   :  { %s3229_s25 = scalar_lea.vmem %s2336_s24, 768  ;;  %p3234_p13 = scmp.lt.s32.totalorder %s2336_s24, %s2336_s24 }
 0x4cc   :  { %p3230_p12 = scmp.ne.s32.totalorder %s2336_s24, %s3229_s25  ;;  %p3235_p0 = scmp.lt.s32.totalorder %s3229_s25, %s3229_s25 }
 0x4ce   :  { %p3236_p1 = por %p3235_p0, %p3234_p13 }
 0x4d0   :  { %p3237_p2 = pnand %p3236_p1, %p3230_p12 }
 0x4d2   :  { %3240 = shalt.err (!%p3237_p2)
}
 0x4d3   :  { %2341 = dma.vmem_to_hbm [thread:$0]  %s2336_s24, 768, %s3487_s13, [#allocation19], %s3282_s28, %s3282_s28, %s3283_s29  }
 0x4d4   :  { %v2128_v22 = vld [vmem:[%s3484_s10] sm:$0x3]  ;;  %s3298_s12 = smov [#allocation17]  }
 0x4d5   :  { %v2133_v23 = vrot.slane %v2128_v22, %v3421_v48  ;;  %v2137_v24 = vrot.slane %v2128_v22, %v3426_v51  ;;  %s2311_s30 = sshll.u32 %s3298_s12, 4  ;;  %s2312_s30 = int_to_ptr.vmem [resolvable:$true] %s2311_s30 }
 0x4d6   :  { %s3249_s10 = scalar_lea.vmem %s2312_s30, 512  ;;  %p3254_p4 = scmp.lt.s32.totalorder %s2312_s30, %s2312_s30 }
 0x4d7   :  { %p3250_p3 = scmp.ne.s32.totalorder %s2312_s30, %s3249_s10  ;;  %p3255_p5 = scmp.lt.s32.totalorder %s3249_s10, %s3249_s10 }
 0x4d9   :  { %p3256_p6 = por %p3255_p5, %p3254_p4 }
 0x4db   :  { %p3257_p7 = pnand %p3256_p6, %p3250_p3 }
 0x586   :  { %v2254_v25 = vpop.f32.mrf.mxu1 }
 0x587   :  { %v2255_v26 = vadd.f32 %v2254_v25, %v2133_v23 }
 0x588   :  { %v2256_v27 = vpop.f32.mrf.mxu1 }
 0x589   :  { %2263 = vst [vmem:[#allocation17] sm:$0xff] %v2255_v26  ;;  %v2257_v28 = vadd.f32 %v2256_v27, %v2137_v24 }
 0x58a   :  { %v2258_v29 = vpop.f32.mrf.mxu1 }
 0x58b   :  { %2264 = vst [vmem:[#allocation17 + $0x8] sm:$0xff] %v2257_v28  ;;  %v2259_v30 = vadd.f32 %v2258_v29, %v2133_v23 }
 0x58c   :  { %v2260_v31 = vpop.f32.mrf.mxu1 }
 0x58d   :  { %2265 = vst [vmem:[#allocation17 + $0x10] sm:$0xff] %v2259_v30  ;;  %v2261_v33 = vadd.f32 %v2260_v31, %v2137_v24 }
 0x58f   :  { %2266 = vst [vmem:[#allocation17 + $0x18] sm:$0xff] %v2261_v33 }
 0x590   :  { %3260 = shalt.err (!%p3257_p7)
}
 0x591   :  { %2317 = dma.vmem_to_hbm [thread:$0]  %s2312_s30, 512, %s3485_s11, [#allocation7], %s3285_s18, %s3285_s18, %s3286_s19  }
 0x592   :  { %3277 = dma.done.wait [#allocation7], 512  }
 0x593   :  { %3278 = vsyncadd [#allocation7], 4294966784 }
 0x594   :  { %3279 = dma.done.wait [#allocation19], 1536  }
 0x595   :  { %3280 = vsyncadd [#allocation19], 4294965760 }
 0x596   :  { %2351 = vsyncpa [#allocation6], 1 }
 0x597   :  { %2352 = vsyncpa [#allocation9], 1 }
 0x598   :  { %2353 = vsyncpa [#allocation12], 1 }
 0x599   :  { %2354 = vsyncpa [#allocation15], 1 }
 0x59a   :  { %2355 = vsyncpa [#allocation7], 1 }
 0x59b   :  { %2356 = vsyncpa [#allocation19], 1 }

// kernel: _sequence_impl.1
= control target key start
LH: loop header
LB: loop body
LE: loop exit
PB: predicated region body
PF: predicated region fallthrough
CT: control target
= control target key end

     0   :  { %19 = vsyncpa [#allocation6], 0  ;;  %s3474_s0 = inlined_call_operand.vmem [shape: s32[1,1,16,1], index: 0, kind: input, shape index: {}]   ;;  %s3475_s1 = inlined_call_operand.hbm [shape: bf16[256,128], index: 1, kind: input, shape index: {}]   ;;  %s3476_s2 = inlined_call_operand.hbm [shape: f32[3,16,128], index: 2, kind: input, shape index: {}]   ;;  %s3477_s3 = inlined_call_operand.hbm [shape: f32[3,16,128], index: 3, kind: input, shape index: {}]   ;;  %s3478_s4 = inlined_call_operand.hbm [shape: bf16[128,512], index: 4, kind: input, shape index: {}]   ;;  %s3479_s5 = inlined_call_operand.hbm [shape: bf16[128,512], index: 5, kind: input, shape index: {}]   ;;  %s3480_s6 = inlined_call_operand.hbm [shape: bf16[2,256,512], index: 6, kind: input, shape index: {}]   ;;  %s3481_s7 = inlined_call_operand.vmem [shape: f32[1,512], index: 7, kind: input, shape index: {}]   ;;  %s3482_s8 = inlined_call_operand.vmem [shape: f32[2,1,512], index: 8, kind: input, shape index: {}]   ;;  %s3483_s9 = inlined_call_operand.hbm [shape: bf16[128,256], index: 9, kind: input, shape index: {}]   ;;  %s3484_s10 = inlined_call_operand.vmem [shape: f32[1,256], index: 10, kind: input, shape index: {}]   ;;  %s3485_s11 = inlined_call_operand.hbm [shape: f32[1,16,256], index: 11, kind: output, shape index: {0}]   ;;  %s3486_s12 = inlined_call_operand.hbm [shape: f32[3,16,128], index: 12, kind: output, shape index: {1}]   ;;  %s3487_s13 = inlined_call_operand.hbm [shape: f32[3,16,128], index: 13, kind: output, shape index: {2}]  }
   0x1   :  { %20 = vsyncpa [#allocation9], 0 }
   0x2   :  { %21 = vsyncpa [#allocation12], 0 }
   0x3   :  { %22 = vsyncpa [#allocation15], 0 }
   0x4   :  { %23 = vsyncpa [#allocation7], 0 }
   0x5   :  { %24 = vsyncpa [#allocation19], 0  ;;  %s3281_s25 = smov [#allocation8]  }
   0x6   :  { %s44_s26 = sshll.u32 %s3281_s25, 4  ;;  %s45_s26 = int_to_ptr.vmem [resolvable:$true] %s44_s26 }
   0x7   :  { %s3077_s27 = scalar_lea.vmem %s45_s26, 768  ;;  %p3082_p1 = scmp.lt.s32.totalorder %s45_s26, %s45_s26 }
   0x8   :  { %p3078_p0 = scmp.ne.s32.totalorder %s45_s26, %s3077_s27  ;;  %p3083_p2 = scmp.lt.s32.totalorder %s3077_s27, %s3077_s27 }
   0xa   :  { %p3084_p3 = por %p3083_p2, %p3082_p1 }
   0xc   :  { %p3085_p4 = pnand %p3084_p3, %p3078_p0 }
   0xe   :  { %3088 = shalt.err (!%p3085_p4)
}
   0xf   :  { %s3282_s28 = smov 128   ;;  %s3283_s29 = smov 8  }
  0x10   :  { %50 = dma.hbm_to_vmem [thread:$0]  %s3476_s2, 768, %s45_s26, [#allocation9], %s3282_s28, %s3282_s28, %s3283_s29  }
  0x11   :  { %s3284_s15 = smov [#allocation11]  }
  0x12   :  { %s68_s16 = sshll.u32 %s3284_s15, 4  ;;  %s69_s16 = int_to_ptr.vmem [resolvable:$true] %s68_s16 }
  0x13   :  { %s3097_s17 = scalar_lea.vmem %s69_s16, 4096  ;;  %p3102_p6 = scmp.lt.s32.totalorder %s69_s16, %s69_s16 }
  0x14   :  { %p3098_p5 = scmp.ne.s32.totalorder %s69_s16, %s3097_s17  ;;  %p3103_p7 = scmp.lt.s32.totalorder %s3097_s17, %s3097_s17 }
  0x16   :  { %p3104_p8 = por %p3103_p7, %p3102_p6 }
  0x18   :  { %p3105_p9 = pnand %p3104_p8, %p3098_p5 }
  0x1a   :  { %3108 = shalt.err (!%p3105_p9)
}
  0x1b   :  { %s3285_s18 = smov 256   ;;  %s3286_s19 = smov 16  }
  0x1c   :  { %74 = dma.hbm_to_vmem [thread:$0]  %s3478_s4, 4096, %s69_s16, [#allocation12], %s3285_s18, %s3285_s18, %s3286_s19  }
  0x1d   :  { %s3287_s2 = smov [#allocation14]   ;;  %s3288_s23 = smov [#allocation5]  }
  0x1e   :  { %s92_s22 = sshll.u32 %s3287_s2, 4  ;;  %s32_s24 = sshll.u32 %s3288_s23, 4  ;;  %s93_s22 = int_to_ptr.vmem [resolvable:$true] %s92_s22  ;;  %s33_s24 = int_to_ptr.vmem [resolvable:$true] %s32_s24 }
  0x1f   :  { %s3117_s25 = scalar_lea.vmem %s93_s22, 16384  ;;  %p3122_p11 = scmp.lt.s32.totalorder %s93_s22, %s93_s22 }
  0x20   :  { %p3118_p10 = scmp.ne.s32.totalorder %s93_s22, %s3117_s25  ;;  %p3123_p12 = scmp.lt.s32.totalorder %s3117_s25, %s3117_s25 }
  0x22   :  { %p3124_p13 = por %p3123_p12, %p3122_p11 }
  0x24   :  { %p3125_p0 = pnand %p3124_p13, %p3118_p10 }
  0x26   :  { %3128 = shalt.err (!%p3125_p0)
}
  0x27   :  { %98 = dma.hbm_to_vmem [thread:$0]  %s3480_s6, 16384, %s93_s22, [#allocation15], %s3285_s18, %s3285_s18, %s3286_s19  }
  0x28   :  { %s3137_s4 = scalar_lea.vmem %s33_s24, 2048  ;;  %p3142_p2 = scmp.lt.s32.totalorder %s33_s24, %s33_s24 }
  0x29   :  { %p3138_p1 = scmp.ne.s32.totalorder %s33_s24, %s3137_s4  ;;  %p3143_p3 = scmp.lt.s32.totalorder %s3137_s4, %s3137_s4 }
  0x2b   :  { %p3144_p4 = por %p3143_p3, %p3142_p2 }
  0x2d   :  { %p3145_p5 = pnand %p3144_p4, %p3138_p1 }
  0x2f   :  { %3148 = shalt.err (!%p3145_p5)
}
  0x30   :  { %s3289_s30 = smov 64   ;;  %s3290_s14 = smov 4  }
  0x31   :  { %38 = dma.hbm_to_vmem [thread:$0]  %s3475_s1, 2048, %s33_s24, [#allocation6], %s3289_s30, %s3289_s30, %s3290_s14  }
  0x32   :  { %s3291_s17 = smov [#allocation10]   ;;  %s3292_s21 = smov [#allocation13]  }
  0x33   :  { %s56_s20 = sshll.u32 %s3291_s17, 4  ;;  %s80_s2 = sshll.u32 %s3292_s21, 4  ;;  %s57_s20 = int_to_ptr.vmem [resolvable:$true] %s56_s20  ;;  %s81_s2 = int_to_ptr.vmem [resolvable:$true] %s80_s2 }
  0x34   :  { %s3157_s6 = scalar_lea.vmem %s57_s20, 768  ;;  %p3162_p7 = scmp.lt.s32.totalorder %s57_s20, %s57_s20 }
  0x35   :  { %p3158_p6 = scmp.ne.s32.totalorder %s57_s20, %s3157_s6  ;;  %p3163_p8 = scmp.lt.s32.totalorder %s3157_s6, %s3157_s6 }
  0x37   :  { %p3164_p9 = por %p3163_p8, %p3162_p7 }
  0x39   :  { %p3165_p10 = pnand %p3164_p9, %p3158_p6 }
  0x3b   :  { %3168 = shalt.err (!%p3165_p10)
}
  0x3c   :  { %62 = dma.hbm_to_vmem [thread:$0]  %s3477_s3, 768, %s57_s20, [#allocation9], %s3282_s28, %s3282_s28, %s3283_s29  }
  0x3d   :  { %s3177_s1 = scalar_lea.vmem %s81_s2, 4096  ;;  %p3182_p12 = scmp.lt.s32.totalorder %s81_s2, %s81_s2 }
  0x3e   :  { %p3178_p11 = scmp.ne.s32.totalorder %s81_s2, %s3177_s1  ;;  %p3183_p13 = scmp.lt.s32.totalorder %s3177_s1, %s3177_s1 }
  0x40   :  { %p3184_p0 = por %p3183_p13, %p3182_p12 }
  0x42   :  { %p3185_p1 = pnand %p3184_p0, %p3178_p11 }
  0x44   :  { %3188 = shalt.err (!%p3185_p1)
}
  0x45   :  { %86 = dma.hbm_to_vmem [thread:$0]  %s3479_s5, 4096, %s81_s2, [#allocation12], %s3285_s18, %s3285_s18, %s3286_s19  }
  0x46   :  { %s3293_s26 = smov [#allocation16]  }
  0x47   :  { %s108_s27 = sshll.u32 %s3293_s26, 4  ;;  %s109_s27 = int_to_ptr.vmem [resolvable:$true] %s108_s27 }
  0x48   :  { %s3197_s4 = scalar_lea.vmem %s109_s27, 2048  ;;  %p3202_p3 = scmp.lt.s32.totalorder %s109_s27, %s109_s27 }
  0x49   :  { %p3198_p2 = scmp.ne.s32.totalorder %s109_s27, %s3197_s4  ;;  %p3203_p4 = scmp.lt.s32.totalorder %s3197_s4, %s3197_s4 }
  0x4b   :  { %p3204_p5 = por %p3203_p4, %p3202_p3 }
  0x4d   :  { %p3205_p6 = pnand %p3204_p5, %p3198_p2 }
  0x4f   :  { %3208 = shalt.err (!%p3205_p6)
}
  0x50   :  { %114 = dma.hbm_to_vmem [thread:$0]  %s3483_s9, 2048, %s109_s27, [#allocation15], %s3282_s28, %s3282_s28, %s3283_s29  }
  0x51   :  { %3269 = dma.done.wait [#allocation6], 2048  }
  0x52   :  { %3270 = vsyncadd [#allocation6], 4294965248 }
  0x53   :  { %3271 = dma.done.wait [#allocation9], 1536  }
  0x54   :  { %3272 = vsyncadd [#allocation9], 4294965760 }
  0x55   :  { %3273 = dma.done.wait [#allocation12], 8192  }
  0x56   :  { %3274 = vsyncadd [#allocation12], 4294959104 }
  0x57   :  { %3275 = dma.done.wait [#allocation15], 18432  }
  0x58   :  { %3276 = vsyncadd [#allocation15], 4294948864  ;;  %v3294_v0 = vmov 0   ;;  %v167_v1 = vld [vmem:[%s3474_s0] sm:$0xff]  ;;  %v168_v2 = vld [vmem:[%s3474_s0 + $0x8] sm:$0xff]  ;;  %v169_v32 = vlaneseq }
  0x59   :  { %2644 = vset.pattern.permute.xlu0 %v3294_v0  ;;  %604 = vmatprep.mubr.bf16.mxu1 %v3294_v0  ;;  %v2645_v3 = vld [vmem:[#allocation5 + $0x78] sm:$0xff]   ;;  %v2647_v5 = vld [vmem:[#allocation5 + $0x70] sm:$0xff]   ;;  %v2649_v7 = vld [vmem:[#allocation5 + $0x68] sm:$0xff]   ;;  %v3295_v39 = vmov 1.0|1.0  }
  0x5a   :  { %173 = vperm.xlu0 %2644, %v167_v1   ;;  %v2646_v4 = vld [vmem:[#allocation5 + $0x38] sm:$0xff]   ;;  %2604 = vmatprep.subr.bf16.mxu0 %v2645_v3  ;;  %v2648_v6 = vld [vmem:[#allocation5 + $0x30] sm:$0xff]   ;;  %v2650_v8 = vld [vmem:[#allocation5 + $0x28] sm:$0xff]   ;;  %v170_v33 = vand.u32 127, %v169_v32 }
  0x5b   :  { %2605 = vmatpush3.bf16.msra.mxu0 %v2646_v4  ;;  %v2651_v9 = vld [vmem:[#allocation5 + $0x60] sm:$0xff]   ;;  %v2653_v11 = vld [vmem:[#allocation5 + $0x58] sm:$0xff]   ;;  %v2655_v13 = vld [vmem:[#allocation5 + $0x50] sm:$0xff]  }
  0x5c   :  { %2606 = vmatprep.subr.bf16.mxu0 %v2647_v5  ;;  %v2652_v10 = vld [vmem:[#allocation5 + $0x20] sm:$0xff]   ;;  %v2654_v12 = vld [vmem:[#allocation5 + $0x18] sm:$0xff]   ;;  %v2656_v15 = vld [vmem:[#allocation5 + $0x10] sm:$0xff]   ;;  %v171_v35 = vadd.s32 128, %v170_v33 }
  0x5d   :  { %v2661_v14 = vld [vmem:[#allocation11 + $0xe4] ss:$16 sps:$4 sm:$0xff]   ;;  %v2666_v16 = vld [vmem:[#allocation11 + $0xe0] ss:$16 sps:$4 sm:$0xff]   ;;  %v2657_v18 = vld [vmem:[#allocation5 + $0x48] sm:$0xff]  }
  0x5e   :  { %176 = vperm.xlu0 %2644, %v168_v2   ;;  %572 = vmatprep.subr.bf16.mxu1 %v2661_v14  ;;  %v2667_v17 = vld [vmem:[#allocation11 + $0xc4] ss:$16 sps:$4 sm:$0xff]   ;;  %v2672_v19 = vld [vmem:[#allocation11 + $0xc0] ss:$16 sps:$4 sm:$0xff]   ;;  %v2658_v21 = vld [vmem:[#allocation5 + $0x8] sm:$0xff]  }
  0x5f   :  { %2607 = vmatpush3.bf16.msra.mxu0 %v2648_v6  ;;  %573 = vmatpush1.bf16.msra.mxu1 %v2666_v16  ;;  %v2673_v20 = vld [vmem:[#allocation11 + $0xa4] ss:$16 sps:$4 sm:$0xff]   ;;  %v2678_v23 = vld [vmem:[#allocation11 + $0xa0] ss:$16 sps:$4 sm:$0xff]   ;;  %v2665_v26 = vld [vmem:[#allocation11 + $0xec] ss:$16 sps:$4 sm:$0xff]  }
  0x60   :  { %2608 = vmatprep.subr.bf16.mxu0 %v2649_v7  ;;  %574 = vmatprep.subr.bf16.mxu1 %v2667_v17  ;;  %v2659_v22 = vld [vmem:[#allocation5 + $0x40] sm:$0xff]   ;;  %v2663_v37 = vld [vmem:[#allocation11 + $0xe8] ss:$16 sps:$4 sm:$0xff]   ;;  %v2671_v38 = vld [vmem:[#allocation11 + $0xcc] ss:$16 sps:$4 sm:$0xff]  }
  0x61   :  { %v2679_v24 = vld [vmem:[#allocation11 + $0x84] ss:$16 sps:$4 sm:$0xff]   ;;  %v2684_v27 = vld [vmem:[#allocation11 + $0x80] ss:$16 sps:$4 sm:$0xff]   ;;  %v2669_v40 = vld [vmem:[#allocation11 + $0xc8] ss:$16 sps:$4 sm:$0xff]  }
  0x62   :  { %v2660_v25 = vld [vmem:[#allocation5] sm:$0xff]   ;;  %v2677_v41 = vld [vmem:[#allocation11 + $0xac] ss:$16 sps:$4 sm:$0xff]   ;;  %v2675_v42 = vld [vmem:[#allocation11 + $0xa8] ss:$16 sps:$4 sm:$0xff]  }
  0x63   :  { %2609 = vmatpush3.bf16.msra.mxu0 %v2650_v8  ;;  %575 = vmatpush1.bf16.msra.mxu1 %v2672_v19  ;;  %v2685_v28 = vld [vmem:[#allocation11 + $0x64] ss:$16 sps:$4 sm:$0xff]   ;;  %v2690_v29 = vld [vmem:[#allocation11 + $0x60] ss:$16 sps:$4 sm:$0xff]   ;;  %v2683_v43 = vld [vmem:[#allocation11 + $0x8c] ss:$16 sps:$4 sm:$0xff]  }
  0x64   :  { %2610 = vmatprep.subr.bf16.mxu0 %v2651_v9  ;;  %576 = vmatprep.subr.bf16.mxu1 %v2673_v20  ;;  %v2691_v30 = vld [vmem:[#allocation11 + $0x44] ss:$16 sps:$4 sm:$0xff]   ;;  %v2696_v31 = vld [vmem:[#allocation11 + $0x40] ss:$16 sps:$4 sm:$0xff]   ;;  %v2681_v44 = vld [vmem:[#allocation11 + $0x88] ss:$16 sps:$4 sm:$0xff]  }
  0x65   :  { %v2689_v45 = vld [vmem:[#allocation11 + $0x6c] ss:$16 sps:$4 sm:$0xff]   ;;  %v2687_v46 = vld [vmem:[#allocation11 + $0x68] ss:$16 sps:$4 sm:$0xff]   ;;  %v2697_v49 = vld [vmem:[#allocation11 + $0x24] ss:$16 sps:$4 sm:$0xff]  }
  0x66   :  { %v2695_v47 = vld [vmem:[#allocation11 + $0x4c] ss:$16 sps:$4 sm:$0xff]   ;;  %v2693_v48 = vld [vmem:[#allocation11 + $0x48] ss:$16 sps:$4 sm:$0xff]   ;;  %v2702_v52 = vld [vmem:[#allocation11 + $0x20] ss:$16 sps:$4 sm:$0xff]  }
  0x67   :  { %2611 = vmatpush3.bf16.msra.mxu0 %v2652_v10  ;;  %577 = vmatpush1.bf16.msra.mxu1 %v2678_v23  ;;  %v2701_v50 = vld [vmem:[#allocation11 + $0x2c] ss:$16 sps:$4 sm:$0xff]   ;;  %v2699_v51 = vld [vmem:[#allocation11 + $0x28] ss:$16 sps:$4 sm:$0xff]   ;;  %v2703_v53 = vld [vmem:[#allocation11 + $0x4] ss:$16 sps:$4 sm:$0xff]  }
  0x68   :  { %2612 = vmatprep.subr.bf16.mxu0 %v2653_v11  ;;  %578 = vmatprep.subr.bf16.mxu1 %v2679_v24  ;;  %v2707_v54 = vld [vmem:[#allocation11 + $0xc] ss:$16 sps:$4 sm:$0xff]   ;;  %v2705_v55 = vld [vmem:[#allocation11 + $0x8] ss:$16 sps:$4 sm:$0xff]   ;;  %v2708_v56 = vld [vmem:[#allocation11] ss:$16 sps:$4 sm:$0xff]  }
  0x69   :  { %v2711_v57 = vld [vmem:[#allocation13 + $0xe4] ss:$16 sps:$4 sm:$0xff]   ;;  %v2714_v58 = vld [vmem:[#allocation13 + $0xec] ss:$16 sps:$4 sm:$0xff]   ;;  %v2709_v2 = vld [vmem:[#allocation13 + $0xe0] ss:$16 sps:$4 sm:$0xff]  }
  0x6a   :  { %v2712_v3 = vld [vmem:[#allocation13 + $0xe8] ss:$16 sps:$4 sm:$0xff]   ;;  %v2717_v5 = vld [vmem:[#allocation13 + $0xc4] ss:$16 sps:$4 sm:$0xff]   ;;  %v2720_v6 = vld [vmem:[#allocation13 + $0xcc] ss:$16 sps:$4 sm:$0xff]  }
  0x6b   :  { %2613 = vmatpush3.bf16.msra.mxu0 %v2654_v12  ;;  %579 = vmatpush1.bf16.msra.mxu1 %v2684_v27  ;;  %v2715_v7 = vld [vmem:[#allocation13 + $0xc0] ss:$16 sps:$4 sm:$0xff]   ;;  %v2718_v8 = vld [vmem:[#allocation13 + $0xc8] ss:$16 sps:$4 sm:$0xff]   ;;  %v2723_v9 = vld [vmem:[#allocation13 + $0xa4] ss:$16 sps:$4 sm:$0xff]  }
  0x6c   :  { %2614 = vmatprep.subr.bf16.mxu0 %v2655_v13  ;;  %580 = vmatprep.subr.bf16.mxu1 %v2685_v28  ;;  %v2726_v10 = vld [vmem:[#allocation13 + $0xac] ss:$16 sps:$4 sm:$0xff]   ;;  %v2721_v11 = vld [vmem:[#allocation13 + $0xa0] ss:$16 sps:$4 sm:$0xff]   ;;  %v2724_v12 = vld [vmem:[#allocation13 + $0xa8] ss:$16 sps:$4 sm:$0xff]  }
  0x6d   :  { %v2729_v13 = vld [vmem:[#allocation13 + $0x84] ss:$16 sps:$4 sm:$0xff]   ;;  %v2732_v14 = vld [vmem:[#allocation13 + $0x8c] ss:$16 sps:$4 sm:$0xff]   ;;  %v2730_v16 = vld [vmem:[#allocation13 + $0x88] ss:$16 sps:$4 sm:$0xff]  }
  0x6e   :  { %v2735_v17 = vld [vmem:[#allocation13 + $0x64] ss:$16 sps:$4 sm:$0xff]   ;;  %v2733_v19 = vld [vmem:[#allocation13 + $0x60] ss:$16 sps:$4 sm:$0xff]   ;;  %v2736_v20 = vld [vmem:[#allocation13 + $0x68] ss:$16 sps:$4 sm:$0xff]  }
  0x6f   :  { %2615 = vmatpush3.bf16.msra.mxu0 %v2656_v15  ;;  %581 = vmatpush1.bf16.msra.mxu1 %v2690_v29  ;;  %v2727_v15 = vld [vmem:[#allocation13 + $0x80] ss:$16 sps:$4 sm:$0xff]   ;;  %v2742_v24 = vld [vmem:[#allocation13 + $0x48] ss:$16 sps:$4 sm:$0xff]   ;;  %v2753_v29 = vld [vmem:[#allocation13 + $0x4] ss:$16 sps:$4 sm:$0xff]  }
  0x70   :  { %2616 = vmatprep.subr.bf16.mxu0 %v2657_v18  ;;  %582 = vmatprep.subr.bf16.mxu1 %v2691_v30  ;;  %v2738_v18 = vld [vmem:[#allocation13 + $0x6c] ss:$16 sps:$4 sm:$0xff]   ;;  %v2739_v23 = vld [vmem:[#allocation13 + $0x40] ss:$16 sps:$4 sm:$0xff]   ;;  %v2748_v28 = vld [vmem:[#allocation13 + $0x28] ss:$16 sps:$4 sm:$0xff]  }
  0x71   :  { %v2745_v27 = vld [vmem:[#allocation13 + $0x20] ss:$16 sps:$4 sm:$0xff]   ;;  %v2756_v30 = vld [vmem:[#allocation13 + $0xc] ss:$16 sps:$4 sm:$0xff]  }
  0x73   :  { %2617 = vmatpush3.bf16.msra.mxu0 %v2658_v21  ;;  %583 = vmatpush1.bf16.msra.mxu1 %v2696_v31  ;;  %v2741_v21 = vld [vmem:[#allocation13 + $0x44] ss:$16 sps:$4 sm:$0xff]   ;;  %v2751_v31 = vld [vmem:[#allocation13] ss:$16 sps:$4 sm:$0xff]  }
  0x74   :  { %2618 = vmatprep.subr.bf16.mxu0 %v2659_v22  ;;  %584 = vmatprep.subr.bf16.mxu1 %v2697_v49  ;;  %v2744_v22 = vld [vmem:[#allocation13 + $0x4c] ss:$16 sps:$4 sm:$0xff]   ;;  %v2777_v49 = vld [vmem:[#allocation14 + $0x84] ss:$16 sps:$4 sm:$0xff]  }
  0x77   :  { %2619 = vmatpush3.bf16.msra.mxu0 %v2660_v25  ;;  %585 = vmatpush1.bf16.msra.mxu1 %v2702_v52  ;;  %v2747_v25 = vld [vmem:[#allocation13 + $0x24] ss:$16 sps:$4 sm:$0xff]   ;;  %v2778_v52 = vld [vmem:[#allocation14 + $0x88] ss:$16 sps:$4 sm:$0xff]  }
  0x78   :  { %615 = vmatprep.subr.bf16.mxu0 %v2665_v26  ;;  %586 = vmatprep.subr.bf16.mxu1 %v2703_v53  ;;  %v2750_v26 = vld [vmem:[#allocation13 + $0x2c] ss:$16 sps:$4 sm:$0xff]   ;;  %v2783_v53 = vld [vmem:[#allocation14 + $0x64] ss:$16 sps:$4 sm:$0xff]  }
  0x7b   :  { %587 = vmatpush1.bf16.msra.mxu1 %v2708_v56  ;;  %v2784_v56 = vld [vmem:[#allocation14 + $0x68] ss:$16 sps:$4 sm:$0xff]  }
  0x7c   :  { %883 = vmatprep.subr.bf16.mxu1 %v2711_v57  ;;  %v2789_v57 = vld [vmem:[#allocation14 + $0x44] ss:$16 sps:$4 sm:$0xff]  }
  0xd5   :  { %v174_v34 = vpop.permute.xlu0 %173 }
  0xd6   :  { %vm178_vm0 = vcmp.eq.s32.totalorder %v174_v34, %v170_v33  ;;  %vm179_vm4 = vcmp.eq.s32.totalorder %v174_v34, %v171_v35  ;;  %v143_v34 = vld [vmem:[#allocation8] sm:$0xff] }
  0xd9   :  { %v177_v36 = vpop.permute.xlu0 %176 }
  0xda   :  { %vm180_vm1 = vcmp.eq.s32.totalorder %v177_v36, %v170_v33  ;;  %vm181_vm2 = vcmp.eq.s32.totalorder %v177_v36, %v171_v35  ;;  %v2754_v33 = vld [vmem:[#allocation13 + $0x8] ss:$16 sps:$4 sm:$0xff]  }
  0xdb   :  { %vm2375_vm3 = vmpackc.low %vm180_vm1, %vm178_vm0  ;;  %v144_v35 = vld [vmem:[#allocation8 + $0x8] sm:$0xff] }
  0xdc   :  { %vm2373_vm5 = vmpackc.low %vm181_vm2, %vm179_vm4  ;;  %v690_v36 = vpack.c.bf16 %v144_v35, %v143_v34  ;;  %v2846_v34 = vld [vmem:[#allocation14 + $0x12c] ss:$16 sps:$4 sm:$0xff]  }
  0xdd   :  { %2374 = vmatprep.mubr.msk.bf16.mxu0 %vm2373_vm5, %v3295_v39 }
  0xde   :  { %2376 = vmatmul.mubr.msk.bf16.vlgmr.msra.gmra.mxu0 %vm2375_vm3, %v3295_v39  ;;  %v2760_v39 = vld [vmem:[#allocation14 + $0xe8] ss:$16 sps:$4 sm:$0xff]  }
  0xdf   :  { %616 = vmatpush1.bf16.msra.mxu0 %v2663_v37  ;;  %647 = vmatprep.mubr.bf16.mxu0 %v3294_v0  ;;  %v2757_v37 = vld [vmem:[#allocation14 + $0xe0] ss:$16 sps:$4 sm:$0xff]  }
  0xe0   :  { %617 = vmatprep.subr.bf16.mxu0 %v2671_v38  ;;  %v2759_v38 = vld [vmem:[#allocation14 + $0xe4] ss:$16 sps:$4 sm:$0xff]  }
  0xe3   :  { %618 = vmatpush1.bf16.msra.mxu0 %v2669_v40  ;;  %v2762_v40 = vld [vmem:[#allocation14 + $0xec] ss:$16 sps:$4 sm:$0xff]  }
  0xe4   :  { %619 = vmatprep.subr.bf16.mxu0 %v2677_v41  ;;  %v2765_v41 = vld [vmem:[#allocation14 + $0xc4] ss:$16 sps:$4 sm:$0xff]  }
  0xe7   :  { %620 = vmatpush1.bf16.msra.mxu0 %v2675_v42  ;;  %v2768_v42 = vld [vmem:[#allocation14 + $0xcc] ss:$16 sps:$4 sm:$0xff]  }
  0xe8   :  { %621 = vmatprep.subr.bf16.mxu0 %v2683_v43  ;;  %v2763_v43 = vld [vmem:[#allocation14 + $0xc0] ss:$16 sps:$4 sm:$0xff]  }
  0xeb   :  { %622 = vmatpush1.bf16.msra.mxu0 %v2681_v44  ;;  %v2766_v44 = vld [vmem:[#allocation14 + $0xc8] ss:$16 sps:$4 sm:$0xff]  }
  0xec   :  { %623 = vmatprep.subr.bf16.mxu0 %v2689_v45  ;;  %v2771_v45 = vld [vmem:[#allocation14 + $0xa4] ss:$16 sps:$4 sm:$0xff]  }
  0xef   :  { %624 = vmatpush1.bf16.msra.mxu0 %v2687_v46  ;;  %v2774_v46 = vld [vmem:[#allocation14 + $0xac] ss:$16 sps:$4 sm:$0xff]  }
  0xf0   :  { %625 = vmatprep.subr.bf16.mxu0 %v2695_v47  ;;  %v2769_v47 = vld [vmem:[#allocation14 + $0xa0] ss:$16 sps:$4 sm:$0xff]  }
  0xf3   :  { %626 = vmatpush1.bf16.msra.mxu0 %v2693_v48  ;;  %v2772_v48 = vld [vmem:[#allocation14 + $0xa8] ss:$16 sps:$4 sm:$0xff]  }
  0xf4   :  { %627 = vmatprep.subr.bf16.mxu0 %v2701_v50  ;;  %v2780_v50 = vld [vmem:[#allocation14 + $0x8c] ss:$16 sps:$4 sm:$0xff]  }
  0xf7   :  { %628 = vmatpush1.bf16.msra.mxu0 %v2699_v51  ;;  %v2775_v51 = vld [vmem:[#allocation14 + $0x80] ss:$16 sps:$4 sm:$0xff]  }
  0xf8   :  { %629 = vmatprep.subr.bf16.mxu0 %v2707_v54  ;;  %v2786_v54 = vld [vmem:[#allocation14 + $0x6c] ss:$16 sps:$4 sm:$0xff]  }
  0xfb   :  { %630 = vmatpush1.bf16.msra.mxu0 %v2705_v55  ;;  %v2781_v55 = vld [vmem:[#allocation14 + $0x60] ss:$16 sps:$4 sm:$0xff]  }
  0xfc   :  { %926 = vmatprep.subr.bf16.mxu0 %v2714_v58  ;;  %v2792_v58 = vld [vmem:[#allocation14 + $0x4c] ss:$16 sps:$4 sm:$0xff]  }
 0x19e   :  { %v2620_v59 = vpop.f32.mrf.mxu0 }
 0x1a0   :  { %v2621_v60 = vpop.f32.mrf.mxu0 }
 0x1a1   :  { %v2622_v63 = vadd.f32 %v2621_v60, %v2620_v59  ;;  %v2787_v59 = vld [vmem:[#allocation14 + $0x40] ss:$16 sps:$4 sm:$0xff]   ;;  %v2790_v60 = vld [vmem:[#allocation14 + $0x48] ss:$16 sps:$4 sm:$0xff]  }
 0x1a2   :  { %v2623_v61 = vpop.f32.mrf.mxu0 }
 0x1a4   :  { %v2624_v62 = vpop.f32.mrf.mxu0 }
 0x1a5   :  { %v2625_v1 = vadd.f32 %v2624_v62, %v2623_v61  ;;  %v2795_v61 = vld [vmem:[#allocation14 + $0x24] ss:$16 sps:$4 sm:$0xff]   ;;  %v2798_v62 = vld [vmem:[#allocation14 + $0x2c] ss:$16 sps:$4 sm:$0xff]  }
 0x1a7   :  { %v357_v4 = vpack.c.bf16 %v2625_v1, %v2622_v63  ;;  %v2793_v63 = vld [vmem:[#allocation14 + $0x20] ss:$16 sps:$4 sm:$0xff]   ;;  %v2796_v1 = vld [vmem:[#allocation14 + $0x28] ss:$16 sps:$4 sm:$0xff]  }
 0x1a9   :  { %605 = vmatmul.mubr.bf16.vlgmr.msra.gmra.mxu1 %v357_v4  ;;  %648 = vmatmul.mubr.bf16.vlgmr.msra.gmra.mxu0 %v357_v4  ;;  %v2799_v4 = vld [vmem:[#allocation14] ss:$16 sps:$4 sm:$0xff]  }
 0x1aa   :  { %884 = vmatpush1.bf16.msra.mxu1 %v2709_v2  ;;  %927 = vmatpush1.bf16.msra.mxu0 %v2712_v3  ;;  %v2801_v2 = vld [vmem:[#allocation14 + $0x4] ss:$16 sps:$4 sm:$0xff]   ;;  %v2804_v3 = vld [vmem:[#allocation14 + $0xc] ss:$16 sps:$4 sm:$0xff]  }
 0x1ab   :  { %885 = vmatprep.subr.bf16.mxu1 %v2717_v5  ;;  %928 = vmatprep.subr.bf16.mxu0 %v2720_v6  ;;  %v2802_v5 = vld [vmem:[#allocation14 + $0x8] ss:$16 sps:$4 sm:$0xff]   ;;  %v2807_v6 = vld [vmem:[#allocation14 + $0x1e4] ss:$16 sps:$4 sm:$0xff]  }
 0x1ac   :  { %915 = vmatprep.mubr.bf16.mxu1 %v3294_v0  ;;  %958 = vmatprep.mubr.bf16.mxu0 %v3294_v0 }
 0x1ae   :  { %886 = vmatpush1.bf16.msra.mxu1 %v2715_v7  ;;  %929 = vmatpush1.bf16.msra.mxu0 %v2718_v8  ;;  %v2810_v7 = vld [vmem:[#allocation14 + $0x1ec] ss:$16 sps:$4 sm:$0xff]   ;;  %v2805_v8 = vld [vmem:[#allocation14 + $0x1e0] ss:$16 sps:$4 sm:$0xff]  }
 0x1af   :  { %887 = vmatprep.subr.bf16.mxu1 %v2723_v9  ;;  %930 = vmatprep.subr.bf16.mxu0 %v2726_v10  ;;  %v2808_v9 = vld [vmem:[#allocation14 + $0x1e8] ss:$16 sps:$4 sm:$0xff]   ;;  %v2813_v10 = vld [vmem:[#allocation14 + $0x1c4] ss:$16 sps:$4 sm:$0xff]  }
 0x1b2   :  { %888 = vmatpush1.bf16.msra.mxu1 %v2721_v11  ;;  %931 = vmatpush1.bf16.msra.mxu0 %v2724_v12  ;;  %v2816_v11 = vld [vmem:[#allocation14 + $0x1cc] ss:$16 sps:$4 sm:$0xff]   ;;  %v2811_v12 = vld [vmem:[#allocation14 + $0x1c0] ss:$16 sps:$4 sm:$0xff]  }
 0x1b3   :  { %889 = vmatprep.subr.bf16.mxu1 %v2729_v13  ;;  %932 = vmatprep.subr.bf16.mxu0 %v2732_v14  ;;  %v2814_v13 = vld [vmem:[#allocation14 + $0x1c8] ss:$16 sps:$4 sm:$0xff]   ;;  %v2819_v14 = vld [vmem:[#allocation14 + $0x1a4] ss:$16 sps:$4 sm:$0xff]  }
 0x1b6   :  { %890 = vmatpush1.bf16.msra.mxu1 %v2727_v15  ;;  %933 = vmatpush1.bf16.msra.mxu0 %v2730_v16  ;;  %v2822_v15 = vld [vmem:[#allocation14 + $0x1ac] ss:$16 sps:$4 sm:$0xff]   ;;  %v2817_v16 = vld [vmem:[#allocation14 + $0x1a0] ss:$16 sps:$4 sm:$0xff]  }
 0x1b7   :  { %891 = vmatprep.subr.bf16.mxu1 %v2735_v17  ;;  %934 = vmatprep.subr.bf16.mxu0 %v2738_v18  ;;  %v2820_v17 = vld [vmem:[#allocation14 + $0x1a8] ss:$16 sps:$4 sm:$0xff]   ;;  %v2825_v18 = vld [vmem:[#allocation14 + $0x184] ss:$16 sps:$4 sm:$0xff]  }
 0x1ba   :  { %892 = vmatpush1.bf16.msra.mxu1 %v2733_v19  ;;  %935 = vmatpush1.bf16.msra.mxu0 %v2736_v20  ;;  %v2828_v19 = vld [vmem:[#allocation14 + $0x18c] ss:$16 sps:$4 sm:$0xff]   ;;  %v2823_v20 = vld [vmem:[#allocation14 + $0x180] ss:$16 sps:$4 sm:$0xff]  }
 0x1bb   :  { %893 = vmatprep.subr.bf16.mxu1 %v2741_v21  ;;  %936 = vmatprep.subr.bf16.mxu0 %v2744_v22  ;;  %v2826_v21 = vld [vmem:[#allocation14 + $0x188] ss:$16 sps:$4 sm:$0xff]   ;;  %v2831_v22 = vld [vmem:[#allocation14 + $0x164] ss:$16 sps:$4 sm:$0xff]  }
 0x1be   :  { %894 = vmatpush1.bf16.msra.mxu1 %v2739_v23  ;;  %937 = vmatpush1.bf16.msra.mxu0 %v2742_v24  ;;  %v2834_v23 = vld [vmem:[#allocation14 + $0x16c] ss:$16 sps:$4 sm:$0xff]   ;;  %v2829_v24 = vld [vmem:[#allocation14 + $0x160] ss:$16 sps:$4 sm:$0xff]  }
 0x1bf   :  { %895 = vmatprep.subr.bf16.mxu1 %v2747_v25  ;;  %938 = vmatprep.subr.bf16.mxu0 %v2750_v26  ;;  %v2832_v25 = vld [vmem:[#allocation14 + $0x168] ss:$16 sps:$4 sm:$0xff]   ;;  %v2837_v26 = vld [vmem:[#allocation14 + $0x144] ss:$16 sps:$4 sm:$0xff]  }
 0x1c2   :  { %896 = vmatpush1.bf16.msra.mxu1 %v2745_v27  ;;  %939 = vmatpush1.bf16.msra.mxu0 %v2748_v28  ;;  %v2840_v27 = vld [vmem:[#allocation14 + $0x14c] ss:$16 sps:$4 sm:$0xff]   ;;  %v2835_v28 = vld [vmem:[#allocation14 + $0x140] ss:$16 sps:$4 sm:$0xff]  }
 0x1c3   :  { %897 = vmatprep.subr.bf16.mxu1 %v2753_v29  ;;  %940 = vmatprep.subr.bf16.mxu0 %v2756_v30  ;;  %v2838_v29 = vld [vmem:[#allocation14 + $0x148] ss:$16 sps:$4 sm:$0xff]   ;;  %v145_v30 = vld [vmem:[#allocation8 + $0x10] sm:$0xff] }
 0x1c6   :  { %898 = vmatpush1.bf16.msra.mxu1 %v2751_v31  ;;  %941 = vmatpush1.bf16.msra.mxu0 %v2754_v33  ;;  %v146_v31 = vld [vmem:[#allocation8 + $0x18] sm:$0xff]  ;;  %v2843_v33 = vld [vmem:[#allocation14 + $0x124] ss:$16 sps:$4 sm:$0xff]  }
 0x1c7   :  { %1433 = vmatprep.subr.bf16.mxu1 %v2759_v38  ;;  %1476 = vmatprep.subr.bf16.mxu0 %v2762_v40  ;;  %v1026_v35 = vpack.c.bf16 %v146_v31, %v145_v30  ;;  %v2849_v38 = vld [vmem:[#allocation14 + $0x104] ss:$16 sps:$4 sm:$0xff]   ;;  %v2847_v40 = vld [vmem:[#allocation14 + $0x100] ss:$16 sps:$4 sm:$0xff]  }
 0x1c9   :  { %916 = vmatmul.mubr.bf16.vlgmr.msra.gmra.mxu1 %v690_v36  ;;  %959 = vmatmul.mubr.bf16.vlgmr.msra.gmra.mxu0 %v690_v36  ;;  %v2841_v36 = vld [vmem:[#allocation14 + $0x120] ss:$16 sps:$4 sm:$0xff]  }
 0x1ca   :  { %1434 = vmatpush1.bf16.msra.mxu1 %v2757_v37  ;;  %1477 = vmatpush1.bf16.msra.mxu0 %v2760_v39  ;;  %v2844_v37 = vld [vmem:[#allocation14 + $0x128] ss:$16 sps:$4 sm:$0xff]   ;;  %v2852_v39 = vld [vmem:[#allocation14 + $0x10c] ss:$16 sps:$4 sm:$0xff]  }
 0x1cb   :  { %1435 = vmatprep.subr.bf16.mxu1 %v2765_v41  ;;  %1478 = vmatprep.subr.bf16.mxu0 %v2768_v42  ;;  %v2850_v41 = vld [vmem:[#allocation14 + $0x108] ss:$16 sps:$4 sm:$0xff]   ;;  %v2855_v42 = vld [vmem:[#allocation14 + $0x2e4] ss:$16 sps:$4 sm:$0xff]  }
 0x1cc   :  { %1465 = vmatprep.mubr.bf16.mxu1 %v1026_v35  ;;  %1508 = vmatprep.mubr.bf16.mxu0 %v1026_v35 }
 0x1ce   :  { %1436 = vmatpush1.bf16.msra.mxu1 %v2763_v43  ;;  %1479 = vmatpush1.bf16.msra.mxu0 %v2766_v44  ;;  %v2858_v43 = vld [vmem:[#allocation14 + $0x2ec] ss:$16 sps:$4 sm:$0xff]  }
 0x1cf   :  { %1437 = vmatprep.subr.bf16.mxu1 %v2771_v45  ;;  %1480 = vmatprep.subr.bf16.mxu0 %v2774_v46  ;;  %v393_v45 = vshrl.u32 %v169_v32, 7 }
 0x1d2   :  { %1438 = vmatpush1.bf16.msra.mxu1 %v2769_v47  ;;  %1481 = vmatpush1.bf16.msra.mxu0 %v2772_v48  ;;  %v3421_v48 = vsub.s32 0, %v393_v45 }
 0x1d3   :  { %1439 = vmatprep.subr.bf16.mxu1 %v2777_v49  ;;  %1482 = vmatprep.subr.bf16.mxu0 %v2780_v50  ;;  %v390_v50 = vld [vmem:[%s3481_s7] sm:$0xf] }
 0x1d6   :  { %1440 = vmatpush1.bf16.msra.mxu1 %v2775_v51  ;;  %1483 = vmatpush1.bf16.msra.mxu0 %v2778_v52  ;;  %v3426_v51 = vsub.s32 1, %v393_v45 }
 0x1d7   :  { %1441 = vmatprep.subr.bf16.mxu1 %v2783_v53  ;;  %1484 = vmatprep.subr.bf16.mxu0 %v2786_v54  ;;  %v395_v53 = vrot.slane %v390_v50, %v3421_v48 }
 0x1da   :  { %1442 = vmatpush1.bf16.msra.mxu1 %v2781_v55  ;;  %1485 = vmatpush1.bf16.msra.mxu0 %v2784_v56  ;;  %v399_v55 = vrot.slane %v390_v50, %v3426_v51 }
 0x1db   :  { %1443 = vmatprep.subr.bf16.mxu1 %v2789_v57  ;;  %1486 = vmatprep.subr.bf16.mxu0 %v2792_v58 }
 0x1de   :  { %1444 = vmatpush1.bf16.msra.mxu1 %v2787_v59  ;;  %1487 = vmatpush1.bf16.msra.mxu0 %v2790_v60 }
 0x1df   :  { %1445 = vmatprep.subr.bf16.mxu1 %v2795_v61  ;;  %1488 = vmatprep.subr.bf16.mxu0 %v2798_v62  ;;  %v3430_v62 = vsub.s32 3, %v393_v45 }
 0x1e2   :  { %1446 = vmatpush1.bf16.msra.mxu1 %v2793_v63  ;;  %1489 = vmatpush1.bf16.msra.mxu0 %v2796_v1 }
 0x1e3   :  { %1447 = vmatprep.subr.bf16.mxu1 %v2801_v2  ;;  %1490 = vmatprep.subr.bf16.mxu0 %v2804_v3 }
 0x1e6   :  { %1448 = vmatpush1.bf16.msra.mxu1 %v2799_v4  ;;  %1491 = vmatpush1.bf16.msra.mxu0 %v2802_v5 }
 0x1e7   :  { %1449 = vmatprep.subr.bf16.mxu1 %v2807_v6  ;;  %1492 = vmatprep.subr.bf16.mxu0 %v2810_v7 }
 0x1ea   :  { %1450 = vmatpush2.bf16.msra.mxu1 %v2805_v8  ;;  %1493 = vmatpush2.bf16.msra.mxu0 %v2808_v9  ;;  %v407_v9 = vrot.slane %v390_v50, %v3430_v62 }
 0x1eb   :  { %1451 = vmatprep.subr.bf16.mxu1 %v2813_v10  ;;  %1494 = vmatprep.subr.bf16.mxu0 %v2816_v11 }
 0x1ee   :  { %1452 = vmatpush2.bf16.msra.mxu1 %v2811_v12  ;;  %1495 = vmatpush2.bf16.msra.mxu0 %v2814_v13  ;;  %v3433_v13 = vsub.s32 2, %v393_v45 }
 0x1ef   :  { %1453 = vmatprep.subr.bf16.mxu1 %v2819_v14  ;;  %1496 = vmatprep.subr.bf16.mxu0 %v2822_v15 }
 0x1f2   :  { %1454 = vmatpush2.bf16.msra.mxu1 %v2817_v16  ;;  %1497 = vmatpush2.bf16.msra.mxu0 %v2820_v17  ;;  %v403_v17 = vrot.slane %v390_v50, %v3433_v13 }
 0x1f3   :  { %1455 = vmatprep.subr.bf16.mxu1 %v2825_v18  ;;  %1498 = vmatprep.subr.bf16.mxu0 %v2828_v19 }
 0x1f6   :  { %1456 = vmatpush2.bf16.msra.mxu1 %v2823_v20  ;;  %1499 = vmatpush2.bf16.msra.mxu0 %v2826_v21 }
 0x1f7   :  { %1457 = vmatprep.subr.bf16.mxu1 %v2831_v22  ;;  %1500 = vmatprep.subr.bf16.mxu0 %v2834_v23 }
 0x1fa   :  { %1458 = vmatpush2.bf16.msra.mxu1 %v2829_v24  ;;  %1501 = vmatpush2.bf16.msra.mxu0 %v2832_v25 }
 0x1fb   :  { %1459 = vmatprep.subr.bf16.mxu1 %v2837_v26  ;;  %1502 = vmatprep.subr.bf16.mxu0 %v2840_v27 }
 0x1fe   :  { %1460 = vmatpush2.bf16.msra.mxu1 %v2835_v28  ;;  %1503 = vmatpush2.bf16.msra.mxu0 %v2838_v29 }
 0x1ff   :  { %1461 = vmatprep.subr.bf16.mxu1 %v2843_v33  ;;  %1504 = vmatprep.subr.bf16.mxu0 %v2846_v34 }
 0x202   :  { %1462 = vmatpush2.bf16.msra.mxu1 %v2841_v36  ;;  %1505 = vmatpush2.bf16.msra.mxu0 %v2844_v37 }
 0x203   :  { %1463 = vmatprep.subr.bf16.mxu1 %v2849_v38  ;;  %1506 = vmatprep.subr.bf16.mxu0 %v2852_v39  ;;  %v155_v39 = vld [vmem:[#allocation10] sm:$0xff] }
 0x206   :  { %1464 = vmatpush2.bf16.msra.mxu1 %v2847_v40  ;;  %1507 = vmatpush2.bf16.msra.mxu0 %v2850_v41 }
 0x207   :  { %1977 = vmatprep.subr.bf16.mxu1 %v2855_v42  ;;  %2020 = vmatprep.subr.bf16.mxu0 %v2858_v43 }
 0x269   :  { %v606_v44 = vpop.f32.mrf.mxu1  ;;  %v649_v46 = vpop.f32.mrf.mxu0 }
 0x26a   :  { %v607_v57 = vadd.f32 %v606_v44, %v395_v53  ;;  %v650_v21 = vadd.f32 %v649_v46, %v403_v17 }
 0x26b   :  { %v608_v47 = vpop.f32.mrf.mxu1  ;;  %v651_v49 = vpop.f32.mrf.mxu0 }
 0x26c   :  { %v609_v59 = vadd.f32 %v608_v47, %v399_v55  ;;  %v652_v16 = vadd.f32 %v651_v49, %v407_v9  ;;  %v156_v47 = vld [vmem:[#allocation10 + $0x8] sm:$0xff] }
 0x26d   :  { %v610_v52 = vpop.f32.mrf.mxu1  ;;  %v653_v54 = vpop.f32.mrf.mxu0 }
 0x26e   :  { %v611_v1 = vadd.f32 %v610_v52, %v395_v53  ;;  %v654_v28 = vadd.f32 %v653_v54, %v403_v17  ;;  %v2882_v17 = vld [vmem:[#allocation14 + $0x26c] ss:$16 sps:$4 sm:$0xff]  }
 0x26f   :  { %v612_v56 = vpop.f32.mrf.mxu1  ;;  %v655_v32 = vpop.f32.mrf.mxu0 }
 0x270   :  { %v613_v5 = vadd.f32 %v612_v56, %v399_v55  ;;  %v656_v20 = vadd.f32 %v655_v32, %v407_v9  ;;  %v2865_v9 = vld [vmem:[#allocation14 + $0x2a0] ss:$16 sps:$4 sm:$0xff]  }
 0x289   :  { %v917_v58 = vpop.f32.mrf.mxu1  ;;  %v960_v61 = vpop.f32.mrf.mxu0 }
 0x28a   :  { %v969_v60 = vadd.f32 %v917_v58, %v607_v57  ;;  %v971_v25 = vadd.f32 %v960_v61, %v650_v21  ;;  %v2888_v21 = vld [vmem:[#allocation14 + $0x24c] ss:$16 sps:$4 sm:$0xff]  }
 0x28b   :  { %v919_v63 = vpop.f32.mrf.mxu1  ;;  %v962_v7 = vpop.f32.mrf.mxu0 }
 0x28c   :  { %v2441_v2 = vmul.f32 -1.442695, %v969_v60  ;;  %v970_v3 = vadd.f32 %v919_v63, %v609_v59  ;;  %v972_v18 = vadd.f32 %v962_v7, %v652_v16  ;;  %v2853_v63 = vld [vmem:[#allocation14 + $0x2e0] ss:$16 sps:$4 sm:$0xff]   ;;  %v2867_v7 = vld [vmem:[#allocation14 + $0x2a4] ss:$16 sps:$4 sm:$0xff]  }
 0x28d   :  { %v921_v4 = vpop.f32.mrf.mxu1  ;;  %v964_v14 = vpop.f32.mrf.mxu0  ;;  %v2879_v16 = vld [vmem:[#allocation14 + $0x264] ss:$16 sps:$4 sm:$0xff]  }
 0x28e   :  { %2973 = vpow2.f32 %v2441_v2  ;;  %v2443_v6 = vmul.f32 -1.442695, %v970_v3  ;;  %v973_v8 = vadd.f32 %v921_v4, %v611_v1  ;;  %v2445_v22 = vmul.f32 -1.442695, %v972_v18  ;;  %v2856_v1 = vld [vmem:[#allocation14 + $0x2e8] ss:$16 sps:$4 sm:$0xff]  }
 0x28f   :  { %v923_v10 = vpop.f32.mrf.mxu1  ;;  %v966_v19 = vpop.f32.mrf.mxu0  ;;  %v975_v33 = vadd.f32 %v964_v14, %v654_v28  ;;  %v2861_v3 = vld [vmem:[#allocation14 + $0x2c4] ss:$16 sps:$4 sm:$0xff]   ;;  %v2864_v4 = vld [vmem:[#allocation14 + $0x2cc] ss:$16 sps:$4 sm:$0xff]   ;;  %v2871_v14 = vld [vmem:[#allocation14 + $0x280] ss:$16 sps:$4 sm:$0xff]  }
 0x290   :  { %2975 = vpow2.f32 %v2443_v6  ;;  %v2442_v11 = vmul.f32 -1.442695, %v973_v8  ;;  %v974_v12 = vadd.f32 %v923_v10, %v613_v5  ;;  %v976_v23 = vadd.f32 %v966_v19, %v656_v20  ;;  %v2859_v5 = vld [vmem:[#allocation14 + $0x2c0] ss:$16 sps:$4 sm:$0xff]   ;;  %v2862_v6 = vld [vmem:[#allocation14 + $0x2c8] ss:$16 sps:$4 sm:$0xff]  }
 0x291   :  { %v2870_v8 = vld [vmem:[#allocation14 + $0x2ac] ss:$16 sps:$4 sm:$0xff]   ;;  %v2868_v10 = vld [vmem:[#allocation14 + $0x2a8] ss:$16 sps:$4 sm:$0xff]   ;;  %v2877_v18 = vld [vmem:[#allocation14 + $0x260] ss:$16 sps:$4 sm:$0xff]  }
 0x292   :  { %2977 = vpow2.f32 %v2442_v11  ;;  %v2444_v15 = vmul.f32 -1.442695, %v974_v12  ;;  %v2446_v29 = vmul.f32 -1.442695, %v976_v23  ;;  %v2873_v11 = vld [vmem:[#allocation14 + $0x284] ss:$16 sps:$4 sm:$0xff]  }
 0x293   :  { %v2876_v12 = vld [vmem:[#allocation14 + $0x28c] ss:$16 sps:$4 sm:$0xff]   ;;  %v2880_v19 = vld [vmem:[#allocation14 + $0x268] ss:$16 sps:$4 sm:$0xff]   ;;  %v2885_v20 = vld [vmem:[#allocation14 + $0x244] ss:$16 sps:$4 sm:$0xff]  }
 0x294   :  { %2979 = vpow2.f32 %v2444_v15  ;;  %v2874_v15 = vld [vmem:[#allocation14 + $0x288] ss:$16 sps:$4 sm:$0xff]   ;;  %v2897_v28 = vld [vmem:[#allocation14 + $0x204] ss:$16 sps:$4 sm:$0xff]  }
 0x295   :  { %2981 = vpow2.f32 %v2445_v22  ;;  %v2883_v22 = vld [vmem:[#allocation14 + $0x240] ss:$16 sps:$4 sm:$0xff]   ;;  %v2886_v23 = vld [vmem:[#allocation14 + $0x248] ss:$16 sps:$4 sm:$0xff]  }
 0x29b   :  { %v2974_v24 = vpop.eup %2973 }
 0x29c   :  { %v983_v26 = vadd.f32 1.0, %v2974_v24  ;;  %v2891_v24 = vld [vmem:[#allocation14 + $0x224] ss:$16 sps:$4 sm:$0xff]  }
 0x29d   :  { %v2976_v27 = vpop.eup %2975 }
 0x29e   :  { %2983 = vrcp.f32 %v983_v26  ;;  %v995_v30 = vadd.f32 1.0, %v2976_v27  ;;  %v2889_v26 = vld [vmem:[#allocation14 + $0x220] ss:$16 sps:$4 sm:$0xff]   ;;  %v2892_v27 = vld [vmem:[#allocation14 + $0x228] ss:$16 sps:$4 sm:$0xff]  }
 0x29f   :  { %v2978_v31 = vpop.eup %2977  ;;  %2985 = vtanh.f32 %v971_v25  ;;  %v2894_v25 = vld [vmem:[#allocation14 + $0x22c] ss:$16 sps:$4 sm:$0xff]  }
 0x2a0   :  { %2987 = vrcp.f32 %v995_v30  ;;  %v984_v34 = vadd.f32 1.0, %v2978_v31  ;;  %v2895_v30 = vld [vmem:[#allocation14 + $0x200] ss:$16 sps:$4 sm:$0xff]   ;;  %v2898_v31 = vld [vmem:[#allocation14 + $0x208] ss:$16 sps:$4 sm:$0xff]  }
 0x2a1   :  { %v2980_v35 = vpop.eup %2979  ;;  %2989 = vpow2.f32 %v2446_v29  ;;  %v2900_v29 = vld [vmem:[#allocation14 + $0x20c] ss:$16 sps:$4 sm:$0xff]  }
 0x2a2   :  { %2991 = vrcp.f32 %v984_v34  ;;  %v996_v36 = vadd.f32 1.0, %v2980_v35  ;;  %v2982_v37 = vpop.eup %2981  ;;  %v2906_v34 = vld [vmem:[#allocation14 + $0x3ec] ss:$16 sps:$4 sm:$0xff]   ;;  %v2901_v35 = vld [vmem:[#allocation14 + $0x3e0] ss:$16 sps:$4 sm:$0xff]  }
 0x2a3   :  { %2993 = vtanh.f32 %v975_v33  ;;  %v1009_v42 = vadd.f32 1.0, %v2982_v37  ;;  %v2903_v33 = vld [vmem:[#allocation14 + $0x3e4] ss:$16 sps:$4 sm:$0xff]  }
 0x2a4   :  { %2995 = vrcp.f32 %v996_v36  ;;  %v2904_v36 = vld [vmem:[#allocation14 + $0x3e8] ss:$16 sps:$4 sm:$0xff]   ;;  %v2909_v37 = vld [vmem:[#allocation14 + $0x3c4] ss:$16 sps:$4 sm:$0xff]  }
 0x2a5   :  { %2997 = vrcp.f32 %v1009_v42  ;;  %v2918_v42 = vld [vmem:[#allocation14 + $0x3ac] ss:$16 sps:$4 sm:$0xff]  }
 0x2ab   :  { %v2984_v38 = vpop.eup %2983 }
 0x2ac   :  { %v2986_v40 = vpop.eup %2985 }
 0x2ad   :  { %v2988_v41 = vpop.eup %2987  ;;  %v1017_v44 = vmul.f32 %v2986_v40, %v2984_v38  ;;  %v2912_v38 = vld [vmem:[#allocation14 + $0x3cc] ss:$16 sps:$4 sm:$0xff]   ;;  %v2910_v40 = vld [vmem:[#allocation14 + $0x3c8] ss:$16 sps:$4 sm:$0xff]  }
 0x2ae   :  { %v2990_v43 = vpop.eup %2989  ;;  %v1015_v45 = vmul.f32 %v2988_v41, %v155_v39  ;;  %v2907_v39 = vld [vmem:[#allocation14 + $0x3c0] ss:$16 sps:$4 sm:$0xff]   ;;  %v2915_v41 = vld [vmem:[#allocation14 + $0x3a4] ss:$16 sps:$4 sm:$0xff]  }
 0x2af   :  { %v2992_v46 = vpop.eup %2991  ;;  %v1010_v53 = vadd.f32 1.0, %v2990_v43  ;;  %v2913_v43 = vld [vmem:[#allocation14 + $0x3a0] ss:$16 sps:$4 sm:$0xff]  }
 0x2b0   :  { %v2994_v49 = vpop.eup %2993  ;;  %v1019_v50 = vadd.f32 %v1017_v44, %v1015_v45  ;;  %v2916_v44 = vld [vmem:[#allocation14 + $0x3a8] ss:$16 sps:$4 sm:$0xff]   ;;  %v2921_v45 = vld [vmem:[#allocation14 + $0x384] ss:$16 sps:$4 sm:$0xff]  }
 0x2b1   :  { %v2996_v52 = vpop.eup %2995  ;;  %v1018_v54 = vmul.f32 %v2994_v49, %v2992_v46  ;;  %v2924_v46 = vld [vmem:[#allocation14 + $0x38c] ss:$16 sps:$4 sm:$0xff]   ;;  %v2922_v49 = vld [vmem:[#allocation14 + $0x388] ss:$16 sps:$4 sm:$0xff]  }
 0x2b2   :  { %2300 = vst [vmem:[#allocation20] sm:$0xff] %v1019_v50  ;;  %v1016_v55 = vmul.f32 %v2996_v52, %v156_v47  ;;  %2999 = vtanh.f32 %v1019_v50  ;;  %v2998_v57 = vpop.eup %2997  ;;  %v2919_v47 = vld [vmem:[#allocation14 + $0x380] ss:$16 sps:$4 sm:$0xff]   ;;  %v2927_v50 = vld [vmem:[#allocation14 + $0x364] ss:$16 sps:$4 sm:$0xff]  }
 0x2b3   :  { %3001 = vrcp.f32 %v1010_v53  ;;  %v2930_v52 = vld [vmem:[#allocation14 + $0x36c] ss:$16 sps:$4 sm:$0xff]   ;;  %v2925_v53 = vld [vmem:[#allocation14 + $0x360] ss:$16 sps:$4 sm:$0xff]  }
 0x2b4   :  { %v1020_v56 = vadd.f32 %v1018_v54, %v1016_v55  ;;  %v2928_v54 = vld [vmem:[#allocation14 + $0x368] ss:$16 sps:$4 sm:$0xff]   ;;  %v2933_v55 = vld [vmem:[#allocation14 + $0x344] ss:$16 sps:$4 sm:$0xff]  }
 0x2b6   :  { %2301 = vst [vmem:[#allocation20 + $0x8] sm:$0xff] %v1020_v56  ;;  %3003 = vtanh.f32 %v1020_v56  ;;  %v2936_v56 = vld [vmem:[#allocation14 + $0x34c] ss:$16 sps:$4 sm:$0xff]  }
 0x2bf   :  { %v3000_v32 = vpop.eup %2999 }
 0x2c0   :  { %v1023_v58 = vmul.f32 %v3000_v32, %v2998_v57  ;;  %v3002_v59 = vpop.eup %3001  ;;  %v2931_v57 = vld [vmem:[#allocation14 + $0x340] ss:$16 sps:$4 sm:$0xff]   ;;  %v2934_v32 = vld [vmem:[#allocation14 + $0x348] ss:$16 sps:$4 sm:$0xff]  }
 0x2c2   :  { %2288 = vst [vmem:[#allocation18] sm:$0xff] %v1023_v58 }
 0x2c3   :  { %v3004_v60 = vpop.eup %3003 }
 0x2c4   :  { %v1024_v61 = vmul.f32 %v3004_v60, %v3002_v59  ;;  %v148_v59 = vld [vmem:[#allocation8 + $0x28] sm:$0xff]  ;;  %v2939_v60 = vld [vmem:[#allocation14 + $0x324] ss:$16 sps:$4 sm:$0xff]  }
 0x2c6   :  { %v1025_v2 = vpack.c.bf16 %v1024_v61, %v1023_v58  ;;  %2289 = vst [vmem:[#allocation18 + $0x8] sm:$0xff] %v1024_v61  ;;  %v147_v58 = vld [vmem:[#allocation8 + $0x20] sm:$0xff]  ;;  %v2942_v61 = vld [vmem:[#allocation14 + $0x32c] ss:$16 sps:$4 sm:$0xff]  }
 0x2c8   :  { %1466 = vmatmul.mubr.bf16.vlgmr.msra.gmra.mxu1 %v1025_v2  ;;  %1509 = vmatmul.mubr.bf16.vlgmr.msra.gmra.mxu0 %v1025_v2  ;;  %v2940_v2 = vld [vmem:[#allocation14 + $0x328] ss:$16 sps:$4 sm:$0xff]  }
 0x2c9   :  { %1978 = vmatpush1.bf16.msra.mxu1 %v2853_v63  ;;  %2021 = vmatpush1.bf16.msra.mxu0 %v2856_v1  ;;  %v1568_v63 = vpack.c.bf16 %v148_v59, %v147_v58  ;;  %v2937_v1 = vld [vmem:[#allocation14 + $0x320] ss:$16 sps:$4 sm:$0xff]  }
 0x2ca   :  { %1979 = vmatprep.subr.bf16.mxu1 %v2861_v3  ;;  %2022 = vmatprep.subr.bf16.mxu0 %v2864_v4  ;;  %v2945_v3 = vld [vmem:[#allocation14 + $0x304] ss:$16 sps:$4 sm:$0xff]   ;;  %v2948_v4 = vld [vmem:[#allocation14 + $0x30c] ss:$16 sps:$4 sm:$0xff]  }
 0x2cb   :  { %2009 = vmatprep.mubr.bf16.mxu1 %v1568_v63  ;;  %2052 = vmatprep.mubr.bf16.mxu0 %v1568_v63 }
 0x2cd   :  { %1980 = vmatpush1.bf16.msra.mxu1 %v2859_v5  ;;  %2023 = vmatpush1.bf16.msra.mxu0 %v2862_v6  ;;  %v2943_v5 = vld [vmem:[#allocation14 + $0x300] ss:$16 sps:$4 sm:$0xff]   ;;  %v2946_v6 = vld [vmem:[#allocation14 + $0x308] ss:$16 sps:$4 sm:$0xff]  }
 0x2ce   :  { %1981 = vmatprep.subr.bf16.mxu1 %v2867_v7  ;;  %2024 = vmatprep.subr.bf16.mxu0 %v2870_v8  ;;  %v1091_v7 = vld [vmem:[%s3482_s8] sm:$0xf] }
 0x2cf   :  { %v1096_v8 = vrot.slane %v1091_v7, %v3421_v48 }
 0x2d1   :  { %1982 = vmatpush1.bf16.msra.mxu1 %v2865_v9  ;;  %2025 = vmatpush1.bf16.msra.mxu0 %v2868_v10  ;;  %v1100_v9 = vrot.slane %v1091_v7, %v3426_v51 }
 0x2d2   :  { %1983 = vmatprep.subr.bf16.mxu1 %v2873_v11  ;;  %2026 = vmatprep.subr.bf16.mxu0 %v2876_v12 }
 0x2d5   :  { %1984 = vmatpush1.bf16.msra.mxu1 %v2871_v14  ;;  %2027 = vmatpush1.bf16.msra.mxu0 %v2874_v15 }
 0x2d6   :  { %1985 = vmatprep.subr.bf16.mxu1 %v2879_v16  ;;  %2028 = vmatprep.subr.bf16.mxu0 %v2882_v17 }
 0x2d9   :  { %1986 = vmatpush1.bf16.msra.mxu1 %v2877_v18  ;;  %2029 = vmatpush1.bf16.msra.mxu0 %v2880_v19 }
 0x2da   :  { %1987 = vmatprep.subr.bf16.mxu1 %v2885_v20  ;;  %2030 = vmatprep.subr.bf16.mxu0 %v2888_v21 }
 0x2dd   :  { %1988 = vmatpush1.bf16.msra.mxu1 %v2883_v22  ;;  %2031 = vmatpush1.bf16.msra.mxu0 %v2886_v23 }
 0x2de   :  { %1989 = vmatprep.subr.bf16.mxu1 %v2891_v24  ;;  %2032 = vmatprep.subr.bf16.mxu0 %v2894_v25  ;;  %v1108_v24 = vrot.slane %v1091_v7, %v3430_v62 }
 0x2e1   :  { %1990 = vmatpush1.bf16.msra.mxu1 %v2889_v26  ;;  %2033 = vmatpush1.bf16.msra.mxu0 %v2892_v27 }
 0x2e2   :  { %1991 = vmatprep.subr.bf16.mxu1 %v2897_v28  ;;  %2034 = vmatprep.subr.bf16.mxu0 %v2900_v29  ;;  %v1104_v29 = vrot.slane %v1091_v7, %v3433_v13 }
 0x2e5   :  { %1992 = vmatpush1.bf16.msra.mxu1 %v2895_v30  ;;  %2035 = vmatpush1.bf16.msra.mxu0 %v2898_v31 }
 0x2e6   :  { %1993 = vmatprep.subr.bf16.mxu1 %v2903_v33  ;;  %2036 = vmatprep.subr.bf16.mxu0 %v2906_v34 }
 0x2e9   :  { %1994 = vmatpush2.bf16.msra.mxu1 %v2901_v35  ;;  %2037 = vmatpush2.bf16.msra.mxu0 %v2904_v36 }
 0x2ea   :  { %1995 = vmatprep.subr.bf16.mxu1 %v2909_v37  ;;  %2038 = vmatprep.subr.bf16.mxu0 %v2912_v38 }
 0x2ed   :  { %1996 = vmatpush2.bf16.msra.mxu1 %v2907_v39  ;;  %2039 = vmatpush2.bf16.msra.mxu0 %v2910_v40 }
 0x2ee   :  { %1997 = vmatprep.subr.bf16.mxu1 %v2915_v41  ;;  %2040 = vmatprep.subr.bf16.mxu0 %v2918_v42 }
 0x2f1   :  { %1998 = vmatpush2.bf16.msra.mxu1 %v2913_v43  ;;  %2041 = vmatpush2.bf16.msra.mxu0 %v2916_v44 }
 0x2f2   :  { %1999 = vmatprep.subr.bf16.mxu1 %v2921_v45  ;;  %2042 = vmatprep.subr.bf16.mxu0 %v2924_v46  ;;  %v157_v46 = vld [vmem:[#allocation10 + $0x10] sm:$0xff] }
 0x2f5   :  { %2000 = vmatpush2.bf16.msra.mxu1 %v2919_v47  ;;  %2043 = vmatpush2.bf16.msra.mxu0 %v2922_v49 }
 0x2f6   :  { %2001 = vmatprep.subr.bf16.mxu1 %v2927_v50  ;;  %2044 = vmatprep.subr.bf16.mxu0 %v2930_v52 }
 0x2f9   :  { %2002 = vmatpush2.bf16.msra.mxu1 %v2925_v53  ;;  %2045 = vmatpush2.bf16.msra.mxu0 %v2928_v54 }
 0x2fa   :  { %2003 = vmatprep.subr.bf16.mxu1 %v2933_v55  ;;  %2046 = vmatprep.subr.bf16.mxu0 %v2936_v56  ;;  %v158_v56 = vld [vmem:[#allocation10 + $0x18] sm:$0xff] }
 0x2fd   :  { %2004 = vmatpush2.bf16.msra.mxu1 %v2931_v57  ;;  %2047 = vmatpush2.bf16.msra.mxu0 %v2934_v32 }
 0x2fe   :  { %2005 = vmatprep.subr.bf16.mxu1 %v2939_v60  ;;  %2048 = vmatprep.subr.bf16.mxu0 %v2942_v61 }
 0x301   :  { %2006 = vmatpush2.bf16.msra.mxu1 %v2937_v1  ;;  %2049 = vmatpush2.bf16.msra.mxu0 %v2940_v2 }
 0x302   :  { %2007 = vmatprep.subr.bf16.mxu1 %v2945_v3  ;;  %2050 = vmatprep.subr.bf16.mxu0 %v2948_v4 }
 0x305   :  { %2008 = vmatpush2.bf16.msra.mxu1 %v2943_v5  ;;  %2051 = vmatpush2.bf16.msra.mxu0 %v2946_v6 }
 0x388   :  { %v1467_v10 = vpop.f32.mrf.mxu1  ;;  %v1510_v12 = vpop.f32.mrf.mxu0 }
 0x389   :  { %v1468_v11 = vadd.f32 %v1467_v10, %v1096_v8  ;;  %v1511_v34 = vadd.f32 %v1510_v12, %v1104_v29  ;;  %v2954_v10 = vld [vmem:[#allocation16 + $0x64] ss:$8 sps:$4 sm:$0xff]   ;;  %v2957_v12 = vld [vmem:[#allocation16 + $0x54] ss:$8 sps:$4 sm:$0xff]  }
 0x38a   :  { %v1469_v14 = vpop.f32.mrf.mxu1  ;;  %v1512_v19 = vpop.f32.mrf.mxu0 }
 0x38b   :  { %v2511_v15 = vmul.f32 -1.442695, %v1468_v11  ;;  %v1470_v16 = vadd.f32 %v1469_v14, %v1100_v9  ;;  %v1513_v27 = vadd.f32 %v1512_v19, %v1108_v24  ;;  %v2952_v11 = vld [vmem:[#allocation16 + $0x60] ss:$8 sps:$4 sm:$0xff]   ;;  %v2955_v14 = vld [vmem:[#allocation16 + $0x50] ss:$8 sps:$4 sm:$0xff]  }
 0x38c   :  { %v1471_v17 = vpop.f32.mrf.mxu1  ;;  %v1514_v25 = vpop.f32.mrf.mxu0  ;;  %v2964_v19 = vld [vmem:[#allocation16 + $0x20] ss:$8 sps:$4 sm:$0xff]  }
 0x38d   :  { %3005 = vpow2.f32 %v2511_v15  ;;  %v2513_v18 = vmul.f32 -1.442695, %v1470_v16  ;;  %v1472_v20 = vadd.f32 %v1471_v17, %v1096_v8  ;;  %v2515_v30 = vmul.f32 -1.442695, %v1513_v27  ;;  %v2951_v8 = vld [vmem:[#allocation16 + $0x74] ss:$8 sps:$4 sm:$0xff]  }
 0x38e   :  { %v1473_v21 = vpop.f32.mrf.mxu1  ;;  %v1516_v28 = vpop.f32.mrf.mxu0  ;;  %v1515_v40 = vadd.f32 %v1514_v25, %v1104_v29  ;;  %2220 = vmatprep.subr.bf16.mxu1 %v2951_v8  ;;  %v2960_v15 = vld [vmem:[#allocation16 + $0x44] ss:$8 sps:$4 sm:$0xff]   ;;  %v2958_v16 = vld [vmem:[#allocation16 + $0x40] ss:$8 sps:$4 sm:$0xff]   ;;  %v2963_v17 = vld [vmem:[#allocation16 + $0x34] ss:$8 sps:$4 sm:$0xff]  }
 0x38f   :  { %3007 = vpow2.f32 %v2513_v18  ;;  %v2512_v22 = vmul.f32 -1.442695, %v1472_v20  ;;  %v1474_v23 = vadd.f32 %v1473_v21, %v1100_v9  ;;  %v1517_v31 = vadd.f32 %v1516_v28, %v1108_v24  ;;  %v2949_v9 = vld [vmem:[#allocation16 + $0x70] ss:$8 sps:$4 sm:$0xff]   ;;  %v2969_v20 = vld [vmem:[#allocation16 + $0x14] ss:$8 sps:$4 sm:$0xff]  }
 0x390   :  { %v2961_v18 = vld [vmem:[#allocation16 + $0x30] ss:$8 sps:$4 sm:$0xff]   ;;  %v2517_v24 = vld [vmem:[%s3482_s8 + $0x4] sm:$0xf]  ;;  %s3296_s8 = smov [#allocation18]  }
 0x391   :  { %3009 = vpow2.f32 %v2512_v22  ;;  %v2514_v26 = vmul.f32 -1.442695, %v1474_v23  ;;  %v2516_v37 = vmul.f32 -1.442695, %v1517_v31  ;;  %v2967_v21 = vld [vmem:[#allocation16 + $0x10] ss:$8 sps:$4 sm:$0xff]   ;;  %v1640_v25 = vrot.slane %v2517_v24, %v3421_v48 }
 0x392   :  { %v2972_v22 = vld [vmem:[#allocation16 + $0x4] ss:$8 sps:$4 sm:$0xff]   ;;  %v2970_v23 = vld [vmem:[#allocation16] ss:$8 sps:$4 sm:$0xff]   ;;  %s2323_s2 = sshll.u32 %s3296_s8, 4  ;;  %s2324_s2 = int_to_ptr.vmem [resolvable:$true] %s2323_s2 }
 0x393   :  { %3011 = vpow2.f32 %v2514_v26  ;;  %v1644_v26 = vrot.slane %v2517_v24, %v3426_v51  ;;  %s3209_s6 = scalar_lea.vmem %s2324_s2, 768  ;;  %p3214_p8 = scmp.lt.s32.totalorder %s2324_s2, %s2324_s2 }
 0x394   :  { %3013 = vpow2.f32 %v2515_v30  ;;  %p3210_p7 = scmp.ne.s32.totalorder %s2324_s2, %s3209_s6  ;;  %p3215_p9 = scmp.lt.s32.totalorder %s3209_s6, %s3209_s6 }
 0x396   :  { %p3216_p10 = por %p3215_p9, %p3214_p8 }
 0x398   :  { %p3217_p11 = pnand %p3216_p10, %p3210_p7 }
 0x39a   :  { %v3006_v33 = vpop.eup %3005 }
 0x39b   :  { %v1525_v35 = vadd.f32 1.0, %v3006_v33 }
 0x39c   :  { %v3008_v36 = vpop.eup %3007 }
 0x39d   :  { %3015 = vrcp.f32 %v1525_v35  ;;  %v1537_v38 = vadd.f32 1.0, %v3008_v36 }
 0x39e   :  { %v3010_v39 = vpop.eup %3009  ;;  %3017 = vtanh.f32 %v1511_v34 }
 0x39f   :  { %3019 = vrcp.f32 %v1537_v38  ;;  %v1526_v41 = vadd.f32 1.0, %v3010_v39 }
 0x3a0   :  { %v3012_v42 = vpop.eup %3011  ;;  %3021 = vpow2.f32 %v2516_v37 }
 0x3a1   :  { %3023 = vrcp.f32 %v1526_v41  ;;  %v1538_v43 = vadd.f32 1.0, %v3012_v42  ;;  %v3014_v44 = vpop.eup %3013  ;;  %v1652_v41 = vrot.slane %v2517_v24, %v3430_v62 }
 0x3a2   :  { %3025 = vtanh.f32 %v1515_v40  ;;  %v1551_v50 = vadd.f32 1.0, %v3014_v44 }
 0x3a3   :  { %3027 = vrcp.f32 %v1538_v43 }
 0x3a4   :  { %3029 = vrcp.f32 %v1551_v50 }
 0x3aa   :  { %v3016_v45 = vpop.eup %3015 }
 0x3ab   :  { %v3018_v47 = vpop.eup %3017 }
 0x3ac   :  { %v3020_v49 = vpop.eup %3019  ;;  %v1559_v53 = vmul.f32 %v3018_v47, %v3016_v45 }
 0x3ad   :  { %v3022_v52 = vpop.eup %3021  ;;  %v1557_v54 = vmul.f32 %v3020_v49, %v157_v46  ;;  %v1648_v46 = vrot.slane %v2517_v24, %v3433_v13 }
 0x3ae   :  { %v3024_v55 = vpop.eup %3023  ;;  %v1552_v59 = vadd.f32 1.0, %v3022_v52 }
 0x3af   :  { %v3026_v57 = vpop.eup %3025  ;;  %v1561_v32 = vadd.f32 %v1559_v53, %v1557_v54 }
 0x3b0   :  { %v3028_v58 = vpop.eup %3027  ;;  %v1560_v60 = vmul.f32 %v3026_v57, %v3024_v55 }
 0x3b1   :  { %2302 = vst [vmem:[#allocation20 + $0x10] sm:$0xff] %v1561_v32  ;;  %v1558_v61 = vmul.f32 %v3028_v58, %v158_v56  ;;  %3031 = vtanh.f32 %v1561_v32  ;;  %v3030_v1 = vpop.eup %3029 }
 0x3b2   :  { %3033 = vrcp.f32 %v1552_v59 }
 0x3b3   :  { %v1562_v63 = vadd.f32 %v1560_v60, %v1558_v61  ;;  %v159_v61 = vld [vmem:[#allocation10 + $0x20] sm:$0xff] }
 0x3b5   :  { %2303 = vst [vmem:[#allocation20 + $0x18] sm:$0xff] %v1562_v63  ;;  %3035 = vtanh.f32 %v1562_v63 }
 0x3be   :  { %v3032_v2 = vpop.eup %3031 }
 0x3bf   :  { %v1565_v3 = vmul.f32 %v3032_v2, %v3030_v1  ;;  %v3034_v4 = vpop.eup %3033 }
 0x3c1   :  { %2290 = vst [vmem:[#allocation18 + $0x10] sm:$0xff] %v1565_v3 }
 0x3c2   :  { %v3036_v5 = vpop.eup %3035 }
 0x3c3   :  { %v1566_v6 = vmul.f32 %v3036_v5, %v3034_v4 }
 0x3c5   :  { %v1567_v7 = vpack.c.bf16 %v1566_v6, %v1565_v3  ;;  %2291 = vst [vmem:[#allocation18 + $0x18] sm:$0xff] %v1566_v6 }
 0x3c7   :  { %2010 = vmatmul.mubr.bf16.vlgmr.msra.gmra.mxu1 %v1567_v7  ;;  %2053 = vmatmul.mubr.bf16.vlgmr.msra.gmra.mxu0 %v1567_v7  ;;  %v160_v7 = vld [vmem:[#allocation10 + $0x28] sm:$0xff] }
 0x3c8   :  { %2252 = vmatprep.mubr.bf16.mxu1 %v3294_v0  ;;  %2221 = vmatpush1.bf16.msra.mxu1 %v2949_v9  ;;  %v2966_v0 = vld [vmem:[#allocation16 + $0x24] ss:$8 sps:$4 sm:$0xff]  }
 0x3c9   :  { %2222 = vmatprep.subr.bf16.mxu1 %v2954_v10 }
 0x3cc   :  { %2223 = vmatpush1.bf16.msra.mxu1 %v2952_v11 }
 0x3cd   :  { %2224 = vmatprep.subr.bf16.mxu1 %v2957_v12 }
 0x3d0   :  { %2225 = vmatpush1.bf16.msra.mxu1 %v2955_v14 }
 0x3d1   :  { %2226 = vmatprep.subr.bf16.mxu1 %v2960_v15 }
 0x3d4   :  { %2227 = vmatpush1.bf16.msra.mxu1 %v2958_v16 }
 0x3d5   :  { %2228 = vmatprep.subr.bf16.mxu1 %v2963_v17 }
 0x3d8   :  { %2229 = vmatpush1.bf16.msra.mxu1 %v2961_v18 }
 0x3d9   :  { %2230 = vmatprep.subr.bf16.mxu1 %v2966_v0 }
 0x3dc   :  { %2231 = vmatpush1.bf16.msra.mxu1 %v2964_v19 }
 0x3dd   :  { %2232 = vmatprep.subr.bf16.mxu1 %v2969_v20 }
 0x3e0   :  { %2233 = vmatpush1.bf16.msra.mxu1 %v2967_v21 }
 0x3e1   :  { %2234 = vmatprep.subr.bf16.mxu1 %v2972_v22 }
 0x3e4   :  { %2235 = vmatpush1.bf16.msra.mxu1 %v2970_v23 }
 0x487   :  { %v2011_v27 = vpop.f32.mrf.mxu1  ;;  %v2054_v29 = vpop.f32.mrf.mxu0 }
 0x488   :  { %v2012_v28 = vadd.f32 %v2011_v27, %v1640_v25  ;;  %v2055_v52 = vadd.f32 %v2054_v29, %v1648_v46 }
 0x489   :  { %v2013_v30 = vpop.f32.mrf.mxu1  ;;  %v2056_v36 = vpop.f32.mrf.mxu0 }
 0x48a   :  { %v2582_v31 = vmul.f32 -1.442695, %v2012_v28  ;;  %v2014_v33 = vadd.f32 %v2013_v30, %v1644_v26  ;;  %v2057_v44 = vadd.f32 %v2056_v36, %v1652_v41 }
 0x48b   :  { %v2015_v34 = vpop.f32.mrf.mxu1  ;;  %v2058_v42 = vpop.f32.mrf.mxu0 }
 0x48c   :  { %3037 = vpow2.f32 %v2582_v31  ;;  %v2584_v35 = vmul.f32 -1.442695, %v2014_v33  ;;  %v2016_v37 = vadd.f32 %v2015_v34, %v1640_v25  ;;  %v2586_v47 = vmul.f32 -1.442695, %v2057_v44 }
 0x48d   :  { %v2017_v38 = vpop.f32.mrf.mxu1  ;;  %v2060_v45 = vpop.f32.mrf.mxu0  ;;  %v2059_v62 = vadd.f32 %v2058_v42, %v1648_v46 }
 0x48e   :  { %3039 = vpow2.f32 %v2584_v35  ;;  %v2583_v39 = vmul.f32 -1.442695, %v2016_v37  ;;  %v2018_v40 = vadd.f32 %v2017_v38, %v1644_v26  ;;  %v2061_v49 = vadd.f32 %v2060_v45, %v1652_v41 }
 0x490   :  { %3041 = vpow2.f32 %v2583_v39  ;;  %v2585_v43 = vmul.f32 -1.442695, %v2018_v40  ;;  %v2587_v55 = vmul.f32 -1.442695, %v2061_v49 }
 0x492   :  { %3043 = vpow2.f32 %v2585_v43 }
 0x493   :  { %3045 = vpow2.f32 %v2586_v47 }
 0x499   :  { %v3038_v50 = vpop.eup %3037 }
 0x49a   :  { %v2069_v53 = vadd.f32 1.0, %v3038_v50 }
 0x49b   :  { %v3040_v54 = vpop.eup %3039 }
 0x49c   :  { %3047 = vrcp.f32 %v2069_v53  ;;  %v2081_v56 = vadd.f32 1.0, %v3040_v54 }
 0x49d   :  { %v3042_v57 = vpop.eup %3041  ;;  %3049 = vtanh.f32 %v2055_v52 }
 0x49e   :  { %3051 = vrcp.f32 %v2081_v56  ;;  %v2070_v32 = vadd.f32 1.0, %v3042_v57 }
 0x49f   :  { %v3044_v58 = vpop.eup %3043  ;;  %3053 = vpow2.f32 %v2587_v55 }
 0x4a0   :  { %3055 = vrcp.f32 %v2070_v32  ;;  %v2082_v59 = vadd.f32 1.0, %v3044_v58  ;;  %v3046_v13 = vpop.eup %3045 }
 0x4a1   :  { %3057 = vtanh.f32 %v2059_v62  ;;  %v2095_v2 = vadd.f32 1.0, %v3046_v13 }
 0x4a2   :  { %3059 = vrcp.f32 %v2082_v59 }
 0x4a3   :  { %3061 = vrcp.f32 %v2095_v2 }
 0x4a9   :  { %v3048_v60 = vpop.eup %3047 }
 0x4aa   :  { %v3050_v63 = vpop.eup %3049 }
 0x4ab   :  { %v3052_v1 = vpop.eup %3051  ;;  %v2103_v4 = vmul.f32 %v3050_v63, %v3048_v60 }
 0x4ac   :  { %v3054_v3 = vpop.eup %3053  ;;  %v2101_v5 = vmul.f32 %v3052_v1, %v159_v61 }
 0x4ad   :  { %v3056_v6 = vpop.eup %3055  ;;  %v2096_v11 = vadd.f32 1.0, %v3054_v3 }
 0x4ae   :  { %v3058_v8 = vpop.eup %3057  ;;  %v2105_v9 = vadd.f32 %v2103_v4, %v2101_v5 }
 0x4af   :  { %v3060_v10 = vpop.eup %3059  ;;  %v2104_v12 = vmul.f32 %v3058_v8, %v3056_v6 }
 0x4b0   :  { %2304 = vst [vmem:[#allocation20 + $0x20] sm:$0xff] %v2105_v9  ;;  %v2102_v14 = vmul.f32 %v3060_v10, %v160_v7  ;;  %3063 = vtanh.f32 %v2105_v9  ;;  %v3062_v16 = vpop.eup %3061 }
 0x4b1   :  { %3065 = vrcp.f32 %v2096_v11 }
 0x4b2   :  { %v2106_v15 = vadd.f32 %v2104_v12, %v2102_v14 }
 0x4b4   :  { %2305 = vst [vmem:[#allocation20 + $0x28] sm:$0xff] %v2106_v15  ;;  %3067 = vtanh.f32 %v2106_v15 }
 0x4bd   :  { %v3064_v17 = vpop.eup %3063 }
 0x4be   :  { %v2109_v18 = vmul.f32 %v3064_v17, %v3062_v16  ;;  %v3066_v0 = vpop.eup %3065 }
 0x4c0   :  { %2292 = vst [vmem:[#allocation18 + $0x20] sm:$0xff] %v2109_v18 }
 0x4c1   :  { %v3068_v19 = vpop.eup %3067 }
 0x4c2   :  { %v2110_v20 = vmul.f32 %v3068_v19, %v3066_v0 }
 0x4c4   :  { %v2111_v21 = vpack.c.bf16 %v2110_v20, %v2109_v18  ;;  %2293 = vst [vmem:[#allocation18 + $0x28] sm:$0xff] %v2110_v20 }
 0x4c6   :  { %2253 = vmatmul.mubr.bf16.vlgmr.msra.gmra.mxu1 %v2111_v21 }
 0x4c7   :  { %3220 = shalt.err (!%p3217_p11)
}
 0x4c8   :  { %2329 = dma.vmem_to_hbm [thread:$0]  %s2324_s2, 768, %s3486_s12, [#allocation19], %s3282_s28, %s3282_s28, %s3283_s29  }
 0x4c9   :  { %s3297_s1 = smov [#allocation20]  }
 0x4ca   :  { %s2335_s24 = sshll.u32 %s3297_s1, 4  ;;  %s2336_s24 = int_to_ptr.vmem [resolvable:$true] %s2335_s24 }
 0x4cb   :  { %s3229_s25 = scalar_lea.vmem %s2336_s24, 768  ;;  %p3234_p13 = scmp.lt.s32.totalorder %s2336_s24, %s2336_s24 }
 0x4cc   :  { %p3230_p12 = scmp.ne.s32.totalorder %s2336_s24, %s3229_s25  ;;  %p3235_p0 = scmp.lt.s32.totalorder %s3229_s25, %s3229_s25 }
 0x4ce   :  { %p3236_p1 = por %p3235_p0, %p3234_p13 }
 0x4d0   :  { %p3237_p2 = pnand %p3236_p1, %p3230_p12 }
 0x4d2   :  { %3240 = shalt.err (!%p3237_p2)
}
 0x4d3   :  { %2341 = dma.vmem_to_hbm [thread:$0]  %s2336_s24, 768, %s3487_s13, [#allocation19], %s3282_s28, %s3282_s28, %s3283_s29  }
 0x4d4   :  { %v2128_v22 = vld [vmem:[%s3484_s10] sm:$0x3]  ;;  %s3298_s12 = smov [#allocation17]  }
 0x4d5   :  { %v2133_v23 = vrot.slane %v2128_v22, %v3421_v48  ;;  %v2137_v24 = vrot.slane %v2128_v22, %v3426_v51  ;;  %s2311_s30 = sshll.u32 %s3298_s12, 4  ;;  %s2312_s30 = int_to_ptr.vmem [resolvable:$true] %s2311_s30 }
 0x4d6   :  { %s3249_s10 = scalar_lea.vmem %s2312_s30, 512  ;;  %p3254_p4 = scmp.lt.s32.totalorder %s2312_s30, %s2312_s30 }
 0x4d7   :  { %p3250_p3 = scmp.ne.s32.totalorder %s2312_s30, %s3249_s10  ;;  %p3255_p5 = scmp.lt.s32.totalorder %s3249_s10, %s3249_s10 }
 0x4d9   :  { %p3256_p6 = por %p3255_p5, %p3254_p4 }
 0x4db   :  { %p3257_p7 = pnand %p3256_p6, %p3250_p3 }
 0x586   :  { %v2254_v25 = vpop.f32.mrf.mxu1 }
 0x587   :  { %v2255_v26 = vadd.f32 %v2254_v25, %v2133_v23 }
 0x588   :  { %v2256_v27 = vpop.f32.mrf.mxu1 }
 0x589   :  { %2263 = vst [vmem:[#allocation17] sm:$0xff] %v2255_v26  ;;  %v2257_v28 = vadd.f32 %v2256_v27, %v2137_v24 }
 0x58a   :  { %v2258_v29 = vpop.f32.mrf.mxu1 }
 0x58b   :  { %2264 = vst [vmem:[#allocation17 + $0x8] sm:$0xff] %v2257_v28  ;;  %v2259_v30 = vadd.f32 %v2258_v29, %v2133_v23 }
 0x58c   :  { %v2260_v31 = vpop.f32.mrf.mxu1 }
 0x58d   :  { %2265 = vst [vmem:[#allocation17 + $0x10] sm:$0xff] %v2259_v30  ;;  %v2261_v33 = vadd.f32 %v2260_v31, %v2137_v24 }
 0x58f   :  { %2266 = vst [vmem:[#allocation17 + $0x18] sm:$0xff] %v2261_v33 }
 0x590   :  { %3260 = shalt.err (!%p3257_p7)
}
 0x591   :  { %2317 = dma.vmem_to_hbm [thread:$0]  %s2312_s30, 512, %s3485_s11, [#allocation7], %s3285_s18, %s3285_s18, %s3286_s19  }
 0x592   :  { %3277 = dma.done.wait [#allocation7], 512  }
 0x593   :  { %3278 = vsyncadd [#allocation7], 4294966784 }
 0x594   :  { %3279 = dma.done.wait [#allocation19], 1536  }
 0x595   :  { %3280 = vsyncadd [#allocation19], 4294965760 }
 0x596   :  { %2351 = vsyncpa [#allocation6], 1 }
 0x597   :  { %2352 = vsyncpa [#allocation9], 1 }
 0x598   :  { %2353 = vsyncpa [#allocation12], 1 }
 0x599   :  { %2354 = vsyncpa [#allocation15], 1 }
 0x59a   :  { %2355 = vsyncpa [#allocation7], 1 }
 0x59b   :  { %2356 = vsyncpa [#allocation19], 1 }

</bundles_post_ra>
